<compile_context>
chip_gen: v5e
topology: v5e:2x2
jax: 0.10.0
libtpu: 0.0.40
codegen_flags: <defaults>
</compile_context>

<pallas_src>
import jax
import jax.numpy as jnp
from jax import lax
from jax.experimental import pallas as pl
from jax.experimental.pallas import tpu as pltpu

EPS = 1e-5  # nn.InstanceNorm2d default eps, affine=False (no gamma/beta)


# ---------------------------------------------------------------------------
# Fused kernel: conv1 -> IN -> ReLU -> conv2 -> IN -> + x   (one sample)
# ---------------------------------------------------------------------------
def _resnet_block_kernel(x_ref, w1_ref, w2_ref, o_ref):
    # x_ref : (H, W, Cp)     f32, channels-last, channel-padded, spatially UNPADDED
    # w*_ref: (3, 3*Cp, Cp)  bf16, layout [ky, kx*Cp + cin, cout] (kx stacked on K)
    # o_ref : (H, W, Cp)     f32
    H, W, Cp = x_ref.shape
    HW = H * W
    inv_hw = 1.0 / float(HW)

    def conv3x3(src, w_ref):
        # src: (H, W, Cp) bf16.  Reflection halos built in VMEM:
        #   rows    : [row1, rows 0..H-1, row H-2]  (leading-dim concat, contiguous)
        #   kx slabs: slab_kx[r, w, :] = reflect_pad(src)[r, w + kx, :], stacked
        #             along the contraction dim to deepen K for the MXU.
        rowpad = jnp.concatenate([src[1:2], src, src[H - 2:H - 1]], axis=0)  # (H+2, W, Cp)
        slab0 = jnp.concatenate([rowpad[:, 1:2, :], rowpad[:, 0:W - 1, :]], axis=1)
        slab2 = jnp.concatenate([rowpad[:, 1:W, :], rowpad[:, W - 2:W - 1, :]], axis=1)
        big = jnp.concatenate([slab0, rowpad, slab2], axis=-1)              # (H+2, W, 3*Cp)
        acc = jnp.zeros((HW, Cp), jnp.float32)
        for ky in range(3):  # static unroll: 3 deep-K MXU matmuls, f32 accumulate
            acc = acc + jnp.dot(big[ky:ky + H].reshape(HW, 3 * Cp), w_ref[ky],
                                preferred_element_type=jnp.float32)
        return acc                                                          # (HW, Cp) f32

    def instance_norm(y):
        # Per-channel biased mean / E[x^2] over the spatial (sublane) axis, f32.
        # TODO(synk): chunked reduction for very large H*W to shave peak VMEM.
        m = jnp.sum(y, axis=0, keepdims=True) * inv_hw
        m2 = jnp.sum(y * y, axis=0, keepdims=True) * inv_hw
        var = jnp.maximum(m2 - m * m, 0.0)  # clamp keeps zero-padded channels exactly 0
        return (y - m) * lax.rsqrt(var + EPS)

    x = x_ref[...]                     # f32 — also used for the exact residual add
    x_bf = x.astype(jnp.bfloat16)      # bf16 MXU operand

    # ---- stage 1: conv1(reflect_pad(x)) -> IN -> ReLU  (conv bias elided) ----
    y1 = jnp.maximum(instance_norm(conv3x3(x_bf, w1_ref)), 0.0)
    y1_bf = y1.reshape(H, W, Cp).astype(jnp.bfloat16)

    # ---- stage 2: conv2(reflect_pad(y1)) -> IN, + residual -------------------
    y2 = instance_norm(conv3x3(y1_bf, w2_ref)).reshape(H, W, Cp)
    o_ref[...] = (x + y2).astype(o_ref.dtype)


# ---------------------------------------------------------------------------
# Wrapper: layout conversion + channel padding + pallas_call
# ---------------------------------------------------------------------------
def resnet_block_forward(x_nchw, w1, b1, w2, b2):
    # b1/b2 accepted for API parity but unused: InstanceNorm2d(affine=False)
    # immediately follows each conv and cancels any per-channel bias.
    del b1, b2
    N, C, H, W = x_nchw.shape
    assert H >= 3 and W >= 3, "ReflectionPad2d(1) halo construction needs H, W >= 3"
    Cp = ((C + 127) // 128) * 128  # lane-dense channel count (>=128)

    # NCHW -> NHWC, zero-pad channels.  TODO(synk): hoist this layout change out
    # of the per-block wrapper when chaining Resnet blocks in the generator.
    xh = jnp.transpose(x_nchw.astype(jnp.float32), (0, 2, 3, 1))
    if Cp != C:
        xh = jnp.pad(xh, ((0, 0), (0, 0), (0, 0), (0, Cp - C)))

    def prep_w(w):
        # (Cout, Cin, 3, 3) -> (ky, kx, Cin, Cout) -> (3, 3*Cp, Cp) bf16,
        # kx stacked along the contraction dim to match the kernel's slab order.
        wk = jnp.transpose(w.astype(jnp.float32), (2, 3, 1, 0))
        if Cp != C:
            wk = jnp.pad(wk, ((0, 0), (0, 0), (0, Cp - C), (0, Cp - C)))
        return wk.reshape(3, 3 * Cp, Cp).astype(jnp.bfloat16)

    w1k, w2k = prep_w(w1), prep_w(w2)

    # VMEM budget: double-buffered in/out blocks + weights + in-kernel temps.
    act_f32 = H * W * Cp * 4
    act_bf16 = H * W * Cp * 2
    w_bytes = 2 * (3 * 3 * Cp * Cp * 2)                 # both stacked weights, bf16
    vmem_need = 4 * act_f32 + 2 * w_bytes + 8 * act_bf16 + 5 * act_f32 + (4 << 20)
    vmem_limit = int(min(max(vmem_need, 32 << 20), 64 << 20))   # 64 MiB = v7x physical

    cost = pl.CostEstimate(
        flops=2 * (2 * N * H * W * 9 * Cp * Cp),        # two 3x3 convs
        transcendentals=2 * N * Cp,                      # rsqrt per (n, c, norm)
        bytes_accessed=2 * N * H * W * Cp * 4 + 2 * w_bytes)

    out = pl.pallas_call(
        _resnet_block_kernel,
        out_shape=jax.ShapeDtypeStruct((N, H, W, Cp), jnp.float32),
        grid=(N,),
        in_specs=[
            pl.BlockSpec((None, H, W, Cp), lambda n: (n, 0, 0, 0)),
            # Constant index_maps -> weights are DMA'd once for the whole grid.
            # (pl.Buffered(1) would reclaim the idle second buffer on v7x.)
            pl.BlockSpec((3, 3 * Cp, Cp), lambda n: (0, 0, 0)),
            pl.BlockSpec((3, 3 * Cp, Cp), lambda n: (0, 0, 0)),
        ],
        out_specs=pl.BlockSpec((None, H, W, Cp), lambda n: (n, 0, 0, 0)),
        compiler_params=pltpu.CompilerParams(
            dimension_semantics=("parallel",),          # megacore across samples (v7x)
            vmem_limit_bytes=vmem_limit),
        cost_estimate=cost,
    )(xh, w1k, w2k)

    out = out[..., :C]                                  # drop padded channels
    return jnp.transpose(out, (0, 3, 1, 2))             # NHWC -> NCHW


# ---------------------------------------------------------------------------
# Pure-JAX reference (PyTorch semantics, biases included) for correctness check
# ---------------------------------------------------------------------------
def _ref_forward(x, w1, b1, w2, b2):
    def conv_in(h, w, b):
        hp = jnp.pad(h, ((0, 0), (0, 0), (1, 1), (1, 1)), mode="reflect")
        y = lax.conv_general_dilated(
            hp, w, (1, 1), "VALID", dimension_numbers=("NCHW", "OIHW", "NCHW"))
        y = y + b.reshape(1, -1, 1, 1)
        mean = y.mean(axis=(2, 3), keepdims=True)
        var = ((y - mean) ** 2).mean(axis=(2, 3), keepdims=True)
        return (y - mean) / jnp.sqrt(var + EPS)

    h = jnp.maximum(conv_in(x, w1, b1), 0.0)
    return x + conv_in(h, w2, b2)


if __name__ == "__main__":
    N, C, H, W = 2, 4, 16, 16
    key = jax.random.PRNGKey(0)
    kx_, kw1, kb1, kw2, kb2 = jax.random.split(key, 5)

    fan_in = C * 3 * 3
    bound = float(1.0 / (fan_in ** 0.5))
    x = jax.random.normal(kx_, (N, C, H, W), dtype=jnp.float32)
    w1 = jax.random.uniform(kw1, (C, C, 3, 3), jnp.float32, -bound, bound)
    b1 = jax.random.uniform(kb1, (C,), jnp.float32, -bound, bound)
    w2 = jax.random.uniform(kw2, (C, C, 3, 3), jnp.float32, -bound, bound)
    b2 = jax.random.uniform(kb2, (C,), jnp.float32, -bound, bound)

    out = jax.block_until_ready(jax.jit(resnet_block_forward)(x, w1, b1, w2, b2))
    ref = jax.block_until_ready(_ref_forward(x, w1, b1, w2, b2))

    assert out.shape == (N, C, H, W)
    # bf16 MXU operands -> a few e-3 absolute error vs the f32 reference.
    max_err = float(jnp.max(jnp.abs(out - ref)))
    assert jnp.allclose(out, ref, atol=3e-2, rtol=3e-2), (
        f"mismatch vs reference (max abs err {max_err})")
    print("KERNEL_OK")
</pallas_src>

<mosaic_0001>
module attributes {stable_mosaic.version = 11 : i64} {
  func.func @_resnet_block_kernel(%arg0: i32, %arg1: memref<1x16x16x128xf32, #tpu.memory_space<vmem>>, %arg2: memref<3x384x128xbf16, #tpu.memory_space<vmem>>, %arg3: memref<3x384x128xbf16, #tpu.memory_space<vmem>>, %arg4: memref<1x16x16x128xf32, #tpu.memory_space<vmem>>) attributes {dimension_semantics = [#tpu.dimension_semantics<parallel>], iteration_bounds = array<i64: 2>, scalar_prefetch = 0 : i64, scratch_operands = 0 : i64, tpu.core_type = #tpu.core_type<tc>, window_params = [{transform_indices = @transform_0, window_bounds = array<i64: 1, 16, 16, 128>}, {pipeline_mode = #tpu.pipeline_mode<synchronous>, transform_indices = @transform_1, window_bounds = array<i64: 3, 384, 128>}, {pipeline_mode = #tpu.pipeline_mode<synchronous>, transform_indices = @transform_2, window_bounds = array<i64: 3, 384, 128>}, {transform_indices = @transform_3, window_bounds = array<i64: 1, 16, 16, 128>}]} {
    %c0 = arith.constant 0 : index
    %c0_0 = arith.constant 0 : index
    %c0_1 = arith.constant 0 : index
    %c0_2 = arith.constant 0 : index
    %0 = vector.load %arg1[%c0, %c0_0, %c0_1, %c0_2] : memref<1x16x16x128xf32, #tpu.memory_space<vmem>>, vector<1x16x16x128xf32>
    %1 = vector.shape_cast %0 : vector<1x16x16x128xf32> to vector<16x16x128xf32>
    %2 = arith.truncf %1 : vector<16x16x128xf32> to vector<16x16x128xbf16>
    %3 = vector.extract_strided_slice %2 {offsets = [1, 0, 0], sizes = [1, 16, 128], strides = [1, 1, 1]} : vector<16x16x128xbf16> to vector<1x16x128xbf16>
    %4 = vector.extract_strided_slice %2 {offsets = [14, 0, 0], sizes = [1, 16, 128], strides = [1, 1, 1]} : vector<16x16x128xbf16> to vector<1x16x128xbf16>
    %5 = tpu.concatenate %3, %2, %4 in 0 : vector<1x16x128xbf16>, vector<16x16x128xbf16>, vector<1x16x128xbf16> -> vector<18x16x128xbf16>
    %6 = vector.extract_strided_slice %5 {offsets = [0, 1, 0], sizes = [18, 1, 128], strides = [1, 1, 1]} : vector<18x16x128xbf16> to vector<18x1x128xbf16>
    %7 = vector.extract_strided_slice %5 {offsets = [0, 0, 0], sizes = [18, 15, 128], strides = [1, 1, 1]} : vector<18x16x128xbf16> to vector<18x15x128xbf16>
    %8 = tpu.concatenate %6, %7 in 1 : vector<18x1x128xbf16>, vector<18x15x128xbf16> -> vector<18x16x128xbf16>
    %9 = vector.extract_strided_slice %5 {offsets = [0, 1, 0], sizes = [18, 15, 128], strides = [1, 1, 1]} : vector<18x16x128xbf16> to vector<18x15x128xbf16>
    %10 = vector.extract_strided_slice %5 {offsets = [0, 14, 0], sizes = [18, 1, 128], strides = [1, 1, 1]} : vector<18x16x128xbf16> to vector<18x1x128xbf16>
    %11 = tpu.concatenate %9, %10 in 1 : vector<18x15x128xbf16>, vector<18x1x128xbf16> -> vector<18x16x128xbf16>
    %12 = tpu.concatenate %8, %5, %11 in 2 : vector<18x16x128xbf16>, vector<18x16x128xbf16>, vector<18x16x128xbf16> -> vector<18x16x384xbf16>
    %cst = arith.constant 0.000000e+00 : f32
    %13 = vector.broadcast %cst : f32 to vector<256x128xf32>
    %14 = vector.extract_strided_slice %12 {offsets = [0, 0, 0], sizes = [16, 16, 384], strides = [1, 1, 1]} : vector<18x16x384xbf16> to vector<16x16x384xbf16>
    %15 = vector.shape_cast %14 : vector<16x16x384xbf16> to vector<256x384xbf16>
    %c0_3 = arith.constant 0 : index
    %c0_4 = arith.constant 0 : index
    %c0_5 = arith.constant 0 : index
    %16 = vector.load %arg2[%c0_3, %c0_4, %c0_5] : memref<3x384x128xbf16, #tpu.memory_space<vmem>>, vector<1x384x128xbf16>
    %17 = vector.shape_cast %16 : vector<1x384x128xbf16> to vector<384x128xbf16>
    %cst_6 = arith.constant dense<0.000000e+00> : vector<256x128xf32>
    %18 = tpu.matmul %15, %17, %cst_6 {dimension_numbers = #tpu.dot_dimension_numbers<[1], [0], [0], [1], [0, 0, 1, 1], [], []>} : vector<256x384xbf16>, vector<384x128xbf16>, vector<256x128xf32> -> vector<256x128xf32>
    %19 = arith.addf %13, %18 : vector<256x128xf32>
    %20 = vector.extract_strided_slice %12 {offsets = [1, 0, 0], sizes = [16, 16, 384], strides = [1, 1, 1]} : vector<18x16x384xbf16> to vector<16x16x384xbf16>
    %21 = vector.shape_cast %20 : vector<16x16x384xbf16> to vector<256x384xbf16>
    %c1 = arith.constant 1 : index
    %c0_7 = arith.constant 0 : index
    %c0_8 = arith.constant 0 : index
    %22 = vector.load %arg2[%c1, %c0_7, %c0_8] : memref<3x384x128xbf16, #tpu.memory_space<vmem>>, vector<1x384x128xbf16>
    %23 = vector.shape_cast %22 : vector<1x384x128xbf16> to vector<384x128xbf16>
    %cst_9 = arith.constant dense<0.000000e+00> : vector<256x128xf32>
    %24 = tpu.matmul %21, %23, %cst_9 {dimension_numbers = #tpu.dot_dimension_numbers<[1], [0], [0], [1], [0, 0, 1, 1], [], []>} : vector<256x384xbf16>, vector<384x128xbf16>, vector<256x128xf32> -> vector<256x128xf32>
    %25 = arith.addf %19, %24 : vector<256x128xf32>
    %26 = vector.extract_strided_slice %12 {offsets = [2, 0, 0], sizes = [16, 16, 384], strides = [1, 1, 1]} : vector<18x16x384xbf16> to vector<16x16x384xbf16>
    %27 = vector.shape_cast %26 : vector<16x16x384xbf16> to vector<256x384xbf16>
    %c2 = arith.constant 2 : index
    %c0_10 = arith.constant 0 : index
    %c0_11 = arith.constant 0 : index
    %28 = vector.load %arg2[%c2, %c0_10, %c0_11] : memref<3x384x128xbf16, #tpu.memory_space<vmem>>, vector<1x384x128xbf16>
    %29 = vector.shape_cast %28 : vector<1x384x128xbf16> to vector<384x128xbf16>
    %cst_12 = arith.constant dense<0.000000e+00> : vector<256x128xf32>
    %30 = tpu.matmul %27, %29, %cst_12 {dimension_numbers = #tpu.dot_dimension_numbers<[1], [0], [0], [1], [0, 0, 1, 1], [], []>} : vector<256x384xbf16>, vector<384x128xbf16>, vector<256x128xf32> -> vector<256x128xf32>
    %31 = arith.addf %25, %30 : vector<256x128xf32>
    %cst_13 = arith.constant dense<0.000000e+00> : vector<128xf32>
    %32 = vector.multi_reduction <add>, %31, %cst_13 [0] : vector<256x128xf32> to vector<128xf32>
    %33 = vector.shape_cast %32 : vector<128xf32> to vector<1x128xf32>
    %cst_14 = arith.constant 3.906250e-03 : f32
    %34 = vector.broadcast %cst_14 : f32 to vector<1x128xf32>
    %35 = arith.mulf %33, %34 : vector<1x128xf32>
    %36 = arith.mulf %31, %31 : vector<256x128xf32>
    %cst_15 = arith.constant dense<0.000000e+00> : vector<128xf32>
    %37 = vector.multi_reduction <add>, %36, %cst_15 [0] : vector<256x128xf32> to vector<128xf32>
    %38 = vector.shape_cast %37 : vector<128xf32> to vector<1x128xf32>
    %cst_16 = arith.constant 3.906250e-03 : f32
    %39 = vector.broadcast %cst_16 : f32 to vector<1x128xf32>
    %40 = arith.mulf %38, %39 : vector<1x128xf32>
    %41 = arith.mulf %35, %35 : vector<1x128xf32>
    %42 = arith.subf %40, %41 : vector<1x128xf32>
    %cst_17 = arith.constant 0.000000e+00 : f32
    %43 = vector.broadcast %cst_17 : f32 to vector<1x128xf32>
    %44 = arith.maximumf %42, %43 : vector<1x128xf32>
    %45 = vector.broadcast %35 : vector<1x128xf32> to vector<256x128xf32>
    %46 = arith.subf %31, %45 : vector<256x128xf32>
    %cst_18 = arith.constant 9.99999974E-6 : f32
    %47 = vector.broadcast %cst_18 : f32 to vector<1x128xf32>
    %48 = arith.addf %44, %47 : vector<1x128xf32>
    %49 = math.rsqrt %48 : vector<1x128xf32>
    %50 = vector.broadcast %49 : vector<1x128xf32> to vector<256x128xf32>
    %51 = arith.mulf %46, %50 : vector<256x128xf32>
    %cst_19 = arith.constant 0.000000e+00 : f32
    %52 = vector.broadcast %cst_19 : f32 to vector<256x128xf32>
    %53 = arith.maximumf %51, %52 : vector<256x128xf32>
    %54 = vector.shape_cast %53 : vector<256x128xf32> to vector<16x16x128xf32>
    %55 = arith.truncf %54 : vector<16x16x128xf32> to vector<16x16x128xbf16>
    %56 = vector.extract_strided_slice %55 {offsets = [1, 0, 0], sizes = [1, 16, 128], strides = [1, 1, 1]} : vector<16x16x128xbf16> to vector<1x16x128xbf16>
    %57 = vector.extract_strided_slice %55 {offsets = [14, 0, 0], sizes = [1, 16, 128], strides = [1, 1, 1]} : vector<16x16x128xbf16> to vector<1x16x128xbf16>
    %58 = tpu.concatenate %56, %55, %57 in 0 : vector<1x16x128xbf16>, vector<16x16x128xbf16>, vector<1x16x128xbf16> -> vector<18x16x128xbf16>
    %59 = vector.extract_strided_slice %58 {offsets = [0, 1, 0], sizes = [18, 1, 128], strides = [1, 1, 1]} : vector<18x16x128xbf16> to vector<18x1x128xbf16>
    %60 = vector.extract_strided_slice %58 {offsets = [0, 0, 0], sizes = [18, 15, 128], strides = [1, 1, 1]} : vector<18x16x128xbf16> to vector<18x15x128xbf16>
    %61 = tpu.concatenate %59, %60 in 1 : vector<18x1x128xbf16>, vector<18x15x128xbf16> -> vector<18x16x128xbf16>
    %62 = vector.extract_strided_slice %58 {offsets = [0, 1, 0], sizes = [18, 15, 128], strides = [1, 1, 1]} : vector<18x16x128xbf16> to vector<18x15x128xbf16>
    %63 = vector.extract_strided_slice %58 {offsets = [0, 14, 0], sizes = [18, 1, 128], strides = [1, 1, 1]} : vector<18x16x128xbf16> to vector<18x1x128xbf16>
    %64 = tpu.concatenate %62, %63 in 1 : vector<18x15x128xbf16>, vector<18x1x128xbf16> -> vector<18x16x128xbf16>
    %65 = tpu.concatenate %61, %58, %64 in 2 : vector<18x16x128xbf16>, vector<18x16x128xbf16>, vector<18x16x128xbf16> -> vector<18x16x384xbf16>
    %cst_20 = arith.constant 0.000000e+00 : f32
    %66 = vector.broadcast %cst_20 : f32 to vector<256x128xf32>
    %67 = vector.extract_strided_slice %65 {offsets = [0, 0, 0], sizes = [16, 16, 384], strides = [1, 1, 1]} : vector<18x16x384xbf16> to vector<16x16x384xbf16>
    %68 = vector.shape_cast %67 : vector<16x16x384xbf16> to vector<256x384xbf16>
    %c0_21 = arith.constant 0 : index
    %c0_22 = arith.constant 0 : index
    %c0_23 = arith.constant 0 : index
    %69 = vector.load %arg3[%c0_21, %c0_22, %c0_23] : memref<3x384x128xbf16, #tpu.memory_space<vmem>>, vector<1x384x128xbf16>
    %70 = vector.shape_cast %69 : vector<1x384x128xbf16> to vector<384x128xbf16>
    %cst_24 = arith.constant dense<0.000000e+00> : vector<256x128xf32>
    %71 = tpu.matmul %68, %70, %cst_24 {dimension_numbers = #tpu.dot_dimension_numbers<[1], [0], [0], [1], [0, 0, 1, 1], [], []>} : vector<256x384xbf16>, vector<384x128xbf16>, vector<256x128xf32> -> vector<256x128xf32>
    %72 = arith.addf %66, %71 : vector<256x128xf32>
    %73 = vector.extract_strided_slice %65 {offsets = [1, 0, 0], sizes = [16, 16, 384], strides = [1, 1, 1]} : vector<18x16x384xbf16> to vector<16x16x384xbf16>
    %74 = vector.shape_cast %73 : vector<16x16x384xbf16> to vector<256x384xbf16>
    %c1_25 = arith.constant 1 : index
    %c0_26 = arith.constant 0 : index
    %c0_27 = arith.constant 0 : index
    %75 = vector.load %arg3[%c1_25, %c0_26, %c0_27] : memref<3x384x128xbf16, #tpu.memory_space<vmem>>, vector<1x384x128xbf16>
    %76 = vector.shape_cast %75 : vector<1x384x128xbf16> to vector<384x128xbf16>
    %cst_28 = arith.constant dense<0.000000e+00> : vector<256x128xf32>
    %77 = tpu.matmul %74, %76, %cst_28 {dimension_numbers = #tpu.dot_dimension_numbers<[1], [0], [0], [1], [0, 0, 1, 1], [], []>} : vector<256x384xbf16>, vector<384x128xbf16>, vector<256x128xf32> -> vector<256x128xf32>
    %78 = arith.addf %72, %77 : vector<256x128xf32>
    %79 = vector.extract_strided_slice %65 {offsets = [2, 0, 0], sizes = [16, 16, 384], strides = [1, 1, 1]} : vector<18x16x384xbf16> to vector<16x16x384xbf16>
    %80 = vector.shape_cast %79 : vector<16x16x384xbf16> to vector<256x384xbf16>
    %c2_29 = arith.constant 2 : index
    %c0_30 = arith.constant 0 : index
    %c0_31 = arith.constant 0 : index
    %81 = vector.load %arg3[%c2_29, %c0_30, %c0_31] : memref<3x384x128xbf16, #tpu.memory_space<vmem>>, vector<1x384x128xbf16>
    %82 = vector.shape_cast %81 : vector<1x384x128xbf16> to vector<384x128xbf16>
    %cst_32 = arith.constant dense<0.000000e+00> : vector<256x128xf32>
    %83 = tpu.matmul %80, %82, %cst_32 {dimension_numbers = #tpu.dot_dimension_numbers<[1], [0], [0], [1], [0, 0, 1, 1], [], []>} : vector<256x384xbf16>, vector<384x128xbf16>, vector<256x128xf32> -> vector<256x128xf32>
    %84 = arith.addf %78, %83 : vector<256x128xf32>
    %cst_33 = arith.constant dense<0.000000e+00> : vector<128xf32>
    %85 = vector.multi_reduction <add>, %84, %cst_33 [0] : vector<256x128xf32> to vector<128xf32>
    %86 = vector.shape_cast %85 : vector<128xf32> to vector<1x128xf32>
    %cst_34 = arith.constant 3.906250e-03 : f32
    %87 = vector.broadcast %cst_34 : f32 to vector<1x128xf32>
    %88 = arith.mulf %86, %87 : vector<1x128xf32>
    %89 = arith.mulf %84, %84 : vector<256x128xf32>
    %cst_35 = arith.constant dense<0.000000e+00> : vector<128xf32>
    %90 = vector.multi_reduction <add>, %89, %cst_35 [0] : vector<256x128xf32> to vector<128xf32>
    %91 = vector.shape_cast %90 : vector<128xf32> to vector<1x128xf32>
    %cst_36 = arith.constant 3.906250e-03 : f32
    %92 = vector.broadcast %cst_36 : f32 to vector<1x128xf32>
    %93 = arith.mulf %91, %92 : vector<1x128xf32>
    %94 = arith.mulf %88, %88 : vector<1x128xf32>
    %95 = arith.subf %93, %94 : vector<1x128xf32>
    %cst_37 = arith.constant 0.000000e+00 : f32
    %96 = vector.broadcast %cst_37 : f32 to vector<1x128xf32>
    %97 = arith.maximumf %95, %96 : vector<1x128xf32>
    %98 = vector.broadcast %88 : vector<1x128xf32> to vector<256x128xf32>
    %99 = arith.subf %84, %98 : vector<256x128xf32>
    %cst_38 = arith.constant 9.99999974E-6 : f32
    %100 = vector.broadcast %cst_38 : f32 to vector<1x128xf32>
    %101 = arith.addf %97, %100 : vector<1x128xf32>
    %102 = math.rsqrt %101 : vector<1x128xf32>
    %103 = vector.broadcast %102 : vector<1x128xf32> to vector<256x128xf32>
    %104 = arith.mulf %99, %103 : vector<256x128xf32>
    %105 = vector.shape_cast %104 : vector<256x128xf32> to vector<16x16x128xf32>
    %106 = arith.addf %1, %105 : vector<16x16x128xf32>
    %c0_39 = arith.constant 0 : index
    %c0_40 = arith.constant 0 : index
    %c0_41 = arith.constant 0 : index
    %c0_42 = arith.constant 0 : index
    %107 = vector.load %arg4[%c0_39, %c0_40, %c0_41, %c0_42] : memref<1x16x16x128xf32, #tpu.memory_space<vmem>>, vector<1x16x16x128xf32>
    %108 = vector.shape_cast %107 : vector<1x16x16x128xf32> to vector<16x16x128xf32>
    %109 = vector.shape_cast %106 : vector<16x16x128xf32> to vector<1x16x16x128xf32>
    tpu.vector_store %arg4[%c0_39, %c0_40, %c0_41, %c0_42], %109 {strides = array<i32>} : memref<1x16x16x128xf32, #tpu.memory_space<vmem>>, vector<1x16x16x128xf32>,
    return
  }
  func.func @transform_0(%arg0: i32) -> (i32, i32, i32, i32) {
    %c0_i32 = arith.constant 0 : i32
    %c0_i32_0 = arith.constant 0 : i32
    %c0_i32_1 = arith.constant 0 : i32
    %c0_i32_2 = arith.constant 0 : i32
    return %arg0, %c0_i32, %c0_i32_0, %c0_i32_1 : i32, i32, i32, i32
  }
  func.func @transform_1(%arg0: i32) -> (i32, i32, i32) {
    %c0_i32 = arith.constant 0 : i32
    %c0_i32_0 = arith.constant 0 : i32
    %c0_i32_1 = arith.constant 0 : i32
    %c0_i32_2 = arith.constant 0 : i32
    return %c0_i32, %c0_i32_0, %c0_i32_1 : i32, i32, i32
  }
  func.func @transform_2(%arg0: i32) -> (i32, i32, i32) {
    %c0_i32 = arith.constant 0 : i32
    %c0_i32_0 = arith.constant 0 : i32
    %c0_i32_1 = arith.constant 0 : i32
    %c0_i32_2 = arith.constant 0 : i32
    return %c0_i32, %c0_i32_0, %c0_i32_1 : i32, i32, i32
  }
  func.func @transform_3(%arg0: i32) -> (i32, i32, i32, i32) {
    %c0_i32 = arith.constant 0 : i32
    %c0_i32_0 = arith.constant 0 : i32
    %c0_i32_1 = arith.constant 0 : i32
    %c0_i32_2 = arith.constant 0 : i32
    return %arg0, %c0_i32, %c0_i32_0, %c0_i32_1 : i32, i32, i32, i32
  }
}

</mosaic_0001>

<bundles_post_ra>
// kernel: resnet_block_forward.1
= control target key start
LH: loop header
LB: loop body
LE: loop exit
PB: predicated region body
PF: predicated region fallthrough
CT: control target
= control target key end

     0   :  { %s5591_s12 = smov 0   ;;  %s8294_s0 = inlined_call_operand.vmem [shape: f32[2,16,16,128], index: 0, kind: input, shape index: {}]   ;;  %s8295_s1 = inlined_call_operand.vmem [shape: bf16[3,384,128], index: 1, kind: input, shape index: {}]   ;;  %s8296_s2 = inlined_call_operand.vmem [shape: bf16[3,384,128], index: 2, kind: input, shape index: {}]   ;;  %s8297_s3 = inlined_call_operand.vmem [shape: f32[2,16,16,128], index: 3, kind: output, shape index: {}]  }
   0x1 LB: > { %s4578_s13 = sadd.s32 4294967295, %s5569_s12   ;;  %p4582_p0 = scmp.ge.s32.totalorder %s5569_s12, 1  ;;  %s5569_s12 = sphi %s5591_s12, %s13_s12  }
   0x2   : > { %p137_p1 = scmp.lt.s32.totalorder %s5569_s12, 3 }
   0x4   : > { %p138_p2 = pnand %p4582_p0, %p137_p1 }
   0x6   : > { %141 = sbr.rel (%p138_p2) target bundleno = 1849 (0x739), region = 32 }
   0xb   : > { %v5390_v0 = vld [vmem:[%s8295_s1 + $0xf8] sm:$0xff]  ;;  %p161_p3 = scmp.lt.s32.totalorder %s4578_s13, 1  ;;  %v5389_v2 = vld [vmem:[%s8295_s1 + $0xf0] sm:$0xff]  ;;  %v5388_v4 = vld [vmem:[%s8295_s1 + $0xe8] sm:$0xff]  ;;  %vm523_vm0 = vcmask 1040384   ;;  %v8395_v54 = vmov 0 }
   0xc   : > { %v5398_v1 = vld [vmem:[%s8295_s1 + $0x138] sm:$0xff]  ;;  %962 = vmatpush.bf16.msra.mxu0 %v5390_v0  ;;  %5503 = vmatpush.bf16.msra.mxu2 %v5390_v0  ;;  %v5397_v3 = vld [vmem:[%s8295_s1 + $0x130] sm:$0xff]  ;;  %v5396_v8 = vld [vmem:[%s8295_s1 + $0x128] sm:$0xff]  ;;  %vm524_vm1 = vsmask.f32 256  ;;  %vm686_vm3 = vcmask 1047552  }
   0xd   : > { %s8609_s13 = smov (!%p161_p3, %s4578_s13), 1  ;;  %1051 = vmatpush.bf16.msra.mxu1 %v5398_v1  ;;  %5511 = vmatpush.bf16.msra.mxu3 %v5398_v1  ;;  %v5387_v14 = vld [vmem:[%s8295_s1 + $0xe0] sm:$0xff]  ;;  %v5386_v20 = vld [vmem:[%s8295_s1 + $0xd8] sm:$0xff]  ;;  %v5385_v26 = vld [vmem:[%s8295_s1 + $0xd0] sm:$0xff]  ;;  %vm687_vm4 = vsmask.f32 7424 }
   0xe   : > { %s5357_s22 = sshll.u32 %s8609_s13, 8  ;;  %v5395_v19 = vld [vmem:[%s8295_s1 + $0x120] sm:$0xff]  ;;  %v5394_v23 = vld [vmem:[%s8295_s1 + $0x118] sm:$0xff]  ;;  %v5393_v31 = vld [vmem:[%s8295_s1 + $0x110] sm:$0xff] }
   0xf   : > { %s5622_s27 = scalar_lea.vmem %s8294_s0, %s5357_s22  ;;  %v5384_v38 = vld [vmem:[%s8295_s1 + $0xc8] sm:$0xff]  ;;  %v5383_v48 = vld [vmem:[%s8295_s1 + $0xc0] sm:$0xff]  ;;  %vm5697_vm2 = vmand %vm523_vm0, %vm524_vm1  ;;  %s8190_s5 = scalar_lea.vmem %s8297_s3, %s5357_s22 }
  0x10   : > { %963 = vmatpush.bf16.msra.mxu0 %v5389_v2  ;;  %5504 = vmatpush.bf16.msra.mxu2 %v5389_v2  ;;  %v171_v5 = vld [vmem:[%s5622_s27] sm:$0xff]  ;;  %v172_v6 = vld [vmem:[%s5622_s27 + $0x8] sm:$0xff]  ;;  %v173_v24 = vld [vmem:[%s5622_s27 + $0x10] sm:$0xff]  ;;  %v8396_v54 = vsel %vm5697_vm2, 4294967295, %v8395_v54 }
  0x11   : > { %v187_v7 = vld [vmem:[%s5622_s27 + $0x80] sm:$0xff]  ;;  %1052 = vmatpush.bf16.msra.mxu1 %v5397_v3  ;;  %5512 = vmatpush.bf16.msra.mxu3 %v5397_v3  ;;  %v203_v9 = vpack.c.bf16 %v171_v5, %v171_v5  ;;  %v204_v10 = vpack.c.bf16 %v172_v6, %v172_v6  ;;  %v188_v11 = vld [vmem:[%s5622_s27 + $0x88] sm:$0xff]  ;;  %v174_v25 = vld [vmem:[%s5622_s27 + $0x18] sm:$0xff]  ;;  %v205_v32 = vpack.c.bf16 %v173_v24, %v173_v24 }
  0x12   : > { %v219_v12 = vpack.c.bf16 %v187_v7, %v187_v7  ;;  %v220_v13 = vpack.c.bf16 %v188_v11, %v188_v11  ;;  %v189_v29 = vld [vmem:[%s5622_s27 + $0x90] sm:$0xff]  ;;  %v190_v30 = vld [vmem:[%s5622_s27 + $0x98] sm:$0xff]  ;;  %v206_v33 = vpack.c.bf16 %v174_v25, %v174_v25  ;;  %v5392_v43 = vld [vmem:[%s8295_s1 + $0x108] sm:$0xff]  ;;  %8397 = vst [vmem:[#allocation2_spill] sm:$0xff] %v8396_v54 }
  0x13   : > { %v252_v15 = vunpack.c.l.b16 %v203_v9  ;;  %v5634_v16 = vunpack.c.l.b16 %v204_v10  ;;  %v221_v36 = vpack.c.bf16 %v189_v29, %v189_v29  ;;  %v222_v37 = vpack.c.bf16 %v190_v30, %v190_v30  ;;  %v5391_v53 = vld [vmem:[%s8295_s1 + $0x100] sm:$0xff]  ;;  %v5406_v55 = vld [vmem:[%s8295_s1 + $0x178] sm:$0xff]  ;;  %v5405_v62 = vld [vmem:[%s8295_s1 + $0x170] sm:$0xff] }
  0x14   : > { %964 = vmatpush.bf16.msra.mxu0 %v5388_v4  ;;  %5505 = vmatpush.bf16.msra.mxu2 %v5388_v4  ;;  %v259_v17 = vunpack.c.l.b16 %v219_v12  ;;  %v5636_v18 = vunpack.c.l.b16 %v220_v13  ;;  %v5677_v44 = vunpack.c.l.b16 %v205_v32  ;;  %v5679_v45 = vunpack.c.l.b16 %v206_v33  ;;  %v5366_v56 = vld [vmem:[%s8295_s1 + $0x38] sm:$0xff]  ;;  %v5365_v63 = vld [vmem:[%s8295_s1 + $0x30] sm:$0xff]  ;;  %v175_v0 = vld [vmem:[%s5622_s27 + $0x20] sm:$0xff] }
  0x15   : > { %1053 = vmatpush.bf16.msra.mxu1 %v5396_v8  ;;  %5513 = vmatpush.bf16.msra.mxu3 %v5396_v8  ;;  %v5645_v21 = vpack.c.b16 %v5634_v16, %v252_v15  ;;  %v268_v34 = vpack.c.b16 %v252_v15, %v252_v15  ;;  %v5681_v46 = vunpack.c.l.b16 %v221_v36  ;;  %v5683_v47 = vunpack.c.l.b16 %v222_v37  ;;  %v5374_v61 = vld [vmem:[%s8295_s1 + $0x78] sm:$0xff]  ;;  %v176_v3 = vld [vmem:[%s5622_s27 + $0x28] sm:$0xff]  ;;  %v191_v4 = vld [vmem:[%s5622_s27 + $0xa0] sm:$0xff] }
  0x16   : > { %v5648_v22 = vpack.c.b16 %v5636_v18, %v259_v17  ;;  %v275_v35 = vpack.c.b16 %v259_v17, %v259_v17  ;;  %v5709_v57 = vpack.c.b16 %v5679_v45, %v5677_v44  ;;  %v192_v5 = vld [vmem:[%s5622_s27 + $0xa8] sm:$0xff]  ;;  %v5373_v6 = vld [vmem:[%s8295_s1 + $0x70] sm:$0xff]  ;;  %v267_v7 = vpack.c.b16 %v5677_v44, %v5677_v44  ;;  %v5363_v44 = vld [vmem:[%s8295_s1 + $0x20] sm:$0xff] }
  0x17   : > { %v8319_v27 = vshrl.u32 %v5645_v21, 16  ;;  %v8323_v40 = vshll.u32 %v5645_v21, 16  ;;  %v287_v49 = vshrl.u32 %v268_v34, 16  ;;  %v5721_v60 = vpack.c.b16 %v5683_v47, %v5681_v46  ;;  %v5404_v9 = vld [vmem:[%s8295_s1 + $0x168] sm:$0xff]  ;;  %vm6092_vm5 = vmand %vm686_vm3, %vm687_vm4 }
  0x18   : > { %965 = vmatpush.bf16.msra.mxu0 %v5387_v14  ;;  %5506 = vmatpush.bf16.msra.mxu2 %v5387_v14  ;;  %v8306_v28 = vshrl.u32 %v5648_v22, 16  ;;  %v8307_v42 = vshll.u32 %v5648_v22, 16  ;;  %v308_v51 = vshrl.u32 %v275_v35, 16  ;;  %8398 = vst [vmem:[#allocation3_spill] sm:$0xff] %v5709_v57  ;;  %v8318_v1 = vshrl.u32 %v5709_v57, 16  ;;  %v5364_v10 = vld [vmem:[%s8295_s1 + $0x28] sm:$0xff] }
  0x19   : > { %1054 = vmatpush.bf16.msra.mxu1 %v5395_v19  ;;  %5514 = vmatpush.bf16.msra.mxu3 %v5395_v19  ;;  %v405_v39 = vrot.slane %v8319_v27, 7  ;;  %v8304_v2 = vshrl.u32 %v5721_v60, 16  ;;  %v276_v8 = vpack.c.b16 %v5681_v46, %v5681_v46  ;;  %v207_v11 = vpack.c.bf16 %v175_v0, %v175_v0  ;;  %v5371_v46 = vld [vmem:[%s8295_s1 + $0x60] sm:$0xff] }
  0x1a   : > { %v454_v41 = vrot.slane %v8306_v28, 7  ;;  %v208_v12 = vpack.c.bf16 %v176_v3, %v176_v3  ;;  %v223_v13 = vpack.c.bf16 %v191_v4, %v191_v4  ;;  %v224_v14 = vpack.c.bf16 %v192_v5, %v192_v5 }
  0x1b   : > { %v408_v50 = vor.u32 %v8323_v40, %v405_v39  ;;  %v398_v15 = vrot.slane %v8318_v1, 7  ;;  %v8320_v17 = vshll.u32 %v5709_v57, 16  ;;  %v461_v19 = vrot.slane %v8304_v2, 7 }
  0x1c   : > { %966 = vmatpush.bf16.msra.mxu0 %v5386_v20  ;;  %5507 = vmatpush.bf16.msra.mxu2 %v5386_v20  ;;  %v457_v52 = vor.u32 %v8307_v42, %v454_v41  ;;  %v8305_v20 = vshll.u32 %v5721_v60, 16  ;;  %v253_v24 = vunpack.c.l.b16 %v207_v11  ;;  %v5764_v25 = vunpack.c.l.b16 %v208_v12  ;;  %v177_v41 = vld [vmem:[%s5622_s27 + $0x30] sm:$0xff] }
  0x1d   : > { %1055 = vmatpush.bf16.msra.mxu1 %v5394_v23  ;;  %5515 = vmatpush.bf16.msra.mxu3 %v5394_v23  ;;  %v5713_v58 = vsel %vm5697_vm2, %v287_v49, %v408_v50  ;;  %v5372_v23 = vld [vmem:[%s8295_s1 + $0x68] sm:$0xff]  ;;  %v5766_v29 = vunpack.c.l.b16 %v224_v14  ;;  %v284_v30 = vshrl.u32 %v267_v7, 16  ;;  %v311_v32 = vshrl.u32 %v276_v8, 16  ;;  %v193_v49 = vld [vmem:[%s5622_s27 + $0xb0] sm:$0xff]  ;;  %v194_v50 = vld [vmem:[%s5622_s27 + $0xb8] sm:$0xff] }
  0x1e   : > { %v5717_v59 = vsel %vm5697_vm2, %v308_v51, %v457_v52  ;;  %v464_v33 = vor.u32 %v8305_v20, %v461_v19  ;;  %v5773_v34 = vpack.c.b16 %v5764_v25, %v253_v24  ;;  %v269_v51 = vpack.c.b16 %v253_v24, %v253_v24  ;;  %v179_v19 = vld [vmem:[%s5622_s27 + $0x40] sm:$0xff] }
  0x1f   : > { %v225_v0 = vpack.c.bf16 %v193_v49, %v193_v49  ;;  %v226_v3 = vpack.c.bf16 %v194_v50, %v194_v50  ;;  %v195_v24 = vld [vmem:[%s5622_s27 + $0xc0] sm:$0xff] }
  0x20   : > { %967 = vmatpush.bf16.msra.mxu0 %v5385_v26  ;;  %5508 = vmatpush.bf16.msra.mxu2 %v5385_v26  ;;  %v261_v26 = vunpack.c.l.b16 %v223_v13  ;;  %8399 = vst [vmem:[#allocation4_spill] sm:$0xff] %v5773_v34  ;;  %v5784_v37 = vsel %vm5697_vm2, %v311_v32, %v464_v33  ;;  %v8317_v52 = vshll.u32 %v5773_v34, 16  ;;  %v290_v4 = vshrl.u32 %v269_v51, 16  ;;  %v5402_v32 = vld [vmem:[%s8295_s1 + $0x158] sm:$0xff] }
  0x21   : > { %1056 = vmatpush.bf16.msra.mxu1 %v5393_v31  ;;  %5516 = vmatpush.bf16.msra.mxu3 %v5393_v31  ;;  %v401_v31 = vor.u32 %v8320_v17, %v398_v15  ;;  %v5817_v11 = vunpack.c.l.b16 %v226_v3  ;;  %v5362_v33 = vld [vmem:[%s8295_s1 + $0x18] sm:$0xff]  ;;  %v227_v49 = vpack.c.bf16 %v195_v24, %v195_v24 }
  0x22   : > { %v5776_v35 = vpack.c.b16 %v5766_v29, %v261_v26 }
  0x23   : > { %v5780_v36 = vsel %vm5697_vm2, %v284_v30, %v401_v31 }
  0x24   : > { %968 = vmatpush.bf16.msra.mxu0 %v5384_v38  ;;  %5509 = vmatpush.bf16.msra.mxu2 %v5384_v38  ;;  %v8316_v38 = vshrl.u32 %v5773_v34, 16  ;;  %v8301_v39 = vshrl.u32 %v5776_v35, 16 }
  0x25   : > { %1057 = vmatpush.bf16.msra.mxu1 %v5392_v43  ;;  %5517 = vmatpush.bf16.msra.mxu3 %v5392_v43  ;;  %v5403_v43 = vld [vmem:[%s8295_s1 + $0x160] sm:$0xff] }
  0x28   : > { %969 = vmatpush.bf16.msra.mxu0 %v5383_v48  ;;  %5510 = vmatpush.bf16.msra.mxu2 %v5383_v48  ;;  %v178_v48 = vld [vmem:[%s5622_s27 + $0x38] sm:$0xff] }
  0x29   : > { %1058 = vmatpush.bf16.msra.mxu1 %v5391_v53  ;;  %5518 = vmatpush.bf16.msra.mxu3 %v5391_v53  ;;  %v412_v53 = vrot.slane %v8316_v38, 7 }
  0x2b   : > { %970 = vmatmul.bf16.vlgmr.msra.gmra.mxu0 %v5713_v58  ;;  %1010 = vmatmul.bf16.vlgmr.msra.gmra.mxu2 %v5717_v59  ;;  %v415_v5 = vor.u32 %v8317_v52, %v412_v53 }
  0x2c   : > { %1140 = vmatpush.bf16.msrb.mxu2 %v5406_v55  ;;  %1059 = vmatmul.bf16.vlgmr.msra.gmra.mxu1 %v5645_v21  ;;  %v277_v55 = vpack.c.b16 %v261_v26, %v261_v26  ;;  %v196_v26 = vld [vmem:[%s5622_s27 + $0xc8] sm:$0xff] }
  0x2d   : > { %1373 = vmatpush.bf16.msrb.mxu3 %v5366_v56  ;;  %1462 = vmatpush.bf16.msrb.mxu0 %v5374_v61  ;;  %v468_v56 = vrot.slane %v8301_v39, 7  ;;  %v8303_v61 = vshll.u32 %v5776_v35, 16  ;;  %v5821_v12 = vsel %vm5697_vm2, %v290_v4, %v415_v5  ;;  %v228_v50 = vpack.c.bf16 %v196_v26, %v196_v26 }
  0x2e   : > { %1099 = vmatmul.bf16.vlgmr.msra.gmra.mxu3 %v5648_v22  ;;  %8400 = vst [vmem:[#allocation5_spill] sm:$0xff] %v5821_v12 }
  0x2f   : > { %v471_v7 = vor.u32 %v8303_v61, %v468_v56  ;;  %v5860_v3 = vunpack.c.l.b16 %v228_v50 }
  0x30   : > { %1141 = vmatpush.bf16.msrb.mxu2 %v5405_v62  ;;  %v209_v62 = vpack.c.bf16 %v177_v41, %v177_v41  ;;  %v5370_v41 = vld [vmem:[%s8295_s1 + $0x58] sm:$0xff] }
  0x31   : > { %1374 = vmatpush.bf16.msrb.mxu3 %v5365_v63  ;;  %1463 = vmatpush.bf16.msrb.mxu0 %v5373_v6  ;;  %v210_v63 = vpack.c.bf16 %v178_v48, %v178_v48  ;;  %v314_v6 = vshrl.u32 %v277_v55, 16 }
  0x32   : > { %v254_v8 = vunpack.c.l.b16 %v209_v62 }
  0x33   : > { %v5825_v13 = vsel %vm5697_vm2, %v314_v6, %v471_v7 }
  0x34   : > { %1142 = vmatpush.bf16.msrb.mxu2 %v5404_v9  ;;  %v5815_v9 = vunpack.c.l.b16 %v210_v63 }
  0x35   : > { %1375 = vmatpush.bf16.msrb.mxu3 %v5364_v10  ;;  %1464 = vmatpush.bf16.msrb.mxu0 %v5372_v23  ;;  %v262_v10 = vunpack.c.l.b16 %v225_v0  ;;  %v180_v23 = vld [vmem:[%s5622_s27 + $0x48] sm:$0xff]  ;;  %v263_v0 = vunpack.c.l.b16 %v227_v49  ;;  %v198_v49 = vld [vmem:[%s5622_s27 + $0xd8] sm:$0xff] }
  0x36   : > { %v5828_v14 = vpack.c.b16 %v5815_v9, %v254_v8  ;;  %v212_v48 = vpack.c.bf16 %v180_v23, %v180_v23 }
  0x37   : > { %v5831_v15 = vpack.c.b16 %v5817_v11, %v262_v10  ;;  %v278_v53 = vpack.c.b16 %v262_v10, %v262_v10  ;;  %v5870_v10 = vpack.c.b16 %v5860_v3, %v263_v0 }
  0x38   : > { %1143 = vmatpush.bf16.msrb.mxu2 %v5403_v43  ;;  %8401 = vst [vmem:[#allocation6_spill] sm:$0xff] %v5828_v14  ;;  %v8310_v30 = vshrl.u32 %v5828_v14, 16  ;;  %v270_v43 = vpack.c.b16 %v254_v8, %v254_v8  ;;  %v5858_v63 = vunpack.c.l.b16 %v212_v48  ;;  %v197_v48 = vld [vmem:[%s5622_s27 + $0xd0] sm:$0xff] }
  0x39   : > { %1376 = vmatpush.bf16.msrb.mxu3 %v5363_v44  ;;  %1465 = vmatpush.bf16.msrb.mxu0 %v5371_v46  ;;  %v8298_v31 = vshrl.u32 %v5831_v15, 16  ;;  %v8315_v44 = vshll.u32 %v5828_v14, 16  ;;  %v211_v46 = vpack.c.bf16 %v179_v19, %v179_v19  ;;  %v8299_v56 = vshll.u32 %v5831_v15, 16 }
  0x3a   : > { %v419_v51 = vrot.slane %v8310_v30, 7  ;;  %v293_v4 = vshrl.u32 %v270_v43, 16  ;;  %v317_v6 = vshrl.u32 %v278_v53, 16  ;;  %v8300_v26 = vshrl.u32 %v5870_v10, 16  ;;  %v5369_v43 = vld [vmem:[%s8295_s1 + $0x50] sm:$0xff] }
  0x3b   : > { %975 = vmatmul.bf16.gmra.mxu0 %v5780_v36  ;;  %1015 = vmatmul.bf16.gmra.mxu2 %v5784_v37  ;;  %v475_v55 = vrot.slane %v8298_v31, 7  ;;  %v255_v62 = vunpack.c.l.b16 %v211_v46  ;;  %v182_v46 = vld [vmem:[%s5622_s27 + $0x58] sm:$0xff]  ;;  %v229_v31 = vpack.c.bf16 %v197_v48, %v197_v48 }
  0x3c   : > { %1064 = vmatmul.bf16.gmra.mxu1 %v5709_v57  ;;  %1144 = vmatpush.bf16.msrb.mxu2 %v5402_v32  ;;  %v422_v5 = vor.u32 %v8315_v44, %v419_v51  ;;  %v181_v32 = vld [vmem:[%s5622_s27 + $0x50] sm:$0xff] }
  0x3d   : > { %1377 = vmatpush.bf16.msrb.mxu3 %v5362_v33  ;;  %1466 = vmatpush.bf16.msrb.mxu0 %v5370_v41  ;;  %v478_v7 = vor.u32 %v8299_v56, %v475_v55  ;;  %v5867_v8 = vpack.c.b16 %v5858_v63, %v255_v62  ;;  %v5401_v33 = vld [vmem:[%s8295_s1 + $0x150] sm:$0xff]  ;;  %v271_v50 = vpack.c.b16 %v255_v62, %v255_v62 }
  0x3e   : > { %1104 = vmatmul.bf16.gmra.mxu3 %v5721_v60  ;;  %v5874_v19 = vsel %vm5697_vm2, %v293_v4, %v422_v5  ;;  %v5361_v41 = vld [vmem:[%s8295_s1 + $0x10] sm:$0xff]  ;;  %v279_v55 = vpack.c.b16 %v263_v0, %v263_v0  ;;  %v482_v4 = vrot.slane %v8300_v26, 7  ;;  %v8302_v5 = vshll.u32 %v5870_v10, 16 }
  0x3f   : > { %8402 = vst [vmem:[#allocation7_spill] sm:$0xff] %v5867_v8  ;;  %v5878_v23 = vsel %vm5697_vm2, %v317_v6, %v478_v7  ;;  %v8308_v24 = vshrl.u32 %v5867_v8, 16  ;;  %v8309_v51 = vshll.u32 %v5867_v8, 16  ;;  %v213_v6 = vpack.c.bf16 %v181_v32, %v181_v32 }
  0x40   : > { %1145 = vmatpush.bf16.msrb.mxu2 %v5401_v33  ;;  %v214_v7 = vpack.c.bf16 %v182_v46, %v182_v46  ;;  %v230_v56 = vpack.c.bf16 %v198_v49, %v198_v49  ;;  %v296_v62 = vshrl.u32 %v271_v50, 16  ;;  %v485_v0 = vor.u32 %v8302_v5, %v482_v4 }
  0x41   : > { %1378 = vmatpush.bf16.msrb.mxu3 %v5361_v41  ;;  %v426_v53 = vrot.slane %v8308_v24, 7  ;;  %1467 = vmatpush.bf16.msrb.mxu0 %v5369_v43  ;;  %v320_v41 = vshrl.u32 %v279_v55, 16  ;;  %v256_v26 = vunpack.c.l.b16 %v213_v6  ;;  %v264_v43 = vunpack.c.l.b16 %v229_v31  ;;  %v184_v31 = vld [vmem:[%s5622_s27 + $0x68] sm:$0xff] }
  0x42   : > { %v5909_v39 = vunpack.c.l.b16 %v214_v7  ;;  %v5911_v32 = vunpack.c.l.b16 %v230_v56  ;;  %v199_v56 = vld [vmem:[%s5622_s27 + $0xe0] sm:$0xff]  ;;  %v200_v55 = vld [vmem:[%s5622_s27 + $0xe8] sm:$0xff]  ;;  %v216_v2 = vpack.c.bf16 %v184_v31, %v184_v31 }
  0x43   : > { %v429_v33 = vor.u32 %v8309_v51, %v426_v53  ;;  %v5919_v48 = vsel %vm5697_vm2, %v320_v41, %v485_v0  ;;  %v183_v53 = vld [vmem:[%s5622_s27 + $0x60] sm:$0xff]  ;;  %v5400_v7 = vld [vmem:[%s8295_s1 + $0x148] sm:$0xff]  ;;  %v5382_v41 = vld [vmem:[%s8295_s1 + $0xb8] sm:$0xff]  ;;  %v272_v0 = vpack.c.b16 %v256_v26, %v256_v26  ;;  %v231_v20 = vpack.c.bf16 %v199_v56, %v199_v56 }
  0x44   : > { %v5922_v49 = vpack.c.b16 %v5909_v39, %v256_v26  ;;  %v5925_v50 = vpack.c.b16 %v5911_v32, %v264_v43  ;;  %v215_v5 = vpack.c.bf16 %v183_v53, %v183_v53  ;;  %1146 = vmatpush.bf16.msrb.mxu2 %v5400_v7  ;;  %v232_v28 = vpack.c.bf16 %v200_v55, %v200_v55 }
  0x45   : > { %v5915_v46 = vsel %vm5697_vm2, %v296_v62, %v429_v33  ;;  %v5360_v62 = vld [vmem:[%s8295_s1 + $0x8] sm:$0xff]  ;;  %1551 = vmatpush.bf16.msrb.mxu1 %v5382_v41  ;;  %v280_v24 = vpack.c.b16 %v264_v43, %v264_v43  ;;  %v5955_v53 = vunpack.c.l.b16 %v216_v2  ;;  %v265_v7 = vunpack.c.l.b16 %v231_v20  ;;  %v5381_v41 = vld [vmem:[%s8295_s1 + $0xb0] sm:$0xff] }
  0x46   : > { %8403 = vst [vmem:[#allocation8_spill] sm:$0xff] %v5915_v46  ;;  %v8313_v4 = vshrl.u32 %v5922_v49, 16  ;;  %v8311_v6 = vshrl.u32 %v5925_v50, 16  ;;  %v5368_v33 = vld [vmem:[%s8295_s1 + $0x48] sm:$0xff]  ;;  %1379 = vmatpush.bf16.msrb.mxu3 %v5360_v62  ;;  %v8314_v61 = vshll.u32 %v5922_v49, 16  ;;  %v8312_v30 = vshll.u32 %v5925_v50, 16 }
  0x47   : > { %8404 = vst [vmem:[#allocation9_spill] sm:$0xff] %v5922_v49  ;;  %1468 = vmatpush.bf16.msrb.mxu0 %v5368_v33  ;;  %v257_v26 = vunpack.c.l.b16 %v215_v5  ;;  %v5957_v31 = vunpack.c.l.b16 %v232_v28  ;;  %v299_v56 = vshrl.u32 %v272_v0, 16  ;;  %v323_v62 = vshrl.u32 %v280_v24, 16  ;;  %v186_v5 = vld [vmem:[%s5622_s27 + $0x78] sm:$0xff]  ;;  %v201_v0 = vld [vmem:[%s5622_s27 + $0xf0] sm:$0xff] }
  0x48   : > { %v433_v42 = vrot.slane %v8313_v4, 7  ;;  %v489_v51 = vrot.slane %v8311_v6, 7  ;;  %v5367_v6 = vld [vmem:[%s8295_s1 + $0x40] sm:$0xff]  ;;  %v281_v44 = vpack.c.b16 %v265_v7, %v265_v7  ;;  %v218_v1 = vpack.c.bf16 %v186_v5, %v186_v5  ;;  %v5378_v5 = vld [vmem:[%s8295_s1 + $0x98] sm:$0xff] }
  0x49   : > { %v5964_v33 = vpack.c.b16 %v5955_v53, %v257_v26  ;;  %v5967_v2 = vpack.c.b16 %v5957_v31, %v265_v7  ;;  %1552 = vmatpush.bf16.msrb.mxu1 %v5381_v41  ;;  %v233_v27 = vpack.c.bf16 %v201_v0, %v201_v0  ;;  %v5422_v0 = vld [vmem:[%s8295_s1 + $0x1f8] sm:$0xff] }
  0x4a   : > { %v436_v55 = vor.u32 %v8314_v61, %v433_v42  ;;  %v492_v43 = vor.u32 %v8312_v30, %v489_v51  ;;  %v185_v51 = vld [vmem:[%s5622_s27 + $0x70] sm:$0xff]  ;;  %v273_v30 = vpack.c.b16 %v257_v26, %v257_v26  ;;  %v5379_v26 = vld [vmem:[%s8295_s1 + $0xa0] sm:$0xff]  ;;  %v326_v7 = vshrl.u32 %v281_v44, 16 }
  0x4b   : > { %980 = vmatmul.bf16.gmra.mxu0 %v5821_v12  ;;  %1020 = vmatmul.bf16.gmra.mxu2 %v5825_v13  ;;  %8405 = vst [vmem:[#allocation10_spill] sm:$0xff] %v5964_v33  ;;  %v8322_v42 = vshrl.u32 %v5964_v33, 16  ;;  %v8321_v24 = vshrl.u32 %v5967_v2, 16  ;;  %v8329_v4 = vshll.u32 %v5964_v33, 16  ;;  %v8326_v38 = vshll.u32 %v5967_v2, 16 }
  0x4c   : > { %1069 = vmatmul.bf16.gmra.mxu1 %v5773_v34  ;;  %v5971_v28 = vsel %vm5697_vm2, %v299_v56, %v436_v55  ;;  %v5975_v20 = vsel %vm5697_vm2, %v323_v62, %v492_v43  ;;  %v5399_v56 = vld [vmem:[%s8295_s1 + $0x140] sm:$0xff]  ;;  %v202_v62 = vld [vmem:[%s5622_s27 + $0xf8] sm:$0xff]  ;;  %v5380_v43 = vld [vmem:[%s8295_s1 + $0xa8] sm:$0xff]  ;;  %1469 = vmatpush.bf16.msrb.mxu0 %v5367_v6  ;;  %v217_v52 = vpack.c.bf16 %v185_v51, %v185_v51  ;;  %v6015_v40 = vunpack.c.l.b16 %v218_v1 }
  0x4d   : > { %v5359_v55 = vld [vmem:[%s8295_s1] sm:$0xff]  ;;  %1147 = vmatpush.bf16.msrb.mxu2 %v5399_v56  ;;  %v440_v61 = vrot.slane %v8322_v42, 7  ;;  %v496_v41 = vrot.slane %v8321_v24, 7  ;;  %v234_v17 = vpack.c.bf16 %v202_v62, %v202_v62  ;;  %1553 = vmatpush.bf16.msrb.mxu1 %v5380_v43  ;;  %v302_v56 = vshrl.u32 %v273_v30, 16  ;;  %v5377_v1 = vld [vmem:[%s8295_s1 + $0x90] sm:$0xff] }
  0x4e   : > { %1109 = vmatmul.bf16.gmra.mxu3 %v5776_v35  ;;  %v258_v42 = vunpack.c.l.b16 %v217_v52  ;;  %v266_v6 = vunpack.c.l.b16 %v233_v27 }
  0x4f   : > { %1380 = vmatpush.bf16.msrb.mxu3 %v5359_v55  ;;  %v443_v55 = vor.u32 %v8329_v4, %v440_v61  ;;  %v499_v24 = vor.u32 %v8326_v38, %v496_v41  ;;  %v6017_v51 = vunpack.c.l.b16 %v234_v17  ;;  %v5376_v41 = vld [vmem:[%s8295_s1 + $0x88] sm:$0xff]  ;;  %v8413_v38 = vmov 0 }
  0x50   : > { %v6031_v52 = vpack.c.b16 %v6015_v40, %v258_v42  ;;  %v274_v62 = vpack.c.b16 %v258_v42, %v258_v42  ;;  %v5430_v42 = vld [vmem:[%s8295_s1 + $0x238] sm:$0xff]  ;;  %v8414_v38 = vsel %vm6092_vm5, 4294967295, %v8413_v38 }
  0x51   : > { %1554 = vmatpush.bf16.msrb.mxu1 %v5379_v26  ;;  %v6024_v30 = vsel %vm5697_vm2, %v302_v56, %v443_v55  ;;  %v6028_v61 = vsel %vm5697_vm2, %v326_v7, %v499_v24  ;;  %v6034_v27 = vpack.c.b16 %v6017_v51, %v266_v6  ;;  %v5414_v24 = vld [vmem:[%s8295_s1 + $0x1b8] sm:$0xff]  ;;  %v282_v56 = vpack.c.b16 %v266_v6, %v266_v6 }
  0x52   : > { %8406 = vst [vmem:[#allocation11_spill] sm:$0xff] %v6024_v30  ;;  %v8327_v17 = vshrl.u32 %v6031_v52, 16  ;;  %1833 = vmatpush.bf16.msra.mxu2 %v5414_v24  ;;  %v8328_v43 = vshll.u32 %v6031_v52, 16  ;;  %2011 = vmatpush.bf16.msra.mxu0 %v5430_v42 }
  0x53   : > { %8407 = vst [vmem:[#allocation12_spill] sm:$0xff] %v6031_v52  ;;  %v8324_v44 = vshrl.u32 %v6034_v27, 16  ;;  %1922 = vmatpush.bf16.msra.mxu3 %v5422_v0  ;;  %v8325_v7 = vshll.u32 %v6034_v27, 16  ;;  %v329_v0 = vshrl.u32 %v282_v56, 16  ;;  %v8410_v56 = vshll.u32 %v5645_v21, 16 }
  0x54   : > { %v447_v26 = vrot.slane %v8327_v17, 7  ;;  %8415 = vst [vmem:[#allocation15_spill] sm:$0xff] %v8414_v38 }
  0x55   : > { %1555 = vmatpush.bf16.msrb.mxu1 %v5378_v5  ;;  %v503_v55 = vrot.slane %v8324_v44, 7  ;;  %v5375_v5 = vld [vmem:[%s8295_s1 + $0x80] sm:$0xff] }
  0x56   : > { %v450_v24 = vor.u32 %v8328_v43, %v447_v26  ;;  %v590_v26 = vpack.c.b16 %v5679_v45, %v5679_v45 }
  0x57   : > { %v506_v6 = vor.u32 %v8325_v7, %v503_v55  ;;  %v544_v55 = vrot.slane %v8410_v56, 1 }
  0x59   : > { %1556 = vmatpush.bf16.msrb.mxu1 %v5377_v1  ;;  %v305_v1 = vshrl.u32 %v274_v62, 16  ;;  %v6076_v44 = vsel %vm5697_vm2, %v329_v0, %v506_v6  ;;  %v591_v62 = vpack.c.b16 %v5634_v16, %v5634_v16  ;;  %v8412_v0 = vshrl.u32 %v5645_v21, 16 }
  0x5a   : > { %8409 = vst [vmem:[#allocation14_spill] sm:$0xff] %v6076_v44  ;;  %v8416_v16 = vshrl.u32 %v5709_v57, 16 }
  0x5b   : > { %985 = vmatmul.bf16.gmra.mxu0 %v5874_v19  ;;  %1025 = vmatmul.bf16.gmra.mxu2 %v5878_v23  ;;  %v611_v42 = vshll.u32 %v591_v62, 16  ;;  %v545_v6 = vor.u32 %v544_v55, %v8412_v0  ;;  %v5413_v55 = vld [vmem:[%s8295_s1 + $0x1b0] sm:$0xff] }
  0x5c   : > { %1074 = vmatmul.bf16.gmra.mxu1 %v5828_v14  ;;  %1834 = vmatpush.bf16.msra.mxu2 %v5413_v55 }
  0x5d   : > { %1557 = vmatpush.bf16.msrb.mxu1 %v5376_v41  ;;  %v6072_v41 = vsel %vm5697_vm2, %v305_v1, %v450_v24  ;;  %v607_v24 = vshll.u32 %v590_v26, 16  ;;  %v613_v7 = vrot.slane %v611_v42, 4 }
  0x5e   : > { %1114 = vmatmul.bf16.gmra.mxu3 %v5831_v15  ;;  %8408 = vst [vmem:[#allocation13_spill] sm:$0xff] %v6072_v41 }
  0x5f   : > { %v609_v17 = vrot.slane %v607_v24, 4  ;;  %v690_v62 = vsel %vm6092_vm5, %v545_v6, %v613_v7  ;;  %v5421_v7 = vld [vmem:[%s8295_s1 + $0x1f0] sm:$0xff] }
  0x60   : > { %1923 = vmatpush.bf16.msra.mxu3 %v5421_v7  ;;  %v592_v7 = vpack.c.b16 %v5764_v25, %v5764_v25 }
  0x61   : > { %1558 = vmatpush.bf16.msrb.mxu1 %v5375_v5  ;;  %v8411_v5 = vshll.u32 %v5709_v57, 16 }
  0x63   : > { %v542_v1 = vrot.slane %v8411_v5, 1 }
  0x65   : > { %v543_v45 = vor.u32 %v542_v1, %v8416_v16  ;;  %v5429_v16 = vld [vmem:[%s8295_s1 + $0x230] sm:$0xff] }
  0x66   : > { %2012 = vmatpush.bf16.msra.mxu0 %v5429_v16  ;;  %v8420_v16 = vshll.u32 %v5773_v34, 16 }
  0x67   : > { %v6102_v26 = vsel %vm6092_vm5, %v543_v45, %v609_v17 }
  0x6b   : > { %990 = vmatmul.bf16.gmra.mxu0 %v5915_v46  ;;  %1030 = vmatmul.bf16.gmra.mxu2 %v5919_v48 }
  0x6c   : > { %1079 = vmatmul.bf16.gmra.mxu1 %v5867_v8 }
  0x6e   : > { %1119 = vmatmul.bf16.gmra.mxu3 %v5870_v10 }
  0x7b   : > { %995 = vmatmul.bf16.gmra.mxu0 %v5971_v28  ;;  %1035 = vmatmul.bf16.gmra.mxu2 %v5975_v20 }
  0x7c   : > { %1084 = vmatmul.bf16.gmra.mxu1 %v5922_v49 }
  0x7e   : > { %1124 = vmatmul.bf16.gmra.mxu3 %v5925_v50 }
  0x8b   : > { %1000 = vmatmul.bf16.gmra.mxu0 %v6024_v30  ;;  %1040 = vmatmul.bf16.gmra.mxu2 %v6028_v61 }
  0x8c   : > { %1089 = vmatmul.bf16.gmra.mxu1 %v5964_v33 }
  0x8e   : > { %1129 = vmatmul.bf16.gmra.mxu3 %v5967_v2 }
  0x9b   : > { %1005 = vmatmul.bf16.gmra.mxu0 %v6072_v41  ;;  %1045 = vmatmul.bf16.gmra.mxu2 %v6076_v44 }
  0x9c   : > { %1094 = vmatmul.bf16.gmra.mxu1 %v6031_v52 }
  0x9e   : > { %1134 = vmatmul.bf16.gmra.mxu3 %v6034_v27 }
  0xa8   : > { %v971_v56 = vpop.f32.mrf.mxu0 }
  0xa9   : > { %v1060_v5 = vpop.f32.mrf.mxu1 }
  0xaa   : > { %v6104_v43 = vadd.f32 %v1060_v5, %v971_v56 }
  0xab   : > { %1148 = vmatmul.bf16.vlgmr.msrb.gmra.mxu2 %v690_v62  ;;  %1470 = vmatmul.bf16.vlgmr.msrb.gmra.mxu0 %v5709_v57 }
  0xac   : > { %1559 = vmatmul.bf16.vlgmr.msrb.gmra.mxu1 %v6102_v26 }
  0xae   : > { %1381 = vmatmul.bf16.vlgmr.msrb.gmra.mxu3 %v5780_v36  ;;  %v1011_v42 = vpop.f32.mrf.mxu2 }
  0xb0   : > { %v973_v24 = vpop.f32.mrf.mxu0 }
  0xb1   : > { %v1100_v17 = vpop.f32.mrf.mxu3  ;;  %v1062_v0 = vpop.f32.mrf.mxu1 }
  0xb2   : > { %v6115_v1 = vadd.f32 %v1100_v17, %v1011_v42  ;;  %v6117_v6 = vadd.f32 %v1062_v0, %v973_v24 }
  0xb4   : > { %8417 = vst [vmem:[#allocation16_spill] sm:$0xff] %v6115_v1 }
  0xb6   : > { %v1013_v45 = vpop.f32.mrf.mxu2 }
  0xb8   : > { %v976_v4 = vpop.f32.mrf.mxu0 }
  0xb9   : > { %v1102_v56 = vpop.f32.mrf.mxu3  ;;  %v1065_v54 = vpop.f32.mrf.mxu1 }
  0xba   : > { %v6122_v5 = vadd.f32 %v1102_v56, %v1013_v45  ;;  %v6124_v55 = vadd.f32 %v1065_v54, %v976_v4  ;;  %v546_v45 = vrot.slane %v8420_v16, 1  ;;  %v615_v54 = vshll.u32 %v592_v7, 16  ;;  %v5412_v7 = vld [vmem:[%s8295_s1 + $0x1a8] sm:$0xff] }
  0xbb   : > { %1153 = vmatmul.bf16.gmra.mxu2 %v6102_v26  ;;  %1475 = vmatmul.bf16.gmra.mxu0 %v5645_v21  ;;  %v8421_v21 = vshrl.u32 %v5773_v34, 16 }
  0xbc   : > { %8418 = vst [vmem:[#allocation17_spill] sm:$0xff] %v6122_v5  ;;  %1564 = vmatmul.bf16.gmra.mxu1 %v690_v62  ;;  %1835 = vmatpush.bf16.msra.mxu2 %v5412_v7 }
  0xbd   : > { %v547_v44 = vor.u32 %v546_v45, %v8421_v21 }
  0xbe   : > { %1386 = vmatmul.bf16.gmra.mxu3 %v5713_v58  ;;  %v1016_v42 = vpop.f32.mrf.mxu2  ;;  %v617_v58 = vrot.slane %v615_v54, 4 }
  0xc0   : > { %v978_v0 = vpop.f32.mrf.mxu0 }
  0xc1   : > { %v1105_v17 = vpop.f32.mrf.mxu3  ;;  %v1067_v4 = vpop.f32.mrf.mxu1 }
  0xc2   : > { %v6131_v24 = vadd.f32 %v1105_v17, %v1016_v42  ;;  %v6135_v56 = vadd.f32 %v1067_v4, %v978_v0  ;;  %v6143_v42 = vsel %vm6092_vm5, %v547_v44, %v617_v58  ;;  %v5420_v44 = vld [vmem:[%s8295_s1 + $0x1e8] sm:$0xff]  ;;  %v8425_v4 = vshll.u32 %v5828_v14, 16 }
  0xc3   : > { %8423 = vst [vmem:[#allocation20_spill] sm:$0xff] %v6143_v42  ;;  %1924 = vmatpush.bf16.msra.mxu3 %v5420_v44 }
  0xc4   : > { %8419 = vst [vmem:[#allocation18_spill] sm:$0xff] %v6131_v24  ;;  %v548_v21 = vrot.slane %v8425_v4, 1 }
  0xc6   : > { %v1018_v62 = vpop.f32.mrf.mxu2 }
  0xc8   : > { %v981_v25 = vpop.f32.mrf.mxu0 }
  0xc9   : > { %v1107_v5 = vpop.f32.mrf.mxu3  ;;  %v1070_v17 = vpop.f32.mrf.mxu1 }
  0xca   : > { %v6139_v1 = vadd.f32 %v1107_v5, %v1018_v62  ;;  %v6145_v24 = vadd.f32 %v1070_v17, %v981_v25  ;;  %v593_v5 = vpack.c.b16 %v5815_v9, %v5815_v9  ;;  %v5428_v25 = vld [vmem:[%s8295_s1 + $0x228] sm:$0xff]  ;;  %v8426_v17 = vshrl.u32 %v5828_v14, 16 }
  0xcb   : > { %1158 = vmatmul.bf16.gmra.mxu2 %v6143_v42  ;;  %1480 = vmatmul.bf16.gmra.mxu0 %v5709_v57 }
  0xcc   : > { %8422 = vst [vmem:[#allocation19_spill] sm:$0xff] %v6139_v1  ;;  %1569 = vmatmul.bf16.gmra.mxu1 %v6102_v26  ;;  %v619_v58 = vshll.u32 %v593_v5, 16  ;;  %v549_v1 = vor.u32 %v548_v21, %v8426_v17  ;;  %2013 = vmatpush.bf16.msra.mxu0 %v5428_v25  ;;  %v594_v21 = vpack.c.b16 %v5858_v63, %v5858_v63  ;;  %v8429_v17 = vshll.u32 %v5867_v8, 16 }
  0xce   : > { %1391 = vmatmul.bf16.gmra.mxu3 %v5780_v36  ;;  %v1021_v0 = vpop.f32.mrf.mxu2  ;;  %v621_v7 = vrot.slane %v619_v58, 4 }
  0xd0   : > { %v983_v54 = vpop.f32.mrf.mxu0  ;;  %v6174_v5 = vsel %vm6092_vm5, %v549_v1, %v621_v7  ;;  %v623_v7 = vshll.u32 %v594_v21, 16 }
  0xd1   : > { %v1110_v16 = vpop.f32.mrf.mxu3  ;;  %v1072_v9 = vpop.f32.mrf.mxu1 }
  0xd2   : > { %v6159_v45 = vadd.f32 %v1110_v16, %v1021_v0  ;;  %v6163_v62 = vadd.f32 %v1072_v9, %v983_v54 }
  0xd4   : > { %8424 = vst [vmem:[#allocation21_spill] sm:$0xff] %v6159_v45 }
  0xd6   : > { %v1023_v44 = vpop.f32.mrf.mxu2 }
  0xd8   : > { %v986_v45 = vpop.f32.mrf.mxu0 }
  0xd9   : > { %v1112_v0 = vpop.f32.mrf.mxu3  ;;  %v1075_v54 = vpop.f32.mrf.mxu1 }
  0xda   : > { %v6170_v16 = vadd.f32 %v1112_v0, %v1023_v44  ;;  %v6176_v4 = vadd.f32 %v1075_v54, %v986_v45  ;;  %v550_v45 = vrot.slane %v8429_v17, 1  ;;  %v8430_v54 = vshrl.u32 %v5867_v8, 16 }
  0xdb   : > { %1163 = vmatmul.bf16.gmra.mxu2 %v6174_v5  ;;  %1485 = vmatmul.bf16.gmra.mxu0 %v5773_v34  ;;  %v625_v34 = vrot.slane %v623_v7, 4 }
  0xdc   : > { %8427 = vst [vmem:[#allocation22_spill] sm:$0xff] %v6170_v16  ;;  %1574 = vmatmul.bf16.gmra.mxu1 %v6143_v42  ;;  %v551_v16 = vor.u32 %v550_v45, %v8430_v54  ;;  %v8434_v45 = vshll.u32 %v5922_v49, 16 }
  0xde   : > { %1396 = vmatmul.bf16.gmra.mxu3 %v5821_v12  ;;  %v1026_v58 = vpop.f32.mrf.mxu2  ;;  %v552_v7 = vrot.slane %v8434_v45, 1 }
  0xe0   : > { %v988_v1 = vpop.f32.mrf.mxu0 }
  0xe1   : > { %v1115_v9 = vpop.f32.mrf.mxu3  ;;  %v1077_v44 = vpop.f32.mrf.mxu1 }
  0xe2   : > { %v6184_v25 = vadd.f32 %v1115_v9, %v1026_v58  ;;  %v6188_v0 = vadd.f32 %v1077_v44, %v988_v1  ;;  %v6196_v58 = vsel %vm6092_vm5, %v551_v16, %v625_v34  ;;  %v5419_v34 = vld [vmem:[%s8295_s1 + $0x1e0] sm:$0xff] }
  0xe3   : > { %8432 = vst [vmem:[#allocation25_spill] sm:$0xff] %v6196_v58  ;;  %1925 = vmatpush.bf16.msra.mxu3 %v5419_v34 }
  0xe4   : > { %8428 = vst [vmem:[#allocation23_spill] sm:$0xff] %v6184_v25 }
  0xe6   : > { %v1028_v42 = vpop.f32.mrf.mxu2 }
  0xe8   : > { %v991_v63 = vpop.f32.mrf.mxu0 }
  0xe9   : > { %v1117_v12 = vpop.f32.mrf.mxu3  ;;  %v1080_v9 = vpop.f32.mrf.mxu1 }
  0xea   : > { %v6192_v57 = vadd.f32 %v1117_v12, %v1028_v42  ;;  %v6198_v25 = vadd.f32 %v1080_v9, %v991_v63  ;;  %v595_v12 = vpack.c.b16 %v5909_v39, %v5909_v39  ;;  %v5411_v42 = vld [vmem:[%s8295_s1 + $0x1a0] sm:$0xff]  ;;  %v8435_v9 = vshrl.u32 %v5922_v49, 16 }
  0xeb   : > { %1168 = vmatmul.bf16.gmra.mxu2 %v6196_v58  ;;  %1490 = vmatmul.bf16.gmra.mxu0 %v5828_v14  ;;  %v5427_v63 = vld [vmem:[%s8295_s1 + $0x220] sm:$0xff] }
  0xec   : > { %8431 = vst [vmem:[#allocation24_spill] sm:$0xff] %v6192_v57  ;;  %1579 = vmatmul.bf16.gmra.mxu1 %v6174_v5  ;;  %1836 = vmatpush.bf16.msra.mxu2 %v5411_v42  ;;  %v627_v44 = vshll.u32 %v595_v12, 16  ;;  %v553_v57 = vor.u32 %v552_v7, %v8435_v9  ;;  %v596_v7 = vpack.c.b16 %v5955_v53, %v5955_v53  ;;  %v8438_v9 = vshll.u32 %v5964_v33, 16 }
  0xed   : > { %2014 = vmatpush.bf16.msra.mxu0 %v5427_v63 }
  0xee   : > { %1401 = vmatmul.bf16.gmra.mxu3 %v5874_v19  ;;  %v1031_v16 = vpop.f32.mrf.mxu2  ;;  %v629_v42 = vrot.slane %v627_v44, 4 }
  0xf0   : > { %v993_v17 = vpop.f32.mrf.mxu0  ;;  %v6227_v12 = vsel %vm6092_vm5, %v553_v57, %v629_v42  ;;  %v631_v42 = vshll.u32 %v596_v7, 16 }
  0xf1   : > { %v1120_v21 = vpop.f32.mrf.mxu3  ;;  %v1082_v39 = vpop.f32.mrf.mxu1 }
  0xf2   : > { %v6212_v1 = vadd.f32 %v1120_v21, %v1031_v16  ;;  %v6216_v54 = vadd.f32 %v1082_v39, %v993_v17 }
  0xf4   : > { %8433 = vst [vmem:[#allocation26_spill] sm:$0xff] %v6212_v1 }
  0xf6   : > { %v1033_v34 = vpop.f32.mrf.mxu2 }
  0xf8   : > { %v996_v1 = vpop.f32.mrf.mxu0 }
  0xf9   : > { %v1122_v16 = vpop.f32.mrf.mxu3  ;;  %v1085_v17 = vpop.f32.mrf.mxu1 }
  0xfa   : > { %v6223_v21 = vadd.f32 %v1122_v16, %v1033_v34  ;;  %v6229_v45 = vadd.f32 %v1085_v17, %v996_v1  ;;  %v554_v1 = vrot.slane %v8438_v9, 1  ;;  %v8439_v17 = vshrl.u32 %v5964_v33, 16 }
  0xfb   : > { %1173 = vmatmul.bf16.gmra.mxu2 %v6227_v12  ;;  %1495 = vmatmul.bf16.gmra.mxu0 %v5867_v8  ;;  %v633_v8 = vrot.slane %v631_v42, 4 }
  0xfc   : > { %8436 = vst [vmem:[#allocation27_spill] sm:$0xff] %v6223_v21  ;;  %1584 = vmatmul.bf16.gmra.mxu1 %v6196_v58  ;;  %v555_v21 = vor.u32 %v554_v1, %v8439_v17  ;;  %v8443_v1 = vshll.u32 %v6031_v52, 16  ;;  %v5426_v17 = vld [vmem:[%s8295_s1 + $0x218] sm:$0xff] }
  0xfd   : > { %2015 = vmatpush.bf16.msra.mxu0 %v5426_v17  ;;  %v8448_v17 = vshll.u32 %v5648_v22, 16 }
  0xfe   : > { %1406 = vmatmul.bf16.gmra.mxu3 %v5915_v46  ;;  %v1036_v44 = vpop.f32.mrf.mxu2  ;;  %v556_v42 = vrot.slane %v8443_v1, 1 }
 0x100   : > { %v998_v57 = vpop.f32.mrf.mxu0 }
 0x101   : > { %v1125_v39 = vpop.f32.mrf.mxu3  ;;  %v1087_v34 = vpop.f32.mrf.mxu1 }
 0x102   : > { %v6237_v63 = vadd.f32 %v1125_v39, %v1036_v44  ;;  %v6241_v16 = vadd.f32 %v1087_v34, %v998_v57  ;;  %v6249_v44 = vsel %vm6092_vm5, %v555_v21, %v633_v8  ;;  %v5418_v8 = vld [vmem:[%s8295_s1 + $0x1d8] sm:$0xff] }
 0x103   : > { %8441 = vst [vmem:[#allocation30_spill] sm:$0xff] %v6249_v44  ;;  %1926 = vmatpush.bf16.msra.mxu3 %v5418_v8 }
 0x104   : > { %8437 = vst [vmem:[#allocation28_spill] sm:$0xff] %v6237_v63 }
 0x106   : > { %v1038_v58 = vpop.f32.mrf.mxu2 }
 0x108   : > { %v1001_v53 = vpop.f32.mrf.mxu0 }
 0x109   : > { %v1127_v46 = vpop.f32.mrf.mxu3  ;;  %v1090_v39 = vpop.f32.mrf.mxu1 }
 0x10a   : > { %v6245_v14 = vadd.f32 %v1127_v46, %v1038_v58  ;;  %v6251_v63 = vadd.f32 %v1090_v39, %v1001_v53  ;;  %v597_v46 = vpack.c.b16 %v6015_v40, %v6015_v40  ;;  %v5410_v58 = vld [vmem:[%s8295_s1 + $0x198] sm:$0xff]  ;;  %v8444_v39 = vshrl.u32 %v6031_v52, 16 }
 0x10b   : > { %1178 = vmatmul.bf16.gmra.mxu2 %v6249_v44  ;;  %1500 = vmatmul.bf16.gmra.mxu0 %v5922_v49 }
 0x10c   : > { %8440 = vst [vmem:[#allocation29_spill] sm:$0xff] %v6245_v14  ;;  %1589 = vmatmul.bf16.gmra.mxu1 %v6227_v12  ;;  %1837 = vmatpush.bf16.msra.mxu2 %v5410_v58  ;;  %v635_v34 = vshll.u32 %v597_v46, 16  ;;  %v557_v58 = vor.u32 %v556_v42, %v8444_v39 }
 0x10e   : > { %1411 = vmatmul.bf16.gmra.mxu3 %v5971_v28  ;;  %v1041_v21 = vpop.f32.mrf.mxu2  ;;  %v637_v8 = vrot.slane %v635_v34, 4 }
 0x110   : > { %v1003_v9 = vpop.f32.mrf.mxu0  ;;  %v6280_v46 = vsel %vm6092_vm5, %v557_v58, %v637_v8 }
 0x111   : > { %v1130_v7 = vpop.f32.mrf.mxu3  ;;  %v1092_v40 = vpop.f32.mrf.mxu1  ;;  %8446 = vst [vmem:[#allocation33_spill] sm:$0xff] %v6280_v46 }
 0x112   : > { %v6265_v57 = vadd.f32 %v1130_v7, %v1041_v21  ;;  %v6272_v53 = vadd.f32 %v1092_v40, %v1003_v9 }
 0x114   : > { %8442 = vst [vmem:[#allocation31_spill] sm:$0xff] %v6265_v57 }
 0x116   : > { %v1043_v14 = vpop.f32.mrf.mxu2 }
 0x118   : > { %v1006_v57 = vpop.f32.mrf.mxu0 }
 0x119   : > { %v1132_v21 = vpop.f32.mrf.mxu3  ;;  %v1095_v1 = vpop.f32.mrf.mxu1 }
 0x11a   : > { %v6276_v7 = vadd.f32 %v1132_v21, %v1043_v14  ;;  %v6282_v49 = vadd.f32 %v1095_v1, %v1006_v57  ;;  %v598_v14 = vpack.c.b16 %v5636_v18, %v5636_v18  ;;  %v558_v57 = vrot.slane %v8448_v17, 1 }
 0x11b   : > { %1183 = vmatmul.bf16.gmra.mxu2 %v6280_v46  ;;  %1505 = vmatmul.bf16.gmra.mxu0 %v5964_v33  ;;  %v8449_v21 = vshrl.u32 %v5648_v22, 16 }
 0x11c   : > { %8445 = vst [vmem:[#allocation32_spill] sm:$0xff] %v6276_v7  ;;  %1594 = vmatmul.bf16.gmra.mxu1 %v6249_v44  ;;  %v639_v39 = vshll.u32 %v598_v14, 16  ;;  %v599_v14 = vpack.c.b16 %v5683_v47, %v5683_v47 }
 0x11d   : > { %v559_v1 = vor.u32 %v558_v57, %v8449_v21 }
 0x11e   : > { %1416 = vmatmul.bf16.gmra.mxu3 %v6024_v30  ;;  %v1046_v9 = vpop.f32.mrf.mxu2  ;;  %v641_v7 = vrot.slane %v639_v39, 4  ;;  %v8451_v39 = vshll.u32 %v5721_v60, 16  ;;  %v643_v21 = vshll.u32 %v599_v14, 16 }
 0x120   : > { %v1008_v40 = vpop.f32.mrf.mxu0 }
 0x121   : > { %v1135_v42 = vpop.f32.mrf.mxu3  ;;  %v1097_v58 = vpop.f32.mrf.mxu1 }
 0x122   : > { %v6290_v34 = vadd.f32 %v1135_v42, %v1046_v9  ;;  %v6294_v8 = vadd.f32 %v1097_v58, %v1008_v40  ;;  %v6302_v9 = vsel %vm6092_vm5, %v559_v1, %v641_v7  ;;  %v560_v58 = vrot.slane %v8451_v39, 1 }
 0x124   : > { %8447 = vst [vmem:[#allocation34_spill] sm:$0xff] %v6290_v34 }
 0x126   : > { %v1048_v33 = vpop.f32.mrf.mxu2 }
 0x128   : > { %v1471_v18 = vpop.f32.mrf.mxu0 }
 0x129   : > { %v1137_v44 = vpop.f32.mrf.mxu3  ;;  %v1560_v42 = vpop.f32.mrf.mxu1 }
 0x12a   : > { %v6298_v30 = vadd.f32 %v1137_v44, %v1048_v33  ;;  %v5409_v33 = vld [vmem:[%s8295_s1 + $0x190] sm:$0xff] }
 0x12b   : > { %1188 = vmatmul.bf16.gmra.mxu2 %v6302_v9  ;;  %1510 = vmatmul.bf16.gmra.mxu0 %v6031_v52  ;;  %v5417_v44 = vld [vmem:[%s8295_s1 + $0x1d0] sm:$0xff]  ;;  %v8452_v52 = vshrl.u32 %v5721_v60, 16 }
 0x12c   : > { %8450 = vst [vmem:[#allocation35_spill] sm:$0xff] %v6298_v30  ;;  %1599 = vmatmul.bf16.gmra.mxu1 %v6280_v46  ;;  %1838 = vmatpush.bf16.msra.mxu2 %v5409_v33  ;;  %v5425_v30 = vld [vmem:[%s8295_s1 + $0x210] sm:$0xff] }
 0x12d   : > { %1927 = vmatpush.bf16.msra.mxu3 %v5417_v44  ;;  %2016 = vmatpush.bf16.msra.mxu0 %v5425_v30  ;;  %v561_v33 = vor.u32 %v560_v58, %v8452_v52  ;;  %v645_v44 = vrot.slane %v643_v21, 4  ;;  %v600_v52 = vpack.c.b16 %v5766_v29, %v5766_v29  ;;  %v8454_v58 = vshll.u32 %v5776_v35, 16 }
 0x12e   : > { %1421 = vmatmul.bf16.gmra.mxu3 %v6072_v41  ;;  %v1149_v7 = vpop.f32.mrf.mxu2 }
 0x12f   : > { %v1150_v40 = vadd.f32 %v1149_v7, %v6104_v43  ;;  %v6329_v14 = vsel %vm6092_vm5, %v561_v33, %v645_v44  ;;  %v562_v21 = vrot.slane %v8454_v58, 1 }
 0x130   : > { %v1473_v57 = vpop.f32.mrf.mxu0 }
 0x131   : > { %v1382_v17 = vpop.f32.mrf.mxu3  ;;  %v1562_v1 = vpop.f32.mrf.mxu1 }
 0x132   : > { %v1383_v47 = vadd.f32 %v1382_v17, %v1150_v40 }
 0x134   : > { %v1472_v34 = vadd.f32 %v1471_v18, %v1383_v47  ;;  %v647_v47 = vshll.u32 %v600_v52, 16 }
 0x136   : > { %v6324_v46 = vadd.f32 %v1560_v42, %v1472_v34  ;;  %v1151_v43 = vpop.f32.mrf.mxu2 }
 0x137   : > { %v1152_v7 = vadd.f32 %v1151_v43, %v6117_v6  ;;  %v8455_v43 = vshrl.u32 %v5776_v35, 16 }
 0x138   : > { %8453 = vst [vmem:[#allocation36_spill] sm:$0xff] %v6324_v46  ;;  %v1476_v39 = vpop.f32.mrf.mxu0 }
 0x139   : > { %v1384_v41 = vpop.f32.mrf.mxu3  ;;  %v1565_v17 = vpop.f32.mrf.mxu1 }
 0x13a   : > { %v1385_v40 = vadd.f32 %v1384_v41, %v1152_v7  ;;  %v563_v7 = vor.u32 %v562_v21, %v8455_v43 }
 0x13b   : > { %1193 = vmatmul.bf16.gmra.mxu2 %v6329_v14  ;;  %1515 = vmatmul.bf16.gmra.mxu0 %v5648_v22 }
 0x13c   : > { %v1474_v30 = vadd.f32 %v1473_v57, %v1385_v40  ;;  %1604 = vmatmul.bf16.gmra.mxu1 %v6302_v9  ;;  %v649_v40 = vrot.slane %v647_v47, 4 }
 0x13e   : > { %1426 = vmatmul.bf16.gmra.mxu3 %v5717_v59  ;;  %v6337_v6 = vadd.f32 %v1562_v1, %v1474_v30  ;;  %v1154_v34 = vpop.f32.mrf.mxu2 }
 0x13f   : > { %v1155_v18 = vadd.f32 %v1154_v34, %v6124_v55  ;;  %v6349_v34 = vsel %vm6092_vm5, %v563_v7, %v649_v40 }
 0x140   : > { %v1478_v41 = vpop.f32.mrf.mxu0 }
 0x141   : > { %v1387_v42 = vpop.f32.mrf.mxu3  ;;  %v1567_v57 = vpop.f32.mrf.mxu1 }
 0x142   : > { %v1388_v33 = vadd.f32 %v1387_v42, %v1155_v18  ;;  %v5416_v18 = vld [vmem:[%s8295_s1 + $0x1c8] sm:$0xff] }
 0x143   : > { %1928 = vmatpush.bf16.msra.mxu3 %v5416_v18 }
 0x144   : > { %v1477_v44 = vadd.f32 %v1476_v39, %v1388_v33 }
 0x146   : > { %v6344_v46 = vadd.f32 %v1565_v17, %v1477_v44  ;;  %v1156_v29 = vpop.f32.mrf.mxu2  ;;  %v5408_v17 = vld [vmem:[%s8295_s1 + $0x188] sm:$0xff]  ;;  %v8456_v44 = vshll.u32 %v5831_v15, 16 }
 0x147   : > { %v1157_v1 = vadd.f32 %v1156_v29, %v6135_v56  ;;  %v601_v56 = vpack.c.b16 %v5817_v11, %v5817_v11  ;;  %1839 = vmatpush.bf16.msra.mxu2 %v5408_v17  ;;  %v5424_v29 = vld [vmem:[%s8295_s1 + $0x208] sm:$0xff] }
 0x148   : > { %v1481_v55 = vpop.f32.mrf.mxu0  ;;  %v564_v11 = vrot.slane %v8456_v44, 1  ;;  %2017 = vmatpush.bf16.msra.mxu0 %v5424_v29  ;;  %v8458_v29 = vshll.u32 %v5870_v10, 16 }
 0x149   : > { %v1389_v30 = vpop.f32.mrf.mxu3  ;;  %v1570_v52 = vpop.f32.mrf.mxu1  ;;  %v651_v43 = vshll.u32 %v601_v56, 16 }
 0x14a   : > { %v1390_v58 = vadd.f32 %v1389_v30, %v1157_v1 }
 0x14b   : > { %1198 = vmatmul.bf16.gmra.mxu2 %v6349_v34  ;;  %1520 = vmatmul.bf16.gmra.mxu0 %v5721_v60 }
 0x14c   : > { %v1479_v39 = vadd.f32 %v1478_v41, %v1390_v58  ;;  %1609 = vmatmul.bf16.gmra.mxu1 %v6329_v14  ;;  %v653_v58 = vrot.slane %v651_v43, 4 }
 0x14e   : > { %1431 = vmatmul.bf16.gmra.mxu3 %v5784_v37  ;;  %v6363_v42 = vadd.f32 %v1567_v57, %v1479_v39  ;;  %v1159_v21 = vpop.f32.mrf.mxu2  ;;  %v8457_v57 = vshrl.u32 %v5831_v15, 16 }
 0x14f   : > { %v1160_v41 = vadd.f32 %v1159_v21, %v6145_v24 }
 0x150   : > { %v1483_v33 = vpop.f32.mrf.mxu0  ;;  %v565_v30 = vor.u32 %v564_v11, %v8457_v57 }
 0x151   : > { %v1392_v47 = vpop.f32.mrf.mxu3  ;;  %v1572_v40 = vpop.f32.mrf.mxu1 }
 0x152   : > { %v1393_v7 = vadd.f32 %v1392_v47, %v1160_v41  ;;  %v6378_v56 = vsel %vm6092_vm5, %v565_v30, %v653_v58 }
 0x154   : > { %v1482_v1 = vadd.f32 %v1481_v55, %v1393_v7 }
 0x156   : > { %v6373_v39 = vadd.f32 %v1570_v52, %v1482_v1  ;;  %v1161_v24 = vpop.f32.mrf.mxu2  ;;  %v566_v1 = vrot.slane %v8458_v29, 1 }
 0x157   : > { %v1162_v17 = vadd.f32 %v1161_v24, %v6163_v62  ;;  %v602_v62 = vpack.c.b16 %v5860_v3, %v5860_v3  ;;  %v8459_v24 = vshrl.u32 %v5870_v10, 16 }
 0x158   : > { %v1486_v21 = vpop.f32.mrf.mxu0 }
 0x159   : > { %v1394_v18 = vpop.f32.mrf.mxu3  ;;  %v1575_v47 = vpop.f32.mrf.mxu1  ;;  %v655_v57 = vshll.u32 %v602_v62, 16 }
 0x15a   : > { %v1395_v41 = vadd.f32 %v1394_v18, %v1162_v17  ;;  %v567_v17 = vor.u32 %v566_v1, %v8459_v24 }
 0x15b   : > { %1203 = vmatmul.bf16.gmra.mxu2 %v6378_v56  ;;  %1525 = vmatmul.bf16.gmra.mxu0 %v5776_v35  ;;  %v657_v18 = vrot.slane %v655_v57, 4 }
 0x15c   : > { %v1484_v55 = vadd.f32 %v1483_v33, %v1395_v41  ;;  %1614 = vmatmul.bf16.gmra.mxu1 %v6349_v34 }
 0x15e   : > { %1436 = vmatmul.bf16.gmra.mxu3 %v5825_v13  ;;  %v6386_v52 = vadd.f32 %v1572_v40, %v1484_v55  ;;  %v1164_v44 = vpop.f32.mrf.mxu2 }
 0x15f   : > { %v1165_v11 = vadd.f32 %v1164_v44, %v6176_v4  ;;  %v6398_v44 = vsel %vm6092_vm5, %v567_v17, %v657_v18 }
 0x160   : > { %v1488_v7 = vpop.f32.mrf.mxu0 }
 0x161   : > { %v1397_v43 = vpop.f32.mrf.mxu3  ;;  %v1577_v33 = vpop.f32.mrf.mxu1 }
 0x162   : > { %v1398_v30 = vadd.f32 %v1397_v43, %v1165_v11  ;;  %v5415_v11 = vld [vmem:[%s8295_s1 + $0x1c0] sm:$0xff] }
 0x163   : > { %1929 = vmatpush.bf16.msra.mxu3 %v5415_v11 }
 0x164   : > { %v1487_v58 = vadd.f32 %v1486_v21, %v1398_v30 }
 0x166   : > { %v6393_v41 = vadd.f32 %v1575_v47, %v1487_v58  ;;  %v1166_v3 = vpop.f32.mrf.mxu2  ;;  %v5407_v47 = vld [vmem:[%s8295_s1 + $0x180] sm:$0xff]  ;;  %v8460_v58 = vshll.u32 %v5925_v50, 16 }
 0x167   : > { %v1167_v40 = vadd.f32 %v1166_v3, %v6188_v0  ;;  %v603_v0 = vpack.c.b16 %v5911_v32, %v5911_v32  ;;  %1840 = vmatpush.bf16.msra.mxu2 %v5407_v47  ;;  %v5423_v3 = vld [vmem:[%s8295_s1 + $0x200] sm:$0xff] }
 0x168   : > { %v1491_v4 = vpop.f32.mrf.mxu0  ;;  %v568_v32 = vrot.slane %v8460_v58, 1  ;;  %2018 = vmatpush.bf16.msra.mxu0 %v5423_v3 }
 0x169   : > { %v1399_v55 = vpop.f32.mrf.mxu3  ;;  %v1580_v62 = vpop.f32.mrf.mxu1  ;;  %v659_v24 = vshll.u32 %v603_v0, 16 }
 0x16a   : > { %v1400_v29 = vadd.f32 %v1399_v55, %v1167_v40  ;;  %v8462_v40 = vshrl.u32 %v5925_v50, 16 }
 0x16b   : > { %1208 = vmatmul.bf16.gmra.mxu2 %v6398_v44  ;;  %1530 = vmatmul.bf16.gmra.mxu0 %v5831_v15 }
 0x16c   : > { %v1489_v21 = vadd.f32 %v1488_v7, %v1400_v29  ;;  %1619 = vmatmul.bf16.gmra.mxu1 %v6378_v56  ;;  %v569_v55 = vor.u32 %v568_v32, %v8462_v40  ;;  %v661_v29 = vrot.slane %v659_v24, 4 }
 0x16e   : > { %1441 = vmatmul.bf16.gmra.mxu3 %v5878_v23  ;;  %v6412_v43 = vadd.f32 %v1577_v33, %v1489_v21  ;;  %v1169_v1 = vpop.f32.mrf.mxu2 }
 0x16f   : > { %v1170_v7 = vadd.f32 %v1169_v1, %v6198_v25  ;;  %v6429_v1 = vsel %vm6092_vm5, %v569_v55, %v661_v29  ;;  %v8465_v29 = vshrl.u32 %v5967_v2, 16 }
 0x170   : > { %v1493_v30 = vpop.f32.mrf.mxu0 }
 0x171   : > { %v1402_v57 = vpop.f32.mrf.mxu3  ;;  %v6417_v18 = vpop.f32.mrf.mxu1 }
 0x172   : > { %v1403_v17 = vadd.f32 %v1402_v57, %v1170_v7  ;;  %8461 = vst [vmem:[#allocation37_spill] sm:$0xff] %v6417_v18 }
 0x174   : > { %v1492_v33 = vadd.f32 %v1491_v4, %v1403_v17  ;;  %v8463_v17 = vshll.u32 %v5967_v2, 16 }
 0x176   : > { %v6424_v25 = vadd.f32 %v1580_v62, %v1492_v33  ;;  %v1171_v21 = vpop.f32.mrf.mxu2  ;;  %v570_v3 = vrot.slane %v8463_v17, 1 }
 0x177   : > { %v1172_v47 = vadd.f32 %v1171_v21, %v6216_v54  ;;  %v604_v54 = vpack.c.b16 %v5957_v31, %v5957_v31 }
 0x178   : > { %v1496_v0 = vpop.f32.mrf.mxu0  ;;  %v571_v21 = vor.u32 %v570_v3, %v8465_v29 }
 0x179   : > { %v1404_v11 = vpop.f32.mrf.mxu3  ;;  %v1585_v57 = vpop.f32.mrf.mxu1  ;;  %v663_v33 = vshll.u32 %v604_v54, 16 }
 0x17a   : > { %v1405_v7 = vadd.f32 %v1404_v11, %v1172_v47 }
 0x17b   : > { %1213 = vmatmul.bf16.gmra.mxu2 %v6429_v1  ;;  %1535 = vmatmul.bf16.gmra.mxu0 %v5870_v10  ;;  %v665_v47 = vrot.slane %v663_v33, 4  ;;  %v8466_v33 = vshll.u32 %v6034_v27, 16 }
 0x17c   : > { %v6433_v4 = vadd.f32 %v1493_v30, %v1405_v7  ;;  %1624 = vmatmul.bf16.gmra.mxu1 %v6398_v44 }
 0x17d   : > { %v6451_v18 = vsel %vm6092_vm5, %v571_v21, %v665_v47  ;;  %v8467_v47 = vshrl.u32 %v6034_v27, 16 }
 0x17e   : > { %1446 = vmatmul.bf16.gmra.mxu3 %v5919_v48  ;;  %v1174_v62 = vpop.f32.mrf.mxu2 }
 0x17f   : > { %v1175_v58 = vadd.f32 %v1174_v62, %v6229_v45 }
 0x180   : > { %v1498_v24 = vpop.f32.mrf.mxu0 }
 0x181   : > { %v1407_v32 = vpop.f32.mrf.mxu3  ;;  %v6442_v55 = vpop.f32.mrf.mxu1 }
 0x182   : > { %v1408_v40 = vadd.f32 %v1407_v32, %v1175_v58  ;;  %8464 = vst [vmem:[#allocation38_spill] sm:$0xff] %v6442_v55 }
 0x184   : > { %v1497_v30 = vadd.f32 %v1496_v0, %v1408_v40  ;;  %v572_v40 = vrot.slane %v8466_v33, 1 }
 0x186   : > { %v6446_v11 = vadd.f32 %v1585_v57, %v1497_v30  ;;  %v1176_v31 = vpop.f32.mrf.mxu2 }
 0x187   : > { %v1177_v7 = vadd.f32 %v1176_v31, %v6241_v16  ;;  %v605_v16 = vpack.c.b16 %v6017_v51, %v6017_v51  ;;  %v573_v31 = vor.u32 %v572_v40, %v8467_v47 }
 0x188   : > { %v1501_v62 = vpop.f32.mrf.mxu0 }
 0x189   : > { %v1409_v45 = vpop.f32.mrf.mxu3  ;;  %v1590_v58 = vpop.f32.mrf.mxu1  ;;  %v667_v30 = vshll.u32 %v605_v16, 16 }
 0x18a   : > { %v1410_v54 = vadd.f32 %v1409_v45, %v1177_v7 }
 0x18b   : > { %1218 = vmatmul.bf16.gmra.mxu2 %v6451_v18  ;;  %1540 = vmatmul.bf16.gmra.mxu0 %v5925_v50  ;;  %v669_v7 = vrot.slane %v667_v30, 4 }
 0x18c   : > { %v6455_v0 = vadd.f32 %v1498_v24, %v1410_v54  ;;  %1629 = vmatmul.bf16.gmra.mxu1 %v6429_v1 }
 0x18d   : > { %v6473_v55 = vsel %vm6092_vm5, %v573_v31, %v669_v7 }
 0x18e   : > { %1451 = vmatmul.bf16.gmra.mxu3 %v5975_v20  ;;  %v1179_v57 = vpop.f32.mrf.mxu2 }
 0x18f   : > { %v1180_v32 = vadd.f32 %v1179_v57, %v6251_v63 }
 0x190   : > { %v1503_v3 = vpop.f32.mrf.mxu0 }
 0x191   : > { %v1412_v17 = vpop.f32.mrf.mxu3  ;;  %v6464_v21 = vpop.f32.mrf.mxu1 }
 0x192   : > { %v1413_v29 = vadd.f32 %v1412_v17, %v1180_v32 }
 0x194   : > { %v1502_v24 = vadd.f32 %v1501_v62, %v1413_v29 }
 0x196   : > { %v6468_v45 = vadd.f32 %v1590_v58, %v1502_v24  ;;  %v1181_v51 = vpop.f32.mrf.mxu2 }
 0x197   : > { %v1182_v54 = vadd.f32 %v1181_v51, %v6272_v53 }
 0x198   : > { %v1506_v57 = vpop.f32.mrf.mxu0 }
 0x199   : > { %v1414_v63 = vpop.f32.mrf.mxu3  ;;  %v1595_v32 = vpop.f32.mrf.mxu1 }
 0x19a   : > { %v1415_v16 = vadd.f32 %v1414_v63, %v1182_v54  ;;  %v8469_v63 = vld [vmem:[#allocation3_spill] sm:$0xff] }
 0x19b   : > { %1223 = vmatmul.bf16.gmra.mxu2 %v6473_v55  ;;  %1545 = vmatmul.bf16.gmra.mxu0 %v5967_v2 }
 0x19c   : > { %v6477_v62 = vadd.f32 %v1503_v3, %v1415_v16  ;;  %1634 = vmatmul.bf16.gmra.mxu1 %v6451_v18 }
 0x19e   : > { %1456 = vmatmul.bf16.gmra.mxu3 %v6028_v61  ;;  %v1184_v58 = vpop.f32.mrf.mxu2 }
 0x19f   : > { %v1185_v53 = vadd.f32 %v1184_v58, %v6282_v49  ;;  %v8470_v58 = vld [vmem:[#allocation16_spill] sm:$0xff] }
 0x1a0   : > { %v1508_v33 = vpop.f32.mrf.mxu0 }
 0x1a1   : > { %v1417_v17 = vpop.f32.mrf.mxu3  ;;  %v6482_v30 = vpop.f32.mrf.mxu1 }
 0x1a2   : > { %v1418_v40 = vadd.f32 %v1417_v17, %v1185_v53  ;;  %8468 = vst [vmem:[#allocation39_spill] sm:$0xff] %v6482_v30 }
 0x1a4   : > { %v1507_v29 = vadd.f32 %v1506_v57, %v1418_v40 }
 0x1a6   : > { %v6484_v24 = vadd.f32 %v1595_v32, %v1507_v29  ;;  %v1186_v47 = vpop.f32.mrf.mxu2 }
 0x1a7   : > { %v1187_v31 = vadd.f32 %v1186_v47, %v6294_v8 }
 0x1a8   : > { %v1511_v7 = vpop.f32.mrf.mxu0 }
 0x1a9   : > { %v1419_v3 = vpop.f32.mrf.mxu3  ;;  %v1600_v54 = vpop.f32.mrf.mxu1 }
 0x1aa   : > { %v1420_v51 = vadd.f32 %v1419_v3, %v1187_v31  ;;  %v8472_v31 = vld [vmem:[#allocation17_spill] sm:$0xff] }
 0x1ab   : > { %1841 = vmatmul.bf16.vlgmr.msra.gmra.mxu2 %v5780_v36  ;;  %2019 = vmatmul.bf16.vlgmr.msra.gmra.mxu0 %v6102_v26 }
 0x1ac   : > { %v6489_v49 = vadd.f32 %v1508_v33, %v1420_v51  ;;  %v8473_v51 = vld [vmem:[#allocation5_spill] sm:$0xff] }
 0x1ae   : > { %1930 = vmatmul.bf16.vlgmr.msra.gmra.mxu3 %v8469_v63  ;;  %v1189_v16 = vpop.f32.mrf.mxu2  ;;  %v8474_v63 = vld [vmem:[#allocation20_spill] sm:$0xff] }
 0x1af   : > { %v1190_v57 = vadd.f32 %v1189_v16, %v8470_v58  ;;  %v8475_v16 = vld [vmem:[#allocation4_spill] sm:$0xff] }
 0x1b0   : > { %v1513_v53 = vpop.f32.mrf.mxu0 }
 0x1b1   : > { %v1422_v32 = vpop.f32.mrf.mxu3  ;;  %v6493_v8 = vpop.f32.mrf.mxu1 }
 0x1b2   : > { %v1423_v17 = vadd.f32 %v1422_v32, %v1190_v57  ;;  %8471 = vst [vmem:[#allocation3_spill] sm:$0xff] %v6493_v8  ;;  %v8476_v57 = vld [vmem:[#allocation18_spill] sm:$0xff] }
 0x1b4   : > { %v1512_v40 = vadd.f32 %v1511_v7, %v1423_v17 }
 0x1b6   : > { %v6495_v29 = vadd.f32 %v1600_v54, %v1512_v40  ;;  %v1191_v47 = vpop.f32.mrf.mxu2 }
 0x1b7   : > { %v1192_v36 = vadd.f32 %v1191_v47, %v8472_v31 }
 0x1b8   : > { %v1516_v26 = vpop.f32.mrf.mxu0 }
 0x1b9   : > { %v1424_v3 = vpop.f32.mrf.mxu3  ;;  %v1605_v7 = vpop.f32.mrf.mxu1 }
 0x1ba   : > { %v1425_v33 = vadd.f32 %v1424_v3, %v1192_v36  ;;  %v8477_v36 = vld [vmem:[#allocation19_spill] sm:$0xff] }
 0x1bb   : > { %1846 = vmatmul.bf16.gmra.mxu2 %v8473_v51  ;;  %2024 = vmatmul.bf16.gmra.mxu0 %v8474_v63 }
 0x1bc   : > { %v6500_v38 = vadd.f32 %v1513_v53, %v1425_v33 }
 0x1be   : > { %1935 = vmatmul.bf16.gmra.mxu3 %v8475_v16  ;;  %v1194_v58 = vpop.f32.mrf.mxu2  ;;  %v8480_v16 = vld [vmem:[#allocation6_spill] sm:$0xff] }
 0x1bf   : > { %v1195_v32 = vadd.f32 %v1194_v58, %v8476_v57 }
 0x1c0   : > { %v1518_v17 = vpop.f32.mrf.mxu0 }
 0x1c1   : > { %v1427_v54 = vpop.f32.mrf.mxu3  ;;  %v6507_v63 = vpop.f32.mrf.mxu1 }
 0x1c2   : > { %v1428_v40 = vadd.f32 %v1427_v54, %v1195_v32  ;;  %8478 = vst [vmem:[#allocation16_spill] sm:$0xff] %v6507_v63 }
 0x1c4   : > { %v1517_v8 = vadd.f32 %v1516_v26, %v1428_v40  ;;  %v8481_v26 = vld [vmem:[#allocation21_spill] sm:$0xff] }
 0x1c6   : > { %v6504_v47 = vadd.f32 %v1605_v7, %v1517_v8  ;;  %v1196_v31 = vpop.f32.mrf.mxu2 }
 0x1c7   : > { %v1197_v3 = vadd.f32 %v1196_v31, %v8477_v36 }
 0x1c8   : > { %v1521_v30 = vpop.f32.mrf.mxu0 }
 0x1c9   : > { %v1429_v51 = vpop.f32.mrf.mxu3  ;;  %v1610_v54 = vpop.f32.mrf.mxu1 }
 0x1ca   : > { %v1430_v53 = vadd.f32 %v1429_v51, %v1197_v3  ;;  %v8482_v3 = vld [vmem:[#allocation22_spill] sm:$0xff] }
 0x1cb   : > { %1851 = vmatmul.bf16.gmra.mxu2 %v5874_v19  ;;  %2029 = vmatmul.bf16.gmra.mxu0 %v6174_v5 }
 0x1cc   : > { %v6511_v33 = vadd.f32 %v1518_v17, %v1430_v53  ;;  %v8483_v17 = vld [vmem:[#allocation8_spill] sm:$0xff]  ;;  %v8484_v53 = vld [vmem:[#allocation25_spill] sm:$0xff] }
 0x1ce   : > { %8479 = vst [vmem:[#allocation17_spill] sm:$0xff] %v6511_v33  ;;  %1940 = vmatmul.bf16.gmra.mxu3 %v8480_v16  ;;  %v1199_v58 = vpop.f32.mrf.mxu2 }
 0x1cf   : > { %v1200_v8 = vadd.f32 %v1199_v58, %v8481_v26  ;;  %v8485_v58 = vld [vmem:[#allocation7_spill] sm:$0xff] }
 0x1d0   : > { %v1523_v57 = vpop.f32.mrf.mxu0 }
 0x1d1   : > { %v1432_v7 = vpop.f32.mrf.mxu3 }
 0x1d2   : > { %v1433_v32 = vadd.f32 %v1432_v7, %v1200_v8  ;;  %v8486_v8 = vld [vmem:[#allocation23_spill] sm:$0xff] }
 0x1d4   : > { %v1522_v40 = vadd.f32 %v1521_v30, %v1433_v32 }
 0x1d6   : > { %v6515_v31 = vadd.f32 %v1610_v54, %v1522_v40  ;;  %v1201_v36 = vpop.f32.mrf.mxu2 }
 0x1d7   : > { %v1202_v51 = vadd.f32 %v1201_v36, %v8482_v3  ;;  %v8488_v3 = vld [vmem:[#allocation24_spill] sm:$0xff] }
 0x1d8   : > { %v1526_v63 = vpop.f32.mrf.mxu0 }
 0x1d9   : > { %v1434_v19 = vpop.f32.mrf.mxu3 }
 0x1da   : > { %v1435_v5 = vadd.f32 %v1434_v19, %v1202_v51 }
 0x1db   : > { %1856 = vmatmul.bf16.gmra.mxu2 %v8483_v17  ;;  %2034 = vmatmul.bf16.gmra.mxu0 %v8484_v53 }
 0x1dc   : > { %v6520_v16 = vadd.f32 %v1523_v57, %v1435_v5  ;;  %v8490_v5 = vld [vmem:[#allocation9_spill] sm:$0xff] }
 0x1de   : > { %1945 = vmatmul.bf16.gmra.mxu3 %v8485_v58  ;;  %v1204_v26 = vpop.f32.mrf.mxu2  ;;  %v8491_v58 = vld [vmem:[#allocation26_spill] sm:$0xff] }
 0x1df   : > { %v1205_v7 = vadd.f32 %v1204_v26, %v8486_v8 }
 0x1e0   : > { %v1528_v32 = vpop.f32.mrf.mxu0 }
 0x1e1   : > { %v1437_v30 = vpop.f32.mrf.mxu3 }
 0x1e2   : > { %v1438_v54 = vadd.f32 %v1437_v30, %v1205_v7 }
 0x1e4   : > { %v6524_v40 = vadd.f32 %v1526_v63, %v1438_v54 }
 0x1e6   : > { %8487 = vst [vmem:[#allocation5_spill] sm:$0xff] %v6524_v40  ;;  %v1206_v36 = vpop.f32.mrf.mxu2  ;;  %v8494_v40 = vld [vmem:[#allocation11_spill] sm:$0xff] }
 0x1e7   : > { %v1207_v33 = vadd.f32 %v1206_v36, %v8488_v3  ;;  %v8493_v36 = vld [vmem:[#allocation27_spill] sm:$0xff] }
 0x1e8   : > { %v1531_v19 = vpop.f32.mrf.mxu0 }
 0x1e9   : > { %v1439_v51 = vpop.f32.mrf.mxu3 }
 0x1ea   : > { %v1440_v17 = vadd.f32 %v1439_v51, %v1207_v33 }
 0x1eb   : > { %1861 = vmatmul.bf16.gmra.mxu2 %v5971_v28  ;;  %2039 = vmatmul.bf16.gmra.mxu0 %v6227_v12  ;;  %v8495_v12 = vld [vmem:[#allocation30_spill] sm:$0xff] }
 0x1ec   : > { %v6529_v57 = vadd.f32 %v1528_v32, %v1440_v17  ;;  %v8496_v17 = vld [vmem:[#allocation10_spill] sm:$0xff] }
 0x1ee   : > { %8489 = vst [vmem:[#allocation20_spill] sm:$0xff] %v6529_v57  ;;  %1950 = vmatmul.bf16.gmra.mxu3 %v8490_v5  ;;  %v1209_v53 = vpop.f32.mrf.mxu2  ;;  %v8500_v57 = vld [vmem:[#allocation13_spill] sm:$0xff] }
 0x1ef   : > { %v1210_v26 = vadd.f32 %v1209_v53, %v8491_v58  ;;  %v8497_v53 = vld [vmem:[#allocation28_spill] sm:$0xff] }
 0x1f0   : > { %v1533_v63 = vpop.f32.mrf.mxu0 }
 0x1f1   : > { %v1442_v8 = vpop.f32.mrf.mxu3 }
 0x1f2   : > { %v1443_v7 = vadd.f32 %v1442_v8, %v1210_v26 }
 0x1f4   : > { %v6533_v30 = vadd.f32 %v1531_v19, %v1443_v7 }
 0x1f6   : > { %8492 = vst [vmem:[#allocation4_spill] sm:$0xff] %v6533_v30  ;;  %v1211_v54 = vpop.f32.mrf.mxu2 }
 0x1f7   : > { %v1212_v3 = vadd.f32 %v1211_v54, %v8493_v36  ;;  %v8499_v36 = vld [vmem:[#allocation29_spill] sm:$0xff] }
 0x1f8   : > { %v1536_v51 = vpop.f32.mrf.mxu0 }
 0x1f9   : > { %v1444_v33 = vpop.f32.mrf.mxu3 }
 0x1fa   : > { %v1445_v28 = vadd.f32 %v1444_v33, %v1212_v3 }
 0x1fb   : > { %1866 = vmatmul.bf16.gmra.mxu2 %v8494_v40  ;;  %2044 = vmatmul.bf16.gmra.mxu0 %v8495_v12  ;;  %v8502_v12 = vld [vmem:[#allocation12_spill] sm:$0xff] }
 0x1fc   : > { %v6538_v32 = vadd.f32 %v1533_v63, %v1445_v28  ;;  %v8501_v63 = vld [vmem:[#allocation33_spill] sm:$0xff] }
 0x1fe   : > { %1955 = vmatmul.bf16.gmra.mxu3 %v8496_v17  ;;  %v1214_v5 = vpop.f32.mrf.mxu2 }
 0x1ff   : > { %v1215_v58 = vadd.f32 %v1214_v5, %v8497_v53  ;;  %v8503_v5 = vld [vmem:[#allocation31_spill] sm:$0xff] }
 0x200   : > { %v1538_v19 = vpop.f32.mrf.mxu0 }
 0x201   : > { %v1447_v26 = vpop.f32.mrf.mxu3 }
 0x202   : > { %v1448_v8 = vadd.f32 %v1447_v26, %v1215_v58 }
 0x204   : > { %v6542_v7 = vadd.f32 %v1536_v51, %v1448_v8 }
 0x206   : > { %8498 = vst [vmem:[#allocation18_spill] sm:$0xff] %v6542_v7  ;;  %v1216_v54 = vpop.f32.mrf.mxu2 }
 0x207   : > { %v1217_v30 = vadd.f32 %v1216_v54, %v8499_v36  ;;  %v8504_v36 = vld [vmem:[#allocation32_spill] sm:$0xff] }
 0x208   : > { %v1541_v33 = vpop.f32.mrf.mxu0 }
 0x209   : > { %v1449_v3 = vpop.f32.mrf.mxu3 }
 0x20a   : > { %v1450_v40 = vadd.f32 %v1449_v3, %v1217_v30 }
 0x20b   : > { %1871 = vmatmul.bf16.gmra.mxu2 %v8500_v57  ;;  %2049 = vmatmul.bf16.gmra.mxu0 %v8501_v63  ;;  %v8505_v63 = vld [vmem:[#allocation34_spill] sm:$0xff] }
 0x20c   : > { %v6547_v28 = vadd.f32 %v1538_v19, %v1450_v40 }
 0x20e   : > { %1960 = vmatmul.bf16.gmra.mxu3 %v8502_v12  ;;  %v1219_v17 = vpop.f32.mrf.mxu2 }
 0x20f   : > { %v1220_v53 = vadd.f32 %v1219_v17, %v8503_v5 }
 0x210   : > { %v1543_v51 = vpop.f32.mrf.mxu0 }
 0x211   : > { %v1452_v58 = vpop.f32.mrf.mxu3 }
 0x212   : > { %v1453_v26 = vadd.f32 %v1452_v58, %v1220_v53 }
 0x214   : > { %v6551_v8 = vadd.f32 %v1541_v33, %v1453_v26  ;;  %v8507_v26 = vld [vmem:[#allocation35_spill] sm:$0xff] }
 0x216   : > { %v1221_v54 = vpop.f32.mrf.mxu2 }
 0x217   : > { %v1222_v7 = vadd.f32 %v1221_v54, %v8504_v36 }
 0x218   : > { %v1546_v3 = vpop.f32.mrf.mxu0 }
 0x219   : > { %v1454_v30 = vpop.f32.mrf.mxu3 }
 0x21a   : > { %v1455_v57 = vadd.f32 %v1454_v30, %v1222_v7 }
 0x21b   : > { %1876 = vmatmul.bf16.gmra.mxu2 %v5717_v59  ;;  %2054 = vmatmul.bf16.gmra.mxu0 %v6302_v9 }
 0x21c   : > { %v6556_v19 = vadd.f32 %v1543_v51, %v1455_v57 }
 0x21e   : > { %1965 = vmatmul.bf16.gmra.mxu3 %v5648_v22  ;;  %v1224_v40 = vpop.f32.mrf.mxu2 }
 0x21f   : > { %v1225_v12 = vadd.f32 %v1224_v40, %v8505_v63  ;;  %v8509_v40 = vld [vmem:[#allocation36_spill] sm:$0xff] }
 0x220   : > { %v1548_v33 = vpop.f32.mrf.mxu0 }
 0x221   : > { %v1457_v17 = vpop.f32.mrf.mxu3 }
 0x222   : > { %v1458_v5 = vadd.f32 %v1457_v17, %v1225_v12 }
 0x224   : > { %v6560_v53 = vadd.f32 %v1546_v3, %v1458_v5 }
 0x226   : > { %8506 = vst [vmem:[#allocation19_spill] sm:$0xff] %v6560_v53  ;;  %v1226_v58 = vpop.f32.mrf.mxu2 }
 0x227   : > { %v1227_v54 = vadd.f32 %v1226_v58, %v8507_v26 }
 0x228   : > { %v2020_v36 = vpop.f32.mrf.mxu0 }
 0x229   : > { %v1459_v7 = vpop.f32.mrf.mxu3 }
 0x22a   : > { %v1460_v59 = vadd.f32 %v1459_v7, %v1227_v54 }
 0x22b   : > { %1881 = vmatmul.bf16.gmra.mxu2 %v5784_v37  ;;  %2059 = vmatmul.bf16.gmra.mxu0 %v6329_v14 }
 0x22c   : > { %v6565_v9 = vadd.f32 %v1548_v33, %v1460_v59 }
 0x22e   : > { %8508 = vst [vmem:[#allocation6_spill] sm:$0xff] %v6565_v9  ;;  %1970 = vmatmul.bf16.gmra.mxu3 %v5721_v60  ;;  %v1842_v22 = vpop.f32.mrf.mxu2 }
 0x230   : > { %v2022_v57 = vpop.f32.mrf.mxu0 }
 0x231   : > { %v1931_v51 = vpop.f32.mrf.mxu3 }
 0x232   : > { %v1932_v30 = vadd.f32 %v1931_v51, %v1842_v22 }
 0x234   : > { %v2021_v3 = vadd.f32 %v2020_v36, %v1932_v30 }
 0x236   : > { %v6569_v63 = vadd.f32 %v2021_v3, %v8509_v40  ;;  %v1844_v12 = vpop.f32.mrf.mxu2 }
 0x238   : > { %v2025_v58 = vpop.f32.mrf.mxu0 }
 0x239   : > { %v1933_v17 = vpop.f32.mrf.mxu3 }
 0x23a   : > { %v1934_v5 = vadd.f32 %v1933_v17, %v1844_v12 }
 0x23b   : > { %1886 = vmatmul.bf16.gmra.mxu2 %v5825_v13  ;;  %2064 = vmatmul.bf16.gmra.mxu0 %v6349_v34 }
 0x23c   : > { %v2023_v26 = vadd.f32 %v2022_v57, %v1934_v5 }
 0x23e   : > { %v6574_v37 = vadd.f32 %v2023_v26, %v6337_v6  ;;  %1975 = vmatmul.bf16.gmra.mxu3 %v5776_v35  ;;  %v1847_v60 = vpop.f32.mrf.mxu2 }
 0x240   : > { %8510 = vst [vmem:[#allocation21_spill] sm:$0xff] %v6574_v37  ;;  %v2027_v54 = vpop.f32.mrf.mxu0 }
 0x241   : > { %v1936_v14 = vpop.f32.mrf.mxu3 }
 0x242   : > { %v1937_v33 = vadd.f32 %v1936_v14, %v1847_v60 }
 0x244   : > { %v2026_v7 = vadd.f32 %v2025_v58, %v1937_v33 }
 0x246   : > { %v6578_v36 = vadd.f32 %v2026_v7, %v6344_v46  ;;  %v1849_v59 = vpop.f32.mrf.mxu2  ;;  %v5462_v46 = vld [vmem:[%s8296_s2 + $0xf8] sm:$0xff] }
 0x247   : > { %3103 = vmatpush.bf16.msra.mxu1 %v5462_v46 }
 0x248   : > { %v2030_v30 = vpop.f32.mrf.mxu0 }
 0x249   : > { %v1938_v22 = vpop.f32.mrf.mxu3 }
 0x24a   : > { %v1939_v51 = vadd.f32 %v1938_v22, %v1849_v59 }
 0x24b   : > { %1891 = vmatmul.bf16.gmra.mxu2 %v5878_v23  ;;  %2069 = vmatmul.bf16.gmra.mxu0 %v6378_v56 }
 0x24c   : > { %v2028_v13 = vadd.f32 %v2027_v54, %v1939_v51 }
 0x24e   : > { %v6583_v6 = vadd.f32 %v2028_v13, %v6363_v42  ;;  %1980 = vmatmul.bf16.gmra.mxu3 %v5831_v15  ;;  %v1852_v35 = vpop.f32.mrf.mxu2 }
 0x250   : > { %v2032_v3 = vpop.f32.mrf.mxu0 }
 0x251   : > { %v1941_v34 = vpop.f32.mrf.mxu3 }
 0x252   : > { %v1942_v57 = vadd.f32 %v1941_v34, %v1852_v35 }
 0x254   : > { %v2031_v40 = vadd.f32 %v2030_v30, %v1942_v57 }
 0x256   : > { %v6590_v12 = vadd.f32 %v2031_v40, %v6373_v39  ;;  %v1854_v23 = vpop.f32.mrf.mxu2 }
 0x258   : > { %8511 = vst [vmem:[#allocation22_spill] sm:$0xff] %v6590_v12  ;;  %v2035_v42 = vpop.f32.mrf.mxu0 }
 0x259   : > { %v1943_v56 = vpop.f32.mrf.mxu3 }
 0x25a   : > { %v1944_v17 = vadd.f32 %v1943_v56, %v1854_v23 }
 0x25b   : > { %1896 = vmatmul.bf16.gmra.mxu2 %v5919_v48  ;;  %2074 = vmatmul.bf16.gmra.mxu0 %v6398_v44 }
 0x25c   : > { %v2033_v5 = vadd.f32 %v2032_v3, %v1944_v17  ;;  %v8512_v17 = vld [vmem:[#allocation14_spill] sm:$0xff] }
 0x25e   : > { %v6595_v15 = vadd.f32 %v2033_v5, %v6386_v52  ;;  %1985 = vmatmul.bf16.gmra.mxu3 %v5870_v10  ;;  %v1857_v58 = vpop.f32.mrf.mxu2 }
 0x260   : > { %v2037_v14 = vpop.f32.mrf.mxu0  ;;  %v2175_v53 = vmul.f32 %v6595_v15, %v6595_v15 }
 0x261   : > { %v1946_v26 = vpop.f32.mrf.mxu3 }
 0x262   : > { %v1947_v60 = vadd.f32 %v1946_v26, %v1857_v58 }
 0x264   : > { %v2036_v39 = vadd.f32 %v2035_v42, %v1947_v60 }
 0x266   : > { %v6599_v33 = vadd.f32 %v2036_v39, %v6393_v41  ;;  %v1859_v54 = vpop.f32.mrf.mxu2  ;;  %v5461_v41 = vld [vmem:[%s8296_s2 + $0xf0] sm:$0xff] }
 0x267   : > { %3104 = vmatpush.bf16.msra.mxu1 %v5461_v41 }
 0x268   : > { %v2040_v22 = vpop.f32.mrf.mxu0 }
 0x269   : > { %v1948_v7 = vpop.f32.mrf.mxu3 }
 0x26a   : > { %v1949_v59 = vadd.f32 %v1948_v7, %v1859_v54 }
 0x26b   : > { %1901 = vmatmul.bf16.gmra.mxu2 %v5975_v20  ;;  %2079 = vmatmul.bf16.gmra.mxu0 %v6429_v1 }
 0x26c   : > { %v2038_v48 = vadd.f32 %v2037_v14, %v1949_v59 }
 0x26e   : > { %v6604_v52 = vadd.f32 %v2038_v48, %v6412_v43  ;;  %1990 = vmatmul.bf16.gmra.mxu3 %v5925_v50  ;;  %v1862_v10 = vpop.f32.mrf.mxu2 }
 0x270   : > { %v6607_v30 = vpop.f32.mrf.mxu0 }
 0x271   : > { %v1951_v44 = vpop.f32.mrf.mxu3 }
 0x272   : > { %v1952_v51 = vadd.f32 %v1951_v44, %v1862_v10 }
 0x274   : > { %v2041_v13 = vadd.f32 %v2040_v22, %v1952_v51 }
 0x276   : > { %v6613_v20 = vadd.f32 %v2041_v13, %v6424_v25  ;;  %v6615_v1 = vpop.f32.mrf.mxu2 }
 0x278   : > { %v2045_v35 = vpop.f32.mrf.mxu0 }
 0x279   : > { %v6617_v43 = vpop.f32.mrf.mxu3 }
 0x27b   : > { %1906 = vmatmul.bf16.gmra.mxu2 %v6028_v61  ;;  %2084 = vmatmul.bf16.gmra.mxu0 %v6451_v18 }
 0x27e   : > { %1995 = vmatmul.bf16.gmra.mxu3 %v5967_v2  ;;  %v1867_v50 = vpop.f32.mrf.mxu2 }
 0x280   : > { %v6622_v3 = vpop.f32.mrf.mxu0 }
 0x281   : > { %v1956_v34 = vpop.f32.mrf.mxu3 }
 0x282   : > { %v1957_v57 = vadd.f32 %v1956_v34, %v1867_v50 }
 0x284   : > { %v2046_v46 = vadd.f32 %v2045_v35, %v1957_v57 }
 0x286   : > { %v6625_v25 = vadd.f32 %v2046_v46, %v6446_v11  ;;  %v6627_v40 = vpop.f32.mrf.mxu2  ;;  %v5460_v11 = vld [vmem:[%s8296_s2 + $0xe8] sm:$0xff] }
 0x287   : > { %3105 = vmatpush.bf16.msra.mxu1 %v5460_v11 }
 0x288   : > { %v2050_v56 = vpop.f32.mrf.mxu0 }
 0x289   : > { %v6629_v23 = vpop.f32.mrf.mxu3 }
 0x28b   : > { %1911 = vmatmul.bf16.gmra.mxu2 %v8512_v17  ;;  %2089 = vmatmul.bf16.gmra.mxu0 %v6473_v55 }
 0x28e   : > { %2000 = vmatmul.bf16.gmra.mxu3 %v6034_v27  ;;  %v1872_v42 = vpop.f32.mrf.mxu2 }
 0x290   : > { %v6634_v26 = vpop.f32.mrf.mxu0 }
 0x291   : > { %v1961_v5 = vpop.f32.mrf.mxu3 }
 0x292   : > { %v1962_v58 = vadd.f32 %v1961_v5, %v1872_v42 }
 0x294   : > { %v2051_v60 = vadd.f32 %v2050_v56, %v1962_v58  ;;  %v6672_v58 = vpop.f32.mrf.mxu1 }
 0x296   : > { %v6640_v14 = vadd.f32 %v2051_v60, %v6468_v45  ;;  %v6642_v39 = vpop.f32.mrf.mxu2 }
 0x298   : > { %v2055_v55 = vpop.f32.mrf.mxu0 }
 0x299   : > { %v6644_v54 = vpop.f32.mrf.mxu3 }
 0x29b   : > { %1916 = vmatmul.bf16.gmra.mxu2 %v6028_v61  ;;  %2094 = vmatmul.bf16.gmra.mxu0 %v6451_v18 }
 0x29e   : > { %2005 = vmatmul.bf16.gmra.mxu3 %v5967_v2  ;;  %v1877_v27 = vpop.f32.mrf.mxu2  ;;  %v5459_v2 = vld [vmem:[%s8296_s2 + $0xe0] sm:$0xff] }
 0x29f   : > { %3106 = vmatpush.bf16.msra.mxu1 %v5459_v2 }
 0x2a0   : > { %v6649_v22 = vpop.f32.mrf.mxu0 }
 0x2a1   : > { %v1966_v7 = vpop.f32.mrf.mxu3 }
 0x2a2   : > { %v1967_v59 = vadd.f32 %v1966_v7, %v1877_v27  ;;  %v6681_v27 = vpop.f32.mrf.mxu1 }
 0x2a4   : > { %v2056_v48 = vadd.f32 %v2055_v55, %v1967_v59 }
 0x2a6   : > { %v6652_v45 = vadd.f32 %v2056_v48, %v6484_v24  ;;  %v6654_v10 = vpop.f32.mrf.mxu2 }
 0x2a8   : > { %v2060_v51 = vpop.f32.mrf.mxu0 }
 0x2a9   : > { %v6656_v44 = vpop.f32.mrf.mxu3 }
 0x2ae   : > { %v1882_v41 = vpop.f32.mrf.mxu2 }
 0x2b0   : > { %v6658_v18 = vpop.f32.mrf.mxu0 }
 0x2b1   : > { %v1971_v61 = vpop.f32.mrf.mxu3 }
 0x2b2   : > { %v1972_v13 = vadd.f32 %v1971_v61, %v1882_v41  ;;  %v5458_v41 = vld [vmem:[%s8296_s2 + $0xd8] sm:$0xff] }
 0x2b3   : > { %3107 = vmatpush.bf16.msra.mxu1 %v5458_v41  ;;  %v2174_v41 = vmul.f32 %v6590_v12, %v6590_v12 }
 0x2b4   : > { %v2061_v35 = vadd.f32 %v2060_v51, %v1972_v13  ;;  %v2171_v13 = vmul.f32 %v6574_v37, %v6574_v37 }
 0x2b6   : > { %v6664_v50 = vadd.f32 %v2061_v35, %v6495_v29  ;;  %v6666_v24 = vpop.f32.mrf.mxu2  ;;  %v6695_v35 = vpop.f32.mrf.mxu1 }
 0x2b8   : > { %v2065_v57 = vpop.f32.mrf.mxu0 }
 0x2b9   : > { %v6668_v34 = vpop.f32.mrf.mxu3 }
 0x2be   : > { %v1887_v46 = vpop.f32.mrf.mxu2 }
 0x2c0   : > { %v6670_v42 = vpop.f32.mrf.mxu0 }
 0x2c1   : > { %v1976_v56 = vpop.f32.mrf.mxu3 }
 0x2c2   : > { %v1977_v17 = vadd.f32 %v1976_v56, %v1887_v46  ;;  %v2172_v46 = vmul.f32 %v6578_v36, %v6578_v36 }
 0x2c4   : > { %v2066_v5 = vadd.f32 %v2065_v57, %v1977_v17  ;;  %v2170_v57 = vmul.f32 %v6569_v63, %v6569_v63 }
 0x2c6   : > { %v6675_v11 = vadd.f32 %v2066_v5, %v6504_v47  ;;  %v6677_v60 = vpop.f32.mrf.mxu2  ;;  %v2202_v5 = vadd.f32 %v2171_v13, %v2170_v57  ;;  %v1959_v57 = vadd.f32 %v6629_v23, %v6627_v40  ;;  %v2177_v23 = vmul.f32 %v6604_v52, %v6604_v52 }
 0x2c8   : > { %v2070_v55 = vpop.f32.mrf.mxu0 }
 0x2c9   : > { %v6679_v29 = vpop.f32.mrf.mxu3 }
 0x2ce   : > { %v1892_v7 = vpop.f32.mrf.mxu2 }
 0x2d0   : > { %v6683_v51 = vpop.f32.mrf.mxu0 }
 0x2d1   : > { %v1981_v59 = vpop.f32.mrf.mxu3 }
 0x2d2   : > { %v1982_v48 = vadd.f32 %v1981_v59, %v1892_v7  ;;  %v1954_v7 = vadd.f32 %v6617_v43, %v6615_v1 }
 0x2d4   : > { %v2071_v61 = vadd.f32 %v2070_v55, %v1982_v48  ;;  %v2173_v55 = vmul.f32 %v6583_v6, %v6583_v6  ;;  %v2203_v48 = vadd.f32 %v2202_v5, %v2172_v46  ;;  %v2043_v13 = vadd.f32 %v6607_v30, %v1954_v7 }
 0x2d6   : > { %v6689_v47 = vadd.f32 %v2071_v61, %v6515_v31  ;;  %v6693_v2 = vpop.f32.mrf.mxu2  ;;  %v2132_v31 = vadd.f32 %v6574_v37, %v6569_v63  ;;  %v2204_v9 = vadd.f32 %v2203_v48, %v2173_v55  ;;  %v2176_v55 = vmul.f32 %v6599_v33, %v6599_v33  ;;  %v6731_v48 = vpop.f32.mrf.mxu1 }
 0x2d8   : > { %v6703_v17 = vpop.f32.mrf.mxu0  ;;  %v2133_v59 = vadd.f32 %v2132_v31, %v6578_v36  ;;  %v2205_v43 = vadd.f32 %v2204_v9, %v2174_v41  ;;  %v8513_v31 = vld [vmem:[#allocation37_spill] sm:$0xff]  ;;  %v2048_v9 = vadd.f32 %v6622_v3, %v1959_v57 }
 0x2d9   : > { %v6701_v56 = vpop.f32.mrf.mxu3  ;;  %v1583_v5 = vadd.f32 %v8513_v31, %v6433_v4  ;;  %v1964_v4 = vadd.f32 %v6644_v54, %v6642_v39 }
 0x2da   : > { %v2134_v61 = vadd.f32 %v2133_v59, %v6583_v6  ;;  %v2206_v40 = vadd.f32 %v2205_v43, %v2175_v53 }
 0x2db   : > { %v6736_v7 = vadd.f32 %v2043_v13, %v1583_v5  ;;  %v2053_v3 = vadd.f32 %v6634_v26, %v1964_v4 }
 0x2dc   : > { %v2135_v1 = vadd.f32 %v2134_v61, %v6590_v12  ;;  %v8514_v61 = vld [vmem:[#allocation38_spill] sm:$0xff]  ;;  %v2207_v12 = vadd.f32 %v2206_v40, %v2176_v55  ;;  %v1593_v55 = vadd.f32 %v6464_v21, %v6477_v62  ;;  %v1974_v62 = vadd.f32 %v6668_v34, %v6666_v24 }
 0x2dd   : > { %v1588_v31 = vadd.f32 %v8514_v61, %v6455_v0  ;;  %v2179_v13 = vmul.f32 %v6736_v7, %v6736_v7  ;;  %v1969_v0 = vadd.f32 %v6656_v44, %v6654_v10  ;;  %v2182_v61 = vmul.f32 %v6640_v14, %v6640_v14 }
 0x2de   : > { %v6720_v37 = vpop.f32.mrf.mxu2  ;;  %v2136_v30 = vadd.f32 %v2135_v1, %v6595_v15  ;;  %v2178_v1 = vmul.f32 %v6613_v20, %v6613_v20  ;;  %v2208_v43 = vadd.f32 %v2207_v12, %v2177_v23  ;;  %v2180_v12 = vmul.f32 %v6625_v25, %v6625_v25 }
 0x2df   : > { %v6749_v5 = vadd.f32 %v2048_v9, %v1588_v31  ;;  %v6764_v4 = vadd.f32 %v2053_v3, %v1593_v55  ;;  %v2058_v21 = vadd.f32 %v6649_v22, %v1969_v0  ;;  %v8515_v31 = vld [vmem:[#allocation39_spill] sm:$0xff]  ;;  %v2063_v24 = vadd.f32 %v6658_v18, %v1974_v62 }
 0x2e0   : > { %v6729_v59 = vpop.f32.mrf.mxu0  ;;  %v2137_v41 = vadd.f32 %v2136_v30, %v6599_v33  ;;  %v2209_v30 = vadd.f32 %v2208_v43, %v2178_v1  ;;  %v1598_v1 = vadd.f32 %v8515_v31, %v6489_v49  ;;  %v1979_v34 = vadd.f32 %v6679_v29, %v6677_v60  ;;  %v5457_v49 = vld [vmem:[%s8296_s2 + $0xd0] sm:$0xff] }
 0x2e1   : > { %v6723_v46 = vpop.f32.mrf.mxu3  ;;  %v2181_v26 = vmul.f32 %v6749_v5, %v6749_v5  ;;  %3108 = vmatpush.bf16.msra.mxu1 %v5457_v49  ;;  %v1984_v62 = vadd.f32 %v6701_v56, %v6693_v2 }
 0x2e2   : > { %v2138_v53 = vadd.f32 %v2137_v41, %v6604_v52  ;;  %v2210_v9 = vadd.f32 %v2209_v30, %v2179_v13  ;;  %v6766_v41 = vpop.f32.mrf.mxu1  ;;  %v2183_v13 = vmul.f32 %v6764_v4, %v6764_v4  ;;  %v6780_v22 = vadd.f32 %v2058_v21, %v1598_v1 }
 0x2e3   : > { %v2068_v21 = vadd.f32 %v6670_v42, %v1979_v34 }
 0x2e4   : > { %v2139_v54 = vadd.f32 %v2138_v53, %v6613_v20  ;;  %v2211_v44 = vadd.f32 %v2210_v9, %v2180_v12  ;;  %v8516_v12 = vld [vmem:[#allocation3_spill] sm:$0xff]  ;;  %v2185_v60 = vmul.f32 %v6780_v22, %v6780_v22 }
 0x2e6   : > { %v1899_v39 = vpop.f32.mrf.mxu2  ;;  %v2140_v23 = vadd.f32 %v2139_v54, %v6736_v7  ;;  %v2212_v43 = vadd.f32 %v2211_v44, %v2181_v26  ;;  %v2184_v26 = vmul.f32 %v6652_v45, %v6652_v45  ;;  %v8518_v44 = vld [vmem:[#allocation16_spill] sm:$0xff] }
 0x2e8   : > { %v6759_v40 = vpop.f32.mrf.mxu0  ;;  %v2141_v10 = vadd.f32 %v2140_v23, %v6625_v25  ;;  %v2213_v55 = vadd.f32 %v2212_v43, %v2182_v61  ;;  %v1603_v23 = vadd.f32 %v8516_v12, %v6500_v38  ;;  %v8517_v38 = vld [vmem:[#allocation17_spill] sm:$0xff]  ;;  %v2186_v43 = vmul.f32 %v6664_v50, %v6664_v50 }
 0x2e9   : > { %v1988_v57 = vpop.f32.mrf.mxu3  ;;  %v1608_v61 = vadd.f32 %v8518_v44, %v8517_v38 }
 0x2ea   : > { %v2142_v53 = vadd.f32 %v2141_v10, %v6749_v5  ;;  %v2214_v10 = vadd.f32 %v2213_v55, %v2183_v13  ;;  %v6796_v29 = vadd.f32 %v2063_v24, %v1603_v23  ;;  %v1625_v31 = vpop.f32.mrf.mxu1  ;;  %v1987_v13 = vadd.f32 %v6723_v46, %v6720_v37 }
 0x2eb   : > { %v6811_v56 = vadd.f32 %v2068_v21, %v1608_v61  ;;  %v2073_v55 = vadd.f32 %v6683_v51, %v1984_v62  ;;  %v1989_v49 = vadd.f32 %v1988_v57, %v1899_v39  ;;  %v2188_v37 = vmul.f32 %v6675_v11, %v6675_v11  ;;  %v8519_v39 = vld [vmem:[#allocation5_spill] sm:$0xff] }
 0x2ec   : > { %v2143_v54 = vadd.f32 %v2142_v53, %v6640_v14  ;;  %v2215_v1 = vadd.f32 %v2214_v10, %v2184_v26  ;;  %v2187_v2 = vmul.f32 %v6796_v29, %v6796_v29  ;;  %v1613_v46 = vadd.f32 %v6672_v58, %v6520_v16 }
 0x2ed   : > { %v2076_v26 = vadd.f32 %v6703_v17, %v1987_v13  ;;  %v2189_v51 = vmul.f32 %v6811_v56, %v6811_v56  ;;  %v1616_v57 = vadd.f32 %v6681_v27, %v8519_v39  ;;  %v2078_v62 = vadd.f32 %v6729_v59, %v1989_v49  ;;  %v8520_v17 = vld [vmem:[#allocation20_spill] sm:$0xff] }
 0x2ee   : > { %v1902_v3 = vpop.f32.mrf.mxu2  ;;  %v2144_v9 = vadd.f32 %v2143_v54, %v6764_v4  ;;  %v2216_v24 = vadd.f32 %v2215_v1, %v2185_v60  ;;  %v6825_v21 = vadd.f32 %v2073_v55, %v1613_v46  ;;  %v2190_v58 = vmul.f32 %v6689_v47, %v6689_v47  ;;  %v8521_v27 = vld [vmem:[#allocation4_spill] sm:$0xff] }
 0x2f0   : > { %v2082_v30 = vpop.f32.mrf.mxu0  ;;  %v2145_v18 = vadd.f32 %v2144_v9, %v6652_v45  ;;  %v2217_v23 = vadd.f32 %v2216_v24, %v2186_v43  ;;  %v2191_v24 = vmul.f32 %v6825_v21, %v6825_v21 }
 0x2f1   : > { %v1991_v0 = vpop.f32.mrf.mxu3 }
 0x2f2   : > { %v2146_v53 = vadd.f32 %v2145_v18, %v6780_v22  ;;  %v1992_v10 = vadd.f32 %v1991_v0, %v1902_v3  ;;  %v2218_v18 = vadd.f32 %v2217_v23, %v2187_v2  ;;  %v1618_v3 = vadd.f32 %v6695_v35, %v8520_v17  ;;  %v1627_v43 = vpop.f32.mrf.mxu1 }
 0x2f3   : > { %v6833_v0 = vadd.f32 %v2076_v26, %v1616_v57 }
 0x2f4   : > { %v2147_v42 = vadd.f32 %v2146_v53, %v6664_v50  ;;  %v2219_v44 = vadd.f32 %v2218_v18, %v2188_v37  ;;  %v2081_v61 = vadd.f32 %v6759_v40, %v1992_v10  ;;  %v1621_v53 = vadd.f32 %v6731_v48, %v8521_v27  ;;  %v8522_v37 = vld [vmem:[#allocation18_spill] sm:$0xff] }
 0x2f5   : > { %v2192_v48 = vmul.f32 %v6833_v0, %v6833_v0  ;;  %v1626_v46 = vadd.f32 %v1625_v31, %v8522_v37 }
 0x2f6   : > { %v1904_v54 = vpop.f32.mrf.mxu2  ;;  %v2148_v9 = vadd.f32 %v2147_v42, %v6796_v29  ;;  %v2220_v59 = vadd.f32 %v2219_v44, %v2189_v51  ;;  %v6841_v42 = vadd.f32 %v2078_v62, %v1618_v3  ;;  %v6848_v23 = vadd.f32 %v2081_v61, %v1621_v53 }
 0x2f7   : > { %v1628_v44 = vadd.f32 %v1627_v43, %v6547_v28 }
 0x2f8   : > { %v2085_v12 = vpop.f32.mrf.mxu0  ;;  %v2149_v60 = vadd.f32 %v2148_v9, %v6675_v11  ;;  %v2221_v40 = vadd.f32 %v2220_v59, %v2190_v58 }
 0x2f9   : > { %v1993_v34 = vpop.f32.mrf.mxu3 }
 0x2fa   : > { %v1994_v38 = vadd.f32 %v1993_v34, %v1904_v54  ;;  %v2150_v16 = vadd.f32 %v2149_v60, %v6811_v56  ;;  %v1623_v34 = vadd.f32 %v6766_v41, %v6538_v32  ;;  %v2222_v26 = vadd.f32 %v2221_v40, %v2191_v24 }
 0x2fb   : > { %v2194_v60 = vmul.f32 %v6848_v23, %v6848_v23 }
 0x2fc   : > { %v2151_v13 = vadd.f32 %v2150_v16, %v6689_v47  ;;  %v2083_v2 = vadd.f32 %v2082_v30, %v1994_v38  ;;  %v2193_v30 = vmul.f32 %v6841_v42, %v6841_v42  ;;  %v2223_v32 = vadd.f32 %v2222_v26, %v2192_v48  ;;  %v1630_v16 = vpop.f32.mrf.mxu1 }
 0x2fe   : > { %v1907_v1 = vpop.f32.mrf.mxu2  ;;  %v2152_v49 = vadd.f32 %v2151_v13, %v6825_v21  ;;  %v6854_v18 = vadd.f32 %v2083_v2, %v1623_v34  ;;  %v2224_v57 = vadd.f32 %v2223_v32, %v2193_v30  ;;  %v1631_v34 = vadd.f32 %v1630_v16, %v6551_v8  ;;  %v8523_v16 = vld [vmem:[#allocation19_spill] sm:$0xff] }
 0x300   : > { %v2087_v55 = vpop.f32.mrf.mxu0  ;;  %v2153_v10 = vadd.f32 %v2152_v49, %v6833_v0  ;;  %v2195_v62 = vmul.f32 %v6854_v18, %v6854_v18  ;;  %v2225_v58 = vadd.f32 %v2224_v57, %v2194_v60 }
 0x301   : > { %v1996_v54 = vpop.f32.mrf.mxu3 }
 0x302   : > { %v1997_v35 = vadd.f32 %v1996_v54, %v1907_v1  ;;  %v2154_v41 = vadd.f32 %v2153_v10, %v6841_v42  ;;  %v2226_v27 = vadd.f32 %v2225_v58, %v2195_v62 }
 0x304   : > { %v2086_v9 = vadd.f32 %v2085_v12, %v1997_v35  ;;  %v2155_v31 = vadd.f32 %v2154_v41, %v6848_v23 }
 0x306   : > { %v6859_v51 = vadd.f32 %v2086_v9, %v1626_v46  ;;  %v1909_v39 = vpop.f32.mrf.mxu2  ;;  %v2156_v17 = vadd.f32 %v2155_v31, %v6854_v18 }
 0x308   : > { %v2196_v3 = vmul.f32 %v6859_v51, %v6859_v51  ;;  %v2090_v1 = vpop.f32.mrf.mxu0  ;;  %v2157_v53 = vadd.f32 %v2156_v17, %v6859_v51 }
 0x309   : > { %v1998_v12 = vpop.f32.mrf.mxu3 }
 0x30a   : > { %v1999_v38 = vadd.f32 %v1998_v12, %v1909_v39  ;;  %v2227_v13 = vadd.f32 %v2226_v27, %v2196_v3 }
 0x30c   : > { %v2088_v61 = vadd.f32 %v2087_v55, %v1999_v38  ;;  %v1632_v55 = vpop.f32.mrf.mxu1 }
 0x30d   : > { %v1633_v32 = vadd.f32 %v1632_v55, %v6556_v19 }
 0x30e   : > { %v6869_v59 = vadd.f32 %v2088_v61, %v1628_v44  ;;  %v1912_v43 = vpop.f32.mrf.mxu2 }
 0x310   : > { %v2158_v54 = vadd.f32 %v2157_v53, %v6869_v59  ;;  %v2197_v28 = vmul.f32 %v6869_v59, %v6869_v59  ;;  %v2092_v48 = vpop.f32.mrf.mxu0 }
 0x311   : > { %v2001_v24 = vpop.f32.mrf.mxu3 }
 0x312   : > { %v2228_v2 = vadd.f32 %v2227_v13, %v2197_v28  ;;  %v2002_v35 = vadd.f32 %v2001_v24, %v1912_v43  ;;  %v8524_v43 = vld [vmem:[#allocation6_spill] sm:$0xff] }
 0x314   : > { %v2091_v40 = vadd.f32 %v2090_v1, %v2002_v35  ;;  %v1635_v8 = vpop.f32.mrf.mxu1 }
 0x315   : > { %v1636_v58 = vadd.f32 %v1635_v8, %v8523_v16  ;;  %v5470_v8 = vld [vmem:[%s8296_s2 + $0x138] sm:$0xff] }
 0x316   : > { %v6875_v49 = vadd.f32 %v2091_v40, %v1631_v34  ;;  %v1914_v46 = vpop.f32.mrf.mxu2  ;;  %3192 = vmatpush.bf16.msrb.mxu2 %v5470_v8  ;;  %v5433_v8 = vld [vmem:[%s8296_s2 + $0x10] sm:$0xff] }
 0x318   : > { %v2159_v9 = vadd.f32 %v2158_v54, %v6875_v49  ;;  %v2198_v37 = vmul.f32 %v6875_v49, %v6875_v49  ;;  %v2095_v31 = vpop.f32.mrf.mxu0 }
 0x319   : > { %v2003_v26 = vpop.f32.mrf.mxu3 }
 0x31a   : > { %v2229_v10 = vadd.f32 %v2228_v2, %v2198_v37  ;;  %v2004_v30 = vadd.f32 %v2003_v26, %v1914_v46 }
 0x31c   : > { %v2093_v41 = vadd.f32 %v2092_v48, %v2004_v30  ;;  %v1637_v27 = vpop.f32.mrf.mxu1 }
 0x31d   : > { %v1638_v24 = vadd.f32 %v1637_v27, %v8524_v43  ;;  %v5477_v27 = vld [vmem:[%s8296_s2 + $0x170] sm:$0xff] }
 0x31e   : > { %v6881_v60 = vadd.f32 %v2093_v41, %v1633_v32  ;;  %v1917_v57 = vpop.f32.mrf.mxu2 }
 0x320   : > { %v2160_v39 = vadd.f32 %v2159_v9, %v6881_v60  ;;  %v2199_v12 = vmul.f32 %v6881_v60, %v6881_v60  ;;  %v2097_v28 = vpop.f32.mrf.mxu0 }
 0x321   : > { %v2006_v62 = vpop.f32.mrf.mxu3 }
 0x322   : > { %v2230_v38 = vadd.f32 %v2229_v10, %v2199_v12  ;;  %v2007_v44 = vadd.f32 %v2006_v62, %v1917_v57  ;;  %v5469_v62 = vld [vmem:[%s8296_s2 + $0x130] sm:$0xff] }
 0x323   : > { %3193 = vmatpush.bf16.msrb.mxu2 %v5469_v62  ;;  %v5472_v62 = vld [vmem:[%s8296_s2 + $0x148] sm:$0xff] }
 0x324   : > { %v2096_v17 = vadd.f32 %v2095_v31, %v2007_v44 }
 0x326   : > { %v6887_v3 = vadd.f32 %v2096_v17, %v1636_v58  ;;  %v1919_v1 = vpop.f32.mrf.mxu2  ;;  %v5478_v58 = vld [vmem:[%s8296_s2 + $0x178] sm:$0xff] }
 0x327   : > { %v5438_v17 = vld [vmem:[%s8296_s2 + $0x38] sm:$0xff]  ;;  %3281 = vmatpush.bf16.msrb.mxu3 %v5478_v58  ;;  %v5471_v58 = vld [vmem:[%s8296_s2 + $0x140] sm:$0xff] }
 0x328   : > { %v2161_v19 = vadd.f32 %v2160_v39, %v6887_v3  ;;  %v2200_v61 = vmul.f32 %v6887_v3, %v6887_v3  ;;  %3514 = vmatpush.bf16.msrb.mxu0 %v5438_v17 }
 0x329   : > { %v2008_v53 = vpop.f32.mrf.mxu3 }
 0x32a   : > { %v2231_v13 = vadd.f32 %v2230_v38, %v2200_v61  ;;  %v2009_v54 = vadd.f32 %v2008_v53, %v1919_v1  ;;  %v5468_v61 = vld [vmem:[%s8296_s2 + $0x128] sm:$0xff]  ;;  %v5437_v53 = vld [vmem:[%s8296_s2 + $0x30] sm:$0xff] }
 0x32b   : > { %3194 = vmatpush.bf16.msrb.mxu2 %v5468_v61  ;;  %3282 = vmatpush.bf16.msrb.mxu3 %v5477_v27 }
 0x32c   : > { %v2098_v2 = vadd.f32 %v2097_v28, %v2009_v54  ;;  %v5467_v54 = vld [vmem:[%s8296_s2 + $0x120] sm:$0xff]  ;;  %3515 = vmatpush.bf16.msrb.mxu0 %v5437_v53 }
 0x32e   : > { %v6893_v35 = vadd.f32 %v2098_v2, %v1638_v24 }
 0x32f   : > { %3195 = vmatpush.bf16.msrb.mxu2 %v5467_v54  ;;  %v8525_v54 = vld [vmem:[#allocation21_spill] sm:$0xff] }
 0x330   : > { %v2162_v34 = vadd.f32 %v2161_v19, %v6893_v35  ;;  %v2201_v40 = vmul.f32 %v6893_v35, %v6893_v35 }
 0x332   : > { %v2163_v55 = vrot.slane %v2162_v34, 4  ;;  %v2232_v48 = vadd.f32 %v2231_v13, %v2201_v40  ;;  %v5476_v40 = vld [vmem:[%s8296_s2 + $0x168] sm:$0xff] }
 0x333   : > { %3283 = vmatpush.bf16.msrb.mxu3 %v5476_v40 }
 0x334   : > { %v2164_v9 = vadd.f32 %v2163_v55, %v2162_v34  ;;  %v2233_v37 = vrot.slane %v2232_v48, 4  ;;  %v5436_v55 = vld [vmem:[%s8296_s2 + $0x28] sm:$0xff] }
 0x335   : > { %3516 = vmatpush.bf16.msrb.mxu0 %v5436_v55 }
 0x336   : > { %v2165_v46 = vrot.slane %v2164_v9, 2  ;;  %v2234_v26 = vadd.f32 %v2233_v37, %v2232_v48  ;;  %v5466_v48 = vld [vmem:[%s8296_s2 + $0x118] sm:$0xff]  ;;  %v5465_v37 = vld [vmem:[%s8296_s2 + $0x110] sm:$0xff] }
 0x337   : > { %3196 = vmatpush.bf16.msrb.mxu2 %v5466_v48 }
 0x338   : > { %v2166_v10 = vadd.f32 %v2165_v46, %v2164_v9  ;;  %v2235_v30 = vrot.slane %v2234_v26, 2 }
 0x33a   : > { %v2167_v32 = vrot.slane %v2166_v10, 1  ;;  %v2236_v41 = vadd.f32 %v2235_v30, %v2234_v26  ;;  %v5474_v26 = vld [vmem:[%s8296_s2 + $0x158] sm:$0xff]  ;;  %v5464_v30 = vld [vmem:[%s8296_s2 + $0x108] sm:$0xff] }
 0x33b   : > { %3197 = vmatpush.bf16.msrb.mxu2 %v5465_v37 }
 0x33c   : > { %v2168_v39 = vadd.f32 %v2167_v32, %v2166_v10  ;;  %v2237_v12 = vrot.slane %v2236_v41, 1  ;;  %v5434_v10 = vld [vmem:[%s8296_s2 + $0x18] sm:$0xff] }
 0x33e   : > { %v6901_v57 = vmul.f32 0.00390625, %v2168_v39  ;;  %v2238_v31 = vadd.f32 %v2237_v12, %v2236_v41  ;;  %v5473_v41 = vld [vmem:[%s8296_s2 + $0x150] sm:$0xff]  ;;  %v5463_v39 = vld [vmem:[%s8296_s2 + $0x100] sm:$0xff] }
 0x33f   : > { %3198 = vmatpush.bf16.msrb.mxu2 %v5464_v30 }
 0x340   : > { %v2239_v38 = vmul.f32 0.00390625, %v2238_v31  ;;  %v2240_v44 = vmul.f32 %v6901_v57, %v6901_v57  ;;  %v2274_v16 = vsub.f32 %v6893_v35, %v6901_v57  ;;  %v2269_v28 = vsub.f32 %v6859_v51, %v6901_v57  ;;  %v5456_v31 = vld [vmem:[%s8296_s2 + $0xc8] sm:$0xff] }
 0x341   : > { %v2270_v43 = vsub.f32 %v6869_v59, %v6901_v57  ;;  %v2271_v24 = vsub.f32 %v6875_v49, %v6901_v57  ;;  %v2272_v2 = vsub.f32 %v6881_v60, %v6901_v57  ;;  %v2273_v34 = vsub.f32 %v6887_v3, %v6901_v57  ;;  %v5475_v49 = vld [vmem:[%s8296_s2 + $0x160] sm:$0xff]  ;;  %3109 = vmatpush.bf16.msra.mxu1 %v5456_v31 }
 0x342   : > { %v2241_v19 = vsub.f32 %v2239_v38, %v2240_v44  ;;  %v5435_v60 = vld [vmem:[%s8296_s2 + $0x20] sm:$0xff]  ;;  %3284 = vmatpush.bf16.msrb.mxu3 %v5475_v49  ;;  %v5432_v38 = vld [vmem:[%s8296_s2 + $0x8] sm:$0xff]  ;;  %v2243_v53 = vsub.f32 %v6569_v63, %v6901_v57  ;;  %v2244_v40 = vsub.f32 %v8525_v54, %v6901_v57  ;;  %v2245_v55 = vsub.f32 %v6578_v36, %v6901_v57 }
 0x343   : > { %3517 = vmatpush.bf16.msrb.mxu0 %v5435_v60  ;;  %3199 = vmatpush.bf16.msrb.mxu2 %v5463_v39  ;;  %v5455_v44 = vld [vmem:[%s8296_s2 + $0xc0] sm:$0xff]  ;;  %v2246_v48 = vsub.f32 %v6583_v6, %v6901_v57 }
 0x344   : > { %v2242_v1 = vmax.f32 %v2241_v19, 0.0  ;;  %v5431_v19 = vld [vmem:[%s8296_s2] sm:$0xff] }
 0x345   : > { %3110 = vmatpush.bf16.msra.mxu1 %v5455_v44 }
 0x346   : > { %v2275_v13 = vadd.f32 1e-05, %v2242_v1  ;;  %3285 = vmatpush.bf16.msrb.mxu3 %v5474_v26  ;;  %v5446_v1 = vld [vmem:[%s8296_s2 + $0x78] sm:$0xff] }
 0x347   : > { %3518 = vmatpush.bf16.msrb.mxu0 %v5434_v10 }
 0x348   : > { %5527 = vrsqrt.f32 %v2275_v13  ;;  %vm2282_vm7 = vweird.f32 %v2275_v13 }
 0x349   : > { %3603 = vmatpush.bf16.msrb.mxu1 %v5446_v1 }
 0x34a   : > { %3286 = vmatpush.bf16.msrb.mxu3 %v5473_v41 }
 0x34b   : > { %3519 = vmatpush.bf16.msrb.mxu0 %v5433_v8 }
 0x34e   : > { %v5528_v9 = vpop.eup %5527  ;;  %3287 = vmatpush.bf16.msrb.mxu3 %v5472_v62 }
 0x34f   : > { %v2277_v46 = vmul.f32 %v5528_v9, %v2275_v13  ;;  %3520 = vmatpush.bf16.msrb.mxu0 %v5432_v38  ;;  %vm2283_vm6 = vweird.f32 %v5528_v9 }
 0x350   : > { %vm2284_vm8 = vmor %vm2282_vm7, %vm2283_vm6 }
 0x351   : > { %v2278_v32 = vmul.f32 %v5528_v9, %v2277_v46 }
 0x352   : > { %3288 = vmatpush.bf16.msrb.mxu3 %v5471_v58 }
 0x353   : > { %v2279_v12 = vmul.f32 0.5, %v2278_v32  ;;  %3521 = vmatpush.bf16.msrb.mxu0 %v5431_v19 }
 0x355   : > { %v2280_v17 = vsub.f32 1.5, %v2279_v12 }
 0x357   : > { %v2281_v61 = vmul.f32 %v5528_v9, %v2280_v17 }
 0x359   : > { %v6995_v27 = vsel %vm2284_vm8, %v5528_v9, %v2281_v61 }
 0x35a   : > { %v2286_v49 = vmul.f32 %v6995_v27, %v2243_v53  ;;  %v2287_v13 = vmul.f32 %v6995_v27, %v2244_v40  ;;  %v2288_v60 = vmul.f32 %v6995_v27, %v2245_v55  ;;  %v2289_v9 = vmul.f32 %v6995_v27, %v2246_v48 }
 0x35b   : > { %v2314_v37 = vmul.f32 %v6995_v27, %v2271_v24  ;;  %v2315_v63 = vmul.f32 %v6995_v27, %v2272_v2 }
 0x35c   : > { %v2318_v46 = vmax.f32 %v2286_v49, 0.0  ;;  %v2319_v26 = vmax.f32 %v2287_v13, 0.0  ;;  %v2320_v10 = vmax.f32 %v2288_v60, 0.0  ;;  %v2321_v30 = vmax.f32 %v2289_v9, 0.0  ;;  %v8527_v9 = vld [vmem:[#allocation22_spill] sm:$0xff] }
 0x35d   : > { %v2346_v36 = vmax.f32 %v2314_v37, 0.0  ;;  %v2347_v32 = vmax.f32 %v2315_v63, 0.0  ;;  %v2247_v37 = vsub.f32 %v8527_v9, %v6901_v57  ;;  %v2248_v63 = vsub.f32 %v6595_v15, %v6901_v57 }
 0x35e   : > { %v2350_v41 = vpack.c.bf16 %v2318_v46, %v2318_v46  ;;  %v2351_v6 = vpack.c.bf16 %v2319_v26, %v2319_v26  ;;  %v2352_v8 = vpack.c.bf16 %v2320_v10, %v2320_v10  ;;  %v2353_v39 = vpack.c.bf16 %v2321_v30, %v2321_v30 }
 0x35f   : > { %v2378_v12 = vpack.c.bf16 %v2346_v36, %v2346_v36  ;;  %v2379_v31 = vpack.c.bf16 %v2347_v32, %v2347_v32 }
 0x360   : > { %v2398_v62 = vunpack.c.l.b16 %v2352_v8  ;;  %v2399_v38 = vunpack.c.l.b16 %v2350_v41  ;;  %v2510_v44 = vunpack.c.l.b16 %v2353_v39  ;;  %v2511_v58 = vunpack.c.l.b16 %v2351_v6 }
 0x361   : > { %v7011_v17 = vunpack.c.l.b16 %v2378_v12  ;;  %v7013_v24 = vunpack.c.l.b16 %v2379_v31  ;;  %v2290_v8 = vmul.f32 %v6995_v27, %v2247_v37  ;;  %v2291_v39 = vmul.f32 %v6995_v27, %v2248_v63 }
 0x362   : > { %v7015_v2 = vpack.c.b16 %v2510_v44, %v2398_v62  ;;  %v7017_v19 = vpack.c.b16 %v2511_v58, %v2399_v38  ;;  %v2735_v61 = vpack.c.b16 %v2511_v58, %v2511_v58  ;;  %v2415_v53 = vpack.c.b16 %v2399_v38, %v2399_v38  ;;  %v5445_v58 = vld [vmem:[%s8296_s2 + $0x70] sm:$0xff] }
 0x363   : > { %v7021_v1 = vpack.c.b16 %v7013_v24, %v7011_v17  ;;  %v2414_v48 = vpack.c.b16 %v2398_v62, %v2398_v62  ;;  %3604 = vmatpush.bf16.msrb.mxu1 %v5445_v58  ;;  %v2249_v63 = vsub.f32 %v6599_v33, %v6901_v57  ;;  %v2312_v33 = vmul.f32 %v6995_v27, %v2269_v28 }
 0x364   : > { %3200 = vmatmul.bf16.vlgmr.msrb.gmra.mxu2 %v7017_v19  ;;  %v2550_v54 = vshrl.u32 %v7017_v19, 16  ;;  %v2553_v40 = vshll.u32 %v7017_v19, 16  ;;  %v2755_v55 = vshll.u32 %v2735_v61, 16  ;;  %v2543_v49 = vshrl.u32 %v7015_v2, 16 }
 0x365   : > { %8526 = vst [vmem:[#allocation8_spill] sm:$0xff] %v7021_v1  ;;  %v2546_v26 = vshll.u32 %v7015_v2, 16  ;;  %v2434_v10 = vshrl.u32 %v2415_v53, 16  ;;  %v2431_v41 = vshrl.u32 %v2414_v48, 16  ;;  %v2322_v61 = vmax.f32 %v2290_v8, 0.0 }
 0x366   : > { %v2552_v13 = vrot.slane %v2550_v54, 7  ;;  %v2688_v60 = vrot.slane %v2553_v40, 1  ;;  %v2545_v46 = vrot.slane %v2543_v49, 7  ;;  %v2757_v32 = vrot.slane %v2755_v55, 4 }
 0x367   : > { %v2323_v53 = vmax.f32 %v2291_v39, 0.0  ;;  %v2686_v48 = vrot.slane %v2546_v26, 1  ;;  %v2344_v39 = vmax.f32 %v2312_v33, 0.0 }
 0x368   : > { %v2555_v30 = vor.u32 %v2553_v40, %v2552_v13  ;;  %v2689_v36 = vor.u32 %v2688_v60, %v2550_v54  ;;  %v2548_v6 = vor.u32 %v2546_v26, %v2545_v46  ;;  %v2734_v54 = vpack.c.b16 %v2510_v44, %v2510_v44 }
 0x369   : > { %v2354_v40 = vpack.c.bf16 %v2322_v61, %v2322_v61  ;;  %v2355_v55 = vpack.c.bf16 %v2323_v53, %v2323_v53  ;;  %v2687_v37 = vor.u32 %v2686_v48, %v2543_v49  ;;  %v2250_v46 = vsub.f32 %v6604_v52, %v6901_v57 }
 0x36a   : > { %v2671_v31 = vsel %vm5697_vm2, %v2434_v10, %v2555_v30  ;;  %v7038_v38 = vsel %vm6092_vm5, %v2689_v36, %v2757_v32  ;;  %v7043_v15 = vsel %vm5697_vm2, %v2431_v41, %v2548_v6  ;;  %v2751_v13 = vshll.u32 %v2734_v54, 16 }
 0x36b   : > { %3111 = vmatmul.bf16.vlgmr.msra.gmra.mxu1 %v2671_v31  ;;  %3289 = vmatmul.bf16.vlgmr.msrb.gmra.mxu3 %v7038_v38  ;;  %v2400_v60 = vunpack.c.l.b16 %v2354_v40  ;;  %v2512_v9 = vunpack.c.l.b16 %v2355_v55  ;;  %v2292_v30 = vmul.f32 %v6995_v27, %v2249_v63  ;;  %v2293_v44 = vmul.f32 %v6995_v27, %v2250_v46 }
 0x36c   : > { %3522 = vmatmul.bf16.vlgmr.msrb.gmra.mxu0 %v7043_v15  ;;  %v2753_v10 = vrot.slane %v2751_v13, 4  ;;  %v2313_v52 = vmul.f32 %v6995_v27, %v2270_v43  ;;  %v2376_v59 = vpack.c.bf16 %v2344_v39, %v2344_v39 }
 0x36d   : > { %v7060_v36 = vpack.c.b16 %v2512_v9, %v2400_v60  ;;  %v2324_v49 = vmax.f32 %v2292_v30, 0.0  ;;  %v2325_v32 = vmax.f32 %v2293_v44, 0.0  ;;  %v2736_v8 = vpack.c.b16 %v2512_v9, %v2512_v9 }
 0x36e   : > { %v7058_v26 = vsel %vm6092_vm5, %v2687_v37, %v2753_v10  ;;  %v2345_v58 = vmax.f32 %v2313_v52, 0.0  ;;  %v2416_v28 = vpack.c.b16 %v2400_v60, %v2400_v60  ;;  %v2251_v37 = vsub.f32 %v6613_v20, %v6901_v57 }
 0x36f   : > { %v2557_v41 = vshrl.u32 %v7060_v36, 16  ;;  %v2560_v6 = vshll.u32 %v7060_v36, 16  ;;  %v2357_v61 = vpack.c.bf16 %v2325_v32, %v2325_v32  ;;  %v2759_v54 = vshll.u32 %v2736_v8, 16 }
 0x370   : > { %v2377_v40 = vpack.c.bf16 %v2345_v58, %v2345_v58  ;;  %v2252_v9 = vsub.f32 %v6736_v7, %v6901_v57  ;;  %v2437_v63 = vshrl.u32 %v2416_v28, 16  ;;  %v2294_v10 = vmul.f32 %v6995_v27, %v2251_v37  ;;  %v5444_v7 = vld [vmem:[%s8296_s2 + $0x68] sm:$0xff] }
 0x371   : > { %v2559_v53 = vrot.slane %v2557_v41, 7  ;;  %v2690_v51 = vrot.slane %v2560_v6, 1  ;;  %v2513_v55 = vunpack.c.l.b16 %v2357_v61  ;;  %v2761_v46 = vrot.slane %v2759_v54, 4  ;;  %3605 = vmatpush.bf16.msrb.mxu1 %v5444_v7 }
 0x372   : > { %v2295_v30 = vmul.f32 %v6995_v27, %v2252_v9  ;;  %v7081_v60 = vunpack.c.l.b16 %v2376_v59  ;;  %v7083_v44 = vunpack.c.l.b16 %v2377_v40  ;;  %v2316_v54 = vmul.f32 %v6995_v27, %v2273_v34 }
 0x373   : > { %v2562_v48 = vor.u32 %v2560_v6, %v2559_v53  ;;  %v2691_v13 = vor.u32 %v2690_v51, %v2557_v41  ;;  %v2737_v39 = vpack.c.b16 %v2513_v55, %v2513_v55  ;;  %v2317_v59 = vmul.f32 %v6995_v27, %v2274_v16 }
 0x374   : > { %3205 = vmatmul.bf16.gmra.mxu2 %v7015_v2  ;;  %v2327_v32 = vmax.f32 %v2295_v30, 0.0  ;;  %v7103_v41 = vpack.c.b16 %v7083_v44, %v7081_v60  ;;  %v2348_v37 = vmax.f32 %v2316_v54, 0.0 }
 0x375   : > { %v7087_v33 = vsel %vm5697_vm2, %v2437_v63, %v2562_v48  ;;  %v7091_v20 = vsel %vm6092_vm5, %v2691_v13, %v2761_v46  ;;  %v2763_v28 = vshll.u32 %v2737_v39, 16  ;;  %v2349_v9 = vmax.f32 %v2317_v59, 0.0 }
 0x376   : > { %8530 = vst [vmem:[#allocation25_spill] sm:$0xff] %v7103_v41  ;;  %v2254_v63 = vsub.f32 %v6749_v5, %v6901_v57  ;;  %v2380_v34 = vpack.c.bf16 %v2348_v37, %v2348_v37 }
 0x377   : > { %v2765_v46 = vrot.slane %v2763_v28, 4 }
 0x378   : > { %v2297_v16 = vmul.f32 %v6995_v27, %v2254_v63  ;;  %v2256_v63 = vsub.f32 %v6764_v4, %v6901_v57 }
 0x37b   : > { %3116 = vmatmul.bf16.gmra.mxu1 %v7043_v15  ;;  %3294 = vmatmul.bf16.gmra.mxu3 %v7058_v26 }
 0x37c   : > { %3527 = vmatmul.bf16.gmra.mxu0 %v2671_v31  ;;  %v2356_v31 = vpack.c.bf16 %v2324_v49, %v2324_v49  ;;  %v2326_v49 = vmax.f32 %v2294_v10, 0.0  ;;  %v2381_v10 = vpack.c.bf16 %v2349_v9, %v2349_v9 }
 0x37e   : > { %v2401_v43 = vunpack.c.l.b16 %v2356_v31  ;;  %v2358_v58 = vpack.c.bf16 %v2326_v49, %v2326_v49  ;;  %v2359_v31 = vpack.c.bf16 %v2327_v32, %v2327_v32  ;;  %v7132_v49 = vunpack.c.l.b16 %v2380_v34 }
 0x37f   : > { %v7134_v5 = vunpack.c.l.b16 %v2381_v10  ;;  %v2299_v34 = vmul.f32 %v6995_v27, %v2256_v63  ;;  %v2258_v63 = vsub.f32 %v6780_v22, %v6901_v57 }
 0x380   : > { %v7093_v52 = vpack.c.b16 %v2513_v55, %v2401_v43  ;;  %v2417_v51 = vpack.c.b16 %v2401_v43, %v2401_v43  ;;  %v2402_v40 = vunpack.c.l.b16 %v2358_v58  ;;  %v2514_v55 = vunpack.c.l.b16 %v2359_v31 }
 0x381   : > { %v2253_v43 = vsub.f32 %v6625_v25, %v6901_v57  ;;  %v7141_v32 = vpack.c.b16 %v7134_v5, %v7132_v49 }
 0x382   : > { %v2564_v6 = vshrl.u32 %v7093_v52, 16  ;;  %v2567_v8 = vshll.u32 %v7093_v52, 16  ;;  %v2440_v3 = vshrl.u32 %v2417_v51, 16  ;;  %v7122_v30 = vpack.c.b16 %v2514_v55, %v2402_v40 }
 0x383   : > { %v2296_v35 = vmul.f32 %v6995_v27, %v2253_v43  ;;  %v2738_v31 = vpack.c.b16 %v2514_v55, %v2514_v55  ;;  %v2418_v54 = vpack.c.b16 %v2402_v40, %v2402_v40  ;;  %v2255_v43 = vsub.f32 %v6640_v14, %v6901_v57  ;;  %v5443_v14 = vld [vmem:[%s8296_s2 + $0x60] sm:$0xff] }
 0x384   : > { %3210 = vmatmul.bf16.gmra.mxu2 %v7060_v36  ;;  %v2566_v61 = vrot.slane %v2564_v6, 7  ;;  %v2692_v53 = vrot.slane %v2567_v8, 1  ;;  %v2571_v39 = vshrl.u32 %v7122_v30, 16  ;;  %v2574_v58 = vshll.u32 %v7122_v30, 16  ;;  %3606 = vmatpush.bf16.msrb.mxu1 %v5443_v14 }
 0x385   : > { %v2767_v59 = vshll.u32 %v2738_v31, 16 }
 0x386   : > { %v2569_v48 = vor.u32 %v2567_v8, %v2566_v61  ;;  %v2693_v13 = vor.u32 %v2692_v53, %v2564_v6  ;;  %v2328_v6 = vmax.f32 %v2296_v35, 0.0  ;;  %v2329_v8 = vmax.f32 %v2297_v16, 0.0 }
 0x387   : > { %v2573_v51 = vrot.slane %v2571_v39, 7  ;;  %v2694_v28 = vrot.slane %v2574_v58, 1  ;;  %v2769_v55 = vrot.slane %v2767_v59, 4  ;;  %v2331_v16 = vmax.f32 %v2299_v34, 0.0 }
 0x388   : > { %v7126_v7 = vsel %vm5697_vm2, %v2440_v3, %v2569_v48  ;;  %v7130_v25 = vsel %vm6092_vm5, %v2693_v13, %v2765_v46  ;;  %v2360_v61 = vpack.c.bf16 %v2328_v6, %v2328_v6  ;;  %v2361_v53 = vpack.c.bf16 %v2329_v8, %v2329_v8 }
 0x389   : > { %v2576_v37 = vor.u32 %v2574_v58, %v2573_v51  ;;  %v2695_v9 = vor.u32 %v2694_v28, %v2571_v39  ;;  %v2443_v3 = vshrl.u32 %v2418_v54, 16  ;;  %v2298_v46 = vmul.f32 %v6995_v27, %v2255_v43 }
 0x38a   : > { %v2403_v48 = vunpack.c.l.b16 %v2360_v61  ;;  %v2515_v13 = vunpack.c.l.b16 %v2361_v53  ;;  %v2363_v31 = vpack.c.bf16 %v2331_v16, %v2331_v16  ;;  %v2257_v43 = vsub.f32 %v6652_v45, %v6901_v57 }
 0x38b   : > { %3121 = vmatmul.bf16.gmra.mxu1 %v7087_v33  ;;  %3299 = vmatmul.bf16.gmra.mxu3 %v7091_v20  ;;  %v7154_v40 = vsel %vm5697_vm2, %v2443_v3, %v2576_v37  ;;  %v7158_v10 = vsel %vm6092_vm5, %v2695_v9, %v2769_v55  ;;  %v2330_v4 = vmax.f32 %v2298_v46, 0.0  ;;  %v2301_v46 = vmul.f32 %v6995_v27, %v2258_v63 }
 0x38c   : > { %3532 = vmatmul.bf16.gmra.mxu0 %v7043_v15  ;;  %v7160_v35 = vpack.c.b16 %v2515_v13, %v2403_v48  ;;  %v2739_v39 = vpack.c.b16 %v2515_v13, %v2515_v13  ;;  %v2419_v51 = vpack.c.b16 %v2403_v48, %v2403_v48  ;;  %v2516_v59 = vunpack.c.l.b16 %v2363_v31 }
 0x38d   : > { %v2362_v58 = vpack.c.bf16 %v2330_v4, %v2330_v4  ;;  %v2300_v55 = vmul.f32 %v6995_v27, %v2257_v43  ;;  %v2333_v22 = vmax.f32 %v2301_v46, 0.0  ;;  %v2259_v43 = vsub.f32 %v6664_v50, %v6901_v57  ;;  %v5442_v50 = vld [vmem:[%s8296_s2 + $0x58] sm:$0xff] }
 0x38e   : > { %v2578_v6 = vshrl.u32 %v7160_v35, 16  ;;  %v2581_v8 = vshll.u32 %v7160_v35, 16  ;;  %v2771_v28 = vshll.u32 %v2739_v39, 16  ;;  %v2446_v3 = vshrl.u32 %v2419_v51, 16  ;;  %3607 = vmatpush.bf16.msrb.mxu1 %v5442_v50 }
 0x38f   : > { %v2404_v54 = vunpack.c.l.b16 %v2362_v58  ;;  %v2332_v45 = vmax.f32 %v2300_v55, 0.0  ;;  %v2365_v39 = vpack.c.bf16 %v2333_v22, %v2333_v22  ;;  %v2260_v63 = vsub.f32 %v6796_v29, %v6901_v57 }
 0x390   : > { %v2580_v61 = vrot.slane %v2578_v6, 7  ;;  %v2696_v53 = vrot.slane %v2581_v8, 1  ;;  %v2773_v13 = vrot.slane %v2771_v28, 4 }
 0x391   : > { %v7185_v14 = vpack.c.b16 %v2516_v59, %v2404_v54  ;;  %v2517_v28 = vunpack.c.l.b16 %v2365_v39  ;;  %v2303_v55 = vmul.f32 %v6995_v27, %v2260_v63 }
 0x392   : > { %v2583_v37 = vor.u32 %v2581_v8, %v2580_v61  ;;  %v2697_v9 = vor.u32 %v2696_v53, %v2578_v6  ;;  %v2740_v6 = vpack.c.b16 %v2516_v59, %v2516_v59  ;;  %v2364_v8 = vpack.c.bf16 %v2332_v45, %v2332_v45 }
 0x393   : > { %8532 = vst [vmem:[#allocation23_spill] sm:$0xff] %v7185_v14  ;;  %v2585_v4 = vshrl.u32 %v7185_v14, 16  ;;  %v2588_v16 = vshll.u32 %v7185_v14, 16  ;;  %v2420_v61 = vpack.c.b16 %v2404_v54, %v2404_v54  ;;  %v2335_v22 = vmax.f32 %v2303_v55, 0.0 }
 0x394   : > { %3215 = vmatmul.bf16.gmra.mxu2 %v7093_v52  ;;  %v7179_v48 = vsel %vm5697_vm2, %v2446_v3, %v2583_v37  ;;  %v7183_v34 = vsel %vm6092_vm5, %v2697_v9, %v2773_v13  ;;  %v2775_v53 = vshll.u32 %v2740_v6, 16  ;;  %v2405_v51 = vunpack.c.l.b16 %v2364_v8 }
 0x395   : > { %8531 = vst [vmem:[#allocation7_spill] sm:$0xff] %v7183_v34  ;;  %v2587_v58 = vrot.slane %v2585_v4, 7  ;;  %v2698_v31 = vrot.slane %v2588_v16, 1  ;;  %v2449_v3 = vshrl.u32 %v2420_v61, 16  ;;  %v2302_v13 = vmul.f32 %v6995_v27, %v2259_v43 }
 0x396   : > { %v2777_v59 = vrot.slane %v2775_v53, 4  ;;  %v7207_v45 = vpack.c.b16 %v2517_v28, %v2405_v51  ;;  %v2741_v6 = vpack.c.b16 %v2517_v28, %v2517_v28  ;;  %v2367_v39 = vpack.c.bf16 %v2335_v22, %v2335_v22 }
 0x397   : > { %v2590_v37 = vor.u32 %v2588_v16, %v2587_v58  ;;  %v2699_v9 = vor.u32 %v2698_v31, %v2585_v4  ;;  %v2334_v29 = vmax.f32 %v2302_v13, 0.0  ;;  %v2421_v61 = vpack.c.b16 %v2405_v51, %v2405_v51 }
 0x398   : > { %8534 = vst [vmem:[#allocation9_spill] sm:$0xff] %v7207_v45  ;;  %v2592_v4 = vshrl.u32 %v7207_v45, 16  ;;  %v2595_v16 = vshll.u32 %v7207_v45, 16  ;;  %v2779_v53 = vshll.u32 %v2741_v6, 16 }
 0x399   : > { %v7201_v54 = vsel %vm5697_vm2, %v2449_v3, %v2590_v37  ;;  %v7205_v46 = vsel %vm6092_vm5, %v2699_v9, %v2777_v59  ;;  %v2366_v8 = vpack.c.bf16 %v2334_v29, %v2334_v29  ;;  %v2518_v9 = vunpack.c.l.b16 %v2367_v39 }
 0x39a   : > { %8533 = vst [vmem:[#allocation24_spill] sm:$0xff] %v7205_v46  ;;  %v2594_v58 = vrot.slane %v2592_v4, 7  ;;  %v2700_v31 = vrot.slane %v2595_v16, 1  ;;  %v2261_v3 = vsub.f32 %v6675_v11, %v6901_v57  ;;  %v2262_v59 = vsub.f32 %v6811_v56, %v6901_v57 }
 0x39b   : > { %3126 = vmatmul.bf16.gmra.mxu1 %v7126_v7  ;;  %3304 = vmatmul.bf16.gmra.mxu3 %v7130_v25  ;;  %v2406_v37 = vunpack.c.l.b16 %v2366_v8  ;;  %v2452_v13 = vshrl.u32 %v2421_v61, 16  ;;  %v2781_v28 = vrot.slane %v2779_v53, 4  ;;  %v2742_v6 = vpack.c.b16 %v2518_v9, %v2518_v9 }
 0x39c   : > { %3537 = vmatmul.bf16.gmra.mxu0 %v7087_v33  ;;  %v2597_v43 = vor.u32 %v2595_v16, %v2594_v58  ;;  %v2701_v63 = vor.u32 %v2700_v31, %v2592_v4  ;;  %v2304_v55 = vmul.f32 %v6995_v27, %v2261_v3  ;;  %v2305_v50 = vmul.f32 %v6995_v27, %v2262_v59 }
 0x39d   : > { %v7232_v22 = vpack.c.b16 %v2518_v9, %v2406_v37  ;;  %v2422_v61 = vpack.c.b16 %v2406_v37, %v2406_v37  ;;  %v2783_v53 = vshll.u32 %v2742_v6, 16 }
 0x39e   : > { %v7226_v51 = vsel %vm5697_vm2, %v2452_v13, %v2597_v43  ;;  %v7230_v29 = vsel %vm6092_vm5, %v2701_v63, %v2781_v28  ;;  %v2336_v11 = vmax.f32 %v2304_v55, 0.0  ;;  %v2337_v56 = vmax.f32 %v2305_v50, 0.0 }
 0x39f   : > { %8535 = vst [vmem:[#allocation26_spill] sm:$0xff] %v7226_v51  ;;  %v2599_v4 = vshrl.u32 %v7232_v22, 16  ;;  %v2602_v16 = vshll.u32 %v7232_v22, 16  ;;  %v2263_v13 = vsub.f32 %v6689_v47, %v6901_v57  ;;  %v2264_v55 = vsub.f32 %v6825_v21, %v6901_v57  ;;  %v5441_v21 = vld [vmem:[%s8296_s2 + $0x50] sm:$0xff] }
 0x3a0   : > { %8536 = vst [vmem:[#allocation27_spill] sm:$0xff] %v7230_v29  ;;  %v2368_v8 = vpack.c.bf16 %v2336_v11, %v2336_v11  ;;  %v2369_v39 = vpack.c.bf16 %v2337_v56, %v2337_v56  ;;  %v2455_v50 = vshrl.u32 %v2422_v61, 16  ;;  %v2785_v11 = vrot.slane %v2783_v53, 4  ;;  %3608 = vmatpush.bf16.msrb.mxu1 %v5441_v21 }
 0x3a1   : > { %8537 = vst [vmem:[#allocation11_spill] sm:$0xff] %v7232_v22  ;;  %v2601_v58 = vrot.slane %v2599_v4, 7  ;;  %v2702_v31 = vrot.slane %v2602_v16, 1  ;;  %v2306_v56 = vmul.f32 %v6995_v27, %v2263_v13  ;;  %v2307_v37 = vmul.f32 %v6995_v27, %v2264_v55 }
 0x3a2   : > { %v2407_v43 = vunpack.c.l.b16 %v2368_v8  ;;  %v2519_v63 = vunpack.c.l.b16 %v2369_v39 }
 0x3a3   : > { %v2604_v3 = vor.u32 %v2602_v16, %v2601_v58  ;;  %v2703_v59 = vor.u32 %v2702_v31, %v2599_v4  ;;  %v2338_v6 = vmax.f32 %v2306_v56, 0.0  ;;  %v2339_v8 = vmax.f32 %v2307_v37, 0.0 }
 0x3a4   : > { %3220 = vmatmul.bf16.gmra.mxu2 %v7122_v30  ;;  %v7256_v16 = vpack.c.b16 %v2519_v63, %v2407_v43  ;;  %v2423_v56 = vpack.c.b16 %v2407_v43, %v2407_v43 }
 0x3a5   : > { %v7250_v4 = vsel %vm5697_vm2, %v2455_v50, %v2604_v3  ;;  %v7254_v47 = vsel %vm6092_vm5, %v2703_v59, %v2785_v11  ;;  %v2743_v59 = vpack.c.b16 %v2519_v63, %v2519_v63  ;;  %v2370_v55 = vpack.c.bf16 %v2338_v6, %v2338_v6 }
 0x3a6   : > { %8538 = vst [vmem:[#allocation30_spill] sm:$0xff] %v7250_v4  ;;  %v2606_v58 = vshrl.u32 %v7256_v16, 16  ;;  %v2609_v31 = vshll.u32 %v7256_v16, 16  ;;  %v2266_v6 = vsub.f32 %v6841_v42, %v6901_v57 }
 0x3a7   : > { %8539 = vst [vmem:[#allocation10_spill] sm:$0xff] %v7254_v47  ;;  %v2787_v37 = vshll.u32 %v2743_v59, 16 }
 0x3a8   : > { %8540 = vst [vmem:[#allocation28_spill] sm:$0xff] %v7256_v16  ;;  %v2608_v50 = vrot.slane %v2606_v58, 7  ;;  %v2704_v11 = vrot.slane %v2609_v31, 1 }
 0x3aa   : > { %v2611_v21 = vor.u32 %v2609_v31, %v2608_v50  ;;  %v2309_v31 = vmul.f32 %v6995_v27, %v2266_v6 }
 0x3ab   : > { %3131 = vmatmul.bf16.gmra.mxu1 %v7154_v40  ;;  %3309 = vmatmul.bf16.gmra.mxu3 %v7158_v10 }
 0x3ac   : > { %3542 = vmatmul.bf16.gmra.mxu0 %v7126_v7 }
 0x3b4   : > { %3225 = vmatmul.bf16.gmra.mxu2 %v7160_v35 }
 0x3bb   : > { %3136 = vmatmul.bf16.gmra.mxu1 %v7179_v48  ;;  %3314 = vmatmul.bf16.gmra.mxu3 %v7183_v34 }
 0x3bc   : > { %3547 = vmatmul.bf16.gmra.mxu0 %v7154_v40 }
 0x3c4   : > { %3230 = vmatmul.bf16.gmra.mxu2 %v7185_v14 }
 0x3cb   : > { %3141 = vmatmul.bf16.gmra.mxu1 %v7201_v54  ;;  %3319 = vmatmul.bf16.gmra.mxu3 %v7205_v46 }
 0x3cc   : > { %3552 = vmatmul.bf16.gmra.mxu0 %v7179_v48 }
 0x3d4   : > { %3235 = vmatmul.bf16.gmra.mxu2 %v7207_v45 }
 0x3db   : > { %3146 = vmatmul.bf16.gmra.mxu1 %v7226_v51  ;;  %3324 = vmatmul.bf16.gmra.mxu3 %v7230_v29 }
 0x3dc   : > { %3557 = vmatmul.bf16.gmra.mxu0 %v7201_v54 }
 0x3e4   : > { %3240 = vmatmul.bf16.gmra.mxu2 %v7232_v22 }
 0x3e7   : > { %v3201_v28 = vpop.f32.mrf.mxu2 }
 0x3e8   : > { %v3112_v9 = vpop.f32.mrf.mxu1 }
 0x3e9   : > { %v3202_v29 = vadd.f32 %v3201_v28, %v3112_v9  ;;  %v7245_v22 = vpop.f32.mrf.mxu0  ;;  %v2371_v9 = vpack.c.bf16 %v2339_v8, %v2339_v8 }
 0x3eb   : > { %3151 = vmatmul.bf16.gmra.mxu1 %v7250_v4  ;;  %3329 = vmatmul.bf16.gmra.mxu3 %v7254_v47  ;;  %v2408_v47 = vunpack.c.l.b16 %v2370_v55  ;;  %v2520_v46 = vunpack.c.l.b16 %v2371_v9 }
 0x3ec   : > { %3562 = vmatmul.bf16.gmra.mxu0 %v7226_v51  ;;  %v2789_v51 = vrot.slane %v2787_v37, 4 }
 0x3ee   : > { %v3290_v39 = vpop.f32.mrf.mxu3 }
 0x3ef   : > { %v7266_v61 = vadd.f32 %v3290_v39, %v3202_v29  ;;  %v3203_v53 = vpop.f32.mrf.mxu2  ;;  %v2705_v29 = vor.u32 %v2704_v11, %v2606_v58  ;;  %v2265_v39 = vsub.f32 %v6833_v0, %v6901_v57 }
 0x3f0   : > { %v3114_v3 = vpop.f32.mrf.mxu1 }
 0x3f1   : > { %v3204_v13 = vadd.f32 %v3203_v53, %v3114_v3  ;;  %v7268_v28 = vpop.f32.mrf.mxu0  ;;  %v2458_v3 = vshrl.u32 %v2423_v56, 16  ;;  %v2308_v43 = vmul.f32 %v6995_v27, %v2265_v39  ;;  %v7287_v0 = vsel %vm6092_vm5, %v2705_v29, %v2789_v51 }
 0x3f2   : > { %8542 = vst [vmem:[#allocation13_spill] sm:$0xff] %v7287_v0 }
 0x3f3   : > { %v7283_v58 = vsel %vm5697_vm2, %v2458_v3, %v2611_v21  ;;  %v2340_v42 = vmax.f32 %v2308_v43, 0.0  ;;  %v2744_v21 = vpack.c.b16 %v2520_v46, %v2520_v46  ;;  %v2424_v43 = vpack.c.b16 %v2408_v47, %v2408_v47 }
 0x3f4   : > { %3245 = vmatmul.bf16.gmra.mxu2 %v7256_v16  ;;  %8541 = vst [vmem:[#allocation29_spill] sm:$0xff] %v7283_v58 }
 0x3f6   : > { %v3292_v45 = vpop.f32.mrf.mxu3 }
 0x3f7   : > { %v7273_v63 = vadd.f32 %v3292_v45, %v3204_v13  ;;  %v3206_v53 = vpop.f32.mrf.mxu2  ;;  %v7289_v45 = vpack.c.b16 %v2520_v46, %v2408_v47  ;;  %v2341_v13 = vmax.f32 %v2309_v31, 0.0  ;;  %v2791_v31 = vshll.u32 %v2744_v21, 16 }
 0x3f8   : > { %v3117_v8 = vpop.f32.mrf.mxu1 }
 0x3f9   : > { %v3207_v59 = vadd.f32 %v3206_v53, %v3117_v8  ;;  %v7278_v55 = vpop.f32.mrf.mxu0  ;;  %8543 = vst [vmem:[#allocation33_spill] sm:$0xff] %v7289_v45  ;;  %v2613_v50 = vshrl.u32 %v7289_v45, 16  ;;  %v2616_v11 = vshll.u32 %v7289_v45, 16  ;;  %v2372_v53 = vpack.c.bf16 %v2340_v42, %v2340_v42 }
 0x3fa   : > { %v2373_v6 = vpack.c.bf16 %v2341_v13, %v2341_v13  ;;  %v2268_v42 = vsub.f32 %v6854_v18, %v6901_v57  ;;  %v2793_v14 = vrot.slane %v2791_v31, 4  ;;  %v7325_v18 = vadd.f32 %v7245_v22, %v7266_v61 }
 0x3fb   : > { %3156 = vmatmul.bf16.gmra.mxu1 %v7283_v58  ;;  %3334 = vmatmul.bf16.gmra.mxu3 %v7287_v0  ;;  %v2615_v8 = vrot.slane %v2613_v50, 7  ;;  %v2706_v3 = vrot.slane %v2616_v11, 1  ;;  %v2409_v0 = vunpack.c.l.b16 %v2372_v53 }
 0x3fc   : > { %3567 = vmatmul.bf16.gmra.mxu0 %v7250_v4  ;;  %v2521_v16 = vunpack.c.l.b16 %v2373_v6 }
 0x3fd   : > { %v2618_v34 = vor.u32 %v2616_v11, %v2615_v8  ;;  %v2311_v11 = vmul.f32 %v6995_v27, %v2268_v42 }
 0x3fe   : > { %v3295_v9 = vpop.f32.mrf.mxu3  ;;  %v2745_v22 = vpack.c.b16 %v2521_v16, %v2521_v16 }
 0x3ff   : > { %v7296_v56 = vadd.f32 %v3295_v9, %v3207_v59  ;;  %v3208_v37 = vpop.f32.mrf.mxu2  ;;  %v2707_v59 = vor.u32 %v2706_v3, %v2613_v50  ;;  %v2267_v9 = vsub.f32 %v6848_v23, %v6901_v57  ;;  %v5440_v57 = vld [vmem:[%s8296_s2 + $0x48] sm:$0xff] }
 0x400   : > { %v3119_v51 = vpop.f32.mrf.mxu1  ;;  %3609 = vmatpush.bf16.msrb.mxu1 %v5440_v57 }
 0x401   : > { %v3209_v29 = vadd.f32 %v3208_v37, %v3119_v51  ;;  %v7298_v39 = vpop.f32.mrf.mxu0  ;;  %v2461_v51 = vshrl.u32 %v2424_v43, 16  ;;  %v2310_v47 = vmul.f32 %v6995_v27, %v2267_v9  ;;  %v7317_v23 = vsel %vm6092_vm5, %v2707_v59, %v2793_v14 }
 0x402   : > { %8544 = vst [vmem:[#allocation12_spill] sm:$0xff] %v7317_v23 }
 0x403   : > { %v7313_v50 = vsel %vm5697_vm2, %v2461_v51, %v2618_v34  ;;  %v2342_v27 = vmax.f32 %v2310_v47, 0.0  ;;  %v2343_v34 = vmax.f32 %v2311_v11, 0.0  ;;  %v2425_v51 = vpack.c.b16 %v2409_v0, %v2409_v0 }
 0x404   : > { %3250 = vmatmul.bf16.gmra.mxu2 %v7289_v45  ;;  %v2795_v47 = vshll.u32 %v2745_v22, 16 }
 0x405   : > { %v2374_v59 = vpack.c.bf16 %v2342_v27, %v2342_v27  ;;  %v2375_v9 = vpack.c.bf16 %v2343_v34, %v2343_v34  ;;  %v2464_v34 = vshrl.u32 %v2425_v51, 16 }
 0x406   : > { %v3297_v4 = vpop.f32.mrf.mxu3 }
 0x407   : > { %v7303_v46 = vadd.f32 %v3297_v4, %v3209_v29  ;;  %v3211_v37 = vpop.f32.mrf.mxu2  ;;  %v7319_v4 = vpack.c.b16 %v2521_v16, %v2409_v0  ;;  %v2522_v11 = vunpack.c.l.b16 %v2375_v9 }
 0x408   : > { %v3122_v13 = vpop.f32.mrf.mxu1 }
 0x409   : > { %v3212_v21 = vadd.f32 %v3211_v37, %v3122_v13  ;;  %v7308_v53 = vpop.f32.mrf.mxu0  ;;  %v2620_v29 = vshrl.u32 %v7319_v4, 16  ;;  %v2623_v6 = vshll.u32 %v7319_v4, 16  ;;  %v7339_v13 = vadd.f32 %v7268_v28, %v7273_v63 }
 0x40b   : > { %3161 = vmatmul.bf16.gmra.mxu1 %v7313_v50  ;;  %3339 = vmatmul.bf16.gmra.mxu3 %v7317_v23  ;;  %v2622_v37 = vrot.slane %v2620_v29, 7  ;;  %v2708_v42 = vrot.slane %v2623_v6, 1  ;;  %v2797_v23 = vrot.slane %v2795_v47, 4 }
 0x40c   : > { %3572 = vmatmul.bf16.gmra.mxu0 %v7283_v58 }
 0x40d   : > { %v2709_v16 = vor.u32 %v2708_v42, %v2620_v29  ;;  %v7360_v29 = vadd.f32 %v7278_v55, %v7296_v56  ;;  %v7371_v55 = vadd.f32 %v7298_v39, %v7303_v46 }
 0x40e   : > { %v3300_v14 = vpop.f32.mrf.mxu3 }
 0x40f   : > { %v7333_v8 = vadd.f32 %v3300_v14, %v3212_v21  ;;  %v3213_v3 = vpop.f32.mrf.mxu2  ;;  %v2410_v21 = vunpack.c.l.b16 %v2374_v59  ;;  %v2625_v14 = vor.u32 %v2623_v6, %v2622_v37  ;;  %v7352_v63 = vsel %vm6092_vm5, %v2709_v16, %v2797_v23 }
 0x410   : > { %v3124_v43 = vpop.f32.mrf.mxu1  ;;  %8545 = vst [vmem:[#allocation31_spill] sm:$0xff] %v7352_v63  ;;  %v2746_v37 = vpack.c.b16 %v2522_v11, %v2522_v11 }
 0x411   : > { %v3214_v61 = vadd.f32 %v3213_v3, %v3124_v43  ;;  %v7335_v31 = vpop.f32.mrf.mxu0  ;;  %v7348_v28 = vsel %vm5697_vm2, %v2464_v34, %v2625_v14  ;;  %v7354_v0 = vpack.c.b16 %v2522_v11, %v2410_v21  ;;  %v2426_v56 = vpack.c.b16 %v2410_v21, %v2410_v21  ;;  %v5453_v21 = vld [vmem:[%s8296_s2 + $0xb0] sm:$0xff] }
 0x412   : > { %v2799_v14 = vshll.u32 %v2746_v37, 16 }
 0x413   : > { %v2627_v22 = vshrl.u32 %v7354_v0, 16 }
 0x414   : > { %3255 = vmatmul.bf16.gmra.mxu2 %v7319_v4 }
 0x415   : > { %v2629_v47 = vrot.slane %v2627_v22, 7 }
 0x416   : > { %v3302_v57 = vpop.f32.mrf.mxu3 }
 0x417   : > { %v7342_v3 = vadd.f32 %v3302_v57, %v3214_v61  ;;  %v3216_v43 = vpop.f32.mrf.mxu2  ;;  %v2630_v61 = vshll.u32 %v7354_v0, 16 }
 0x418   : > { %v3127_v27 = vpop.f32.mrf.mxu1 }
 0x419   : > { %v3217_v45 = vadd.f32 %v3216_v43, %v3127_v27  ;;  %v7344_v58 = vpop.f32.mrf.mxu0  ;;  %v2710_v57 = vrot.slane %v2630_v61, 1  ;;  %v2632_v43 = vor.u32 %v2630_v61, %v2629_v47  ;;  %v7396_v61 = vadd.f32 %v7308_v53, %v7333_v8  ;;  %v5486_v47 = vld [vmem:[%s8296_s2 + $0x1b8] sm:$0xff]  ;;  %v5452_v53 = vld [vmem:[%s8296_s2 + $0xa8] sm:$0xff] }
 0x41a   : > { %3974 = vmatpush.bf16.msra.mxu3 %v5486_v47  ;;  %v2427_v47 = vpack.c.b16 %v7081_v60, %v7081_v60 }
 0x41b   : > { %3166 = vmatmul.bf16.gmra.mxu1 %v7348_v28  ;;  %3344 = vmatmul.bf16.gmra.mxu3 %v7352_v63  ;;  %v2711_v11 = vor.u32 %v2710_v57, %v2627_v22  ;;  %v5494_v57 = vld [vmem:[%s8296_s2 + $0x1f8] sm:$0xff] }
 0x41c   : > { %3577 = vmatmul.bf16.gmra.mxu0 %v7313_v50 }
 0x41d   : > { %4063 = vmatpush.bf16.msra.mxu0 %v5494_v57 }
 0x41e   : > { %v3305_v6 = vpop.f32.mrf.mxu3 }
 0x41f   : > { %v7365_v59 = vadd.f32 %v3305_v6, %v3217_v45  ;;  %v3218_v23 = vpop.f32.mrf.mxu2  ;;  %v5454_v45 = vld [vmem:[%s8296_s2 + $0xb8] sm:$0xff] }
 0x420   : > { %v3129_v9 = vpop.f32.mrf.mxu1  ;;  %3692 = vmatpush.bf16.msra.mxu2 %v5454_v45 }
 0x421   : > { %v3219_v42 = vadd.f32 %v3218_v23, %v3129_v9  ;;  %v7367_v51 = vpop.f32.mrf.mxu0  ;;  %v2467_v23 = vshrl.u32 %v2426_v56, 16  ;;  %v2801_v9 = vrot.slane %v2799_v14, 4  ;;  %v2634_v56 = vshrl.u32 %v7103_v41, 16 }
 0x422   : > { %v2637_v14 = vshll.u32 %v7103_v41, 16 }
 0x423   : > { %v7386_v37 = vsel %vm5697_vm2, %v2467_v23, %v2632_v43  ;;  %v7390_v22 = vsel %vm6092_vm5, %v2711_v11, %v2801_v9  ;;  %v2747_v11 = vpack.c.b16 %v7083_v44, %v7083_v44  ;;  %v5485_v23 = vld [vmem:[%s8296_s2 + $0x1b0] sm:$0xff]  ;;  %v7430_v44 = vadd.f32 %v7335_v31, %v7342_v3  ;;  %v5450_v31 = vld [vmem:[%s8296_s2 + $0x98] sm:$0xff] }
 0x424   : > { %3260 = vmatmul.bf16.gmra.mxu2 %v7354_v0  ;;  %8546 = vst [vmem:[#allocation32_spill] sm:$0xff] %v7390_v22  ;;  %v5493_v9 = vld [vmem:[%s8296_s2 + $0x1f0] sm:$0xff]  ;;  %3975 = vmatpush.bf16.msra.mxu3 %v5485_v23 }
 0x425   : > { %3693 = vmatpush.bf16.msra.mxu2 %v5453_v21  ;;  %v2636_v21 = vrot.slane %v2634_v56, 7  ;;  %4064 = vmatpush.bf16.msra.mxu0 %v5493_v9  ;;  %v2803_v57 = vshll.u32 %v2747_v11, 16  ;;  %v2470_v9 = vshrl.u32 %v2427_v47, 16  ;;  %v5482_v47 = vld [vmem:[%s8296_s2 + $0x198] sm:$0xff] }
 0x426   : > { %v3307_v16 = vpop.f32.mrf.mxu3 }
 0x427   : > { %v7377_v27 = vadd.f32 %v3307_v16, %v3219_v42  ;;  %v3221_v34 = vpop.f32.mrf.mxu2  ;;  %v5439_v42 = vld [vmem:[%s8296_s2 + $0x40] sm:$0xff] }
 0x428   : > { %v3132_v6 = vpop.f32.mrf.mxu1  ;;  %3610 = vmatpush.bf16.msrb.mxu1 %v5439_v42  ;;  %v2712_v42 = vrot.slane %v2637_v14, 1 }
 0x429   : > { %v3222_v39 = vadd.f32 %v3221_v34, %v3132_v6  ;;  %v7379_v46 = vpop.f32.mrf.mxu0  ;;  %3694 = vmatpush.bf16.msra.mxu2 %v5452_v53  ;;  %v5484_v53 = vld [vmem:[%s8296_s2 + $0x1a8] sm:$0xff] }
 0x42a   : > { %3976 = vmatpush.bf16.msra.mxu3 %v5484_v53 }
 0x42b   : > { %3171 = vmatmul.bf16.gmra.mxu1 %v7386_v37  ;;  %3349 = vmatmul.bf16.gmra.mxu3 %v7390_v22  ;;  %v2805_v22 = vrot.slane %v2803_v57, 4  ;;  %v5448_v57 = vld [vmem:[%s8296_s2 + $0x88] sm:$0xff] }
 0x42c   : > { %3582 = vmatmul.bf16.gmra.mxu0 %v7348_v28 }
 0x42e   : > { %v3310_v8 = vpop.f32.mrf.mxu3 }
 0x42f   : > { %v7413_v45 = vadd.f32 %v3310_v8, %v3222_v39  ;;  %v3223_v16 = vpop.f32.mrf.mxu2  ;;  %v5451_v39 = vld [vmem:[%s8296_s2 + $0xa0] sm:$0xff]  ;;  %v5492_v8 = vld [vmem:[%s8296_s2 + $0x1e8] sm:$0xff] }
 0x430   : > { %v3134_v43 = vpop.f32.mrf.mxu1  ;;  %3695 = vmatpush.bf16.msra.mxu2 %v5451_v39  ;;  %4065 = vmatpush.bf16.msra.mxu0 %v5492_v8  ;;  %v5483_v39 = vld [vmem:[%s8296_s2 + $0x1a0] sm:$0xff] }
 0x431   : > { %v3224_v34 = vadd.f32 %v3223_v16, %v3134_v43  ;;  %v7417_v6 = vpop.f32.mrf.mxu0  ;;  %v2639_v16 = vor.u32 %v2637_v14, %v2636_v21  ;;  %v2713_v43 = vor.u32 %v2712_v42, %v2634_v56  ;;  %v5491_v56 = vld [vmem:[%s8296_s2 + $0x1e0] sm:$0xff]  ;;  %v5449_v14 = vld [vmem:[%s8296_s2 + $0x90] sm:$0xff]  ;;  %v7469_v42 = vadd.f32 %v7344_v58, %v7365_v59  ;;  %3977 = vmatpush.bf16.msra.mxu3 %v5483_v39 }
 0x432   : > { %v2641_v58 = vshrl.u32 %v7021_v1, 16  ;;  %v2644_v59 = vshll.u32 %v7021_v1, 16 }
 0x433   : > { %v7463_v21 = vsel %vm6092_vm5, %v2713_v43, %v2805_v22  ;;  %v5490_v22 = vld [vmem:[%s8296_s2 + $0x1d8] sm:$0xff] }
 0x434   : > { %3265 = vmatmul.bf16.gmra.mxu2 %v7103_v41  ;;  %8548 = vst [vmem:[#allocation35_spill] sm:$0xff] %v7463_v21  ;;  %4066 = vmatpush.bf16.msra.mxu0 %v5491_v56  ;;  %v2643_v39 = vrot.slane %v2641_v58, 7  ;;  %v7500_v56 = vadd.f32 %v7367_v51, %v7377_v27 }
 0x435   : > { %3696 = vmatpush.bf16.msra.mxu2 %v5450_v31  ;;  %3978 = vmatpush.bf16.msra.mxu3 %v5482_v47 }
 0x436   : > { %v3312_v3 = vpop.f32.mrf.mxu3  ;;  %v2646_v51 = vor.u32 %v2644_v59, %v2643_v39  ;;  %v2648_v39 = vshrl.u32 %v7141_v32, 16 }
 0x437   : > { %v7444_v23 = vadd.f32 %v3312_v3, %v3224_v34  ;;  %v3226_v60 = vpop.f32.mrf.mxu2  ;;  %v7459_v34 = vsel %vm5697_vm2, %v2470_v9, %v2639_v16  ;;  %v2748_v16 = vpack.c.b16 %v7013_v24, %v7013_v24  ;;  %v5447_v9 = vld [vmem:[%s8296_s2 + $0x80] sm:$0xff]  ;;  %v2714_v24 = vrot.slane %v2644_v59, 1 }
 0x438   : > { %v3137_v11 = vpop.f32.mrf.mxu1  ;;  %8547 = vst [vmem:[#allocation34_spill] sm:$0xff] %v7459_v34  ;;  %4067 = vmatpush.bf16.msra.mxu0 %v5490_v22  ;;  %v5480_v22 = vld [vmem:[%s8296_s2 + $0x188] sm:$0xff] }
 0x439   : > { %v3227_v41 = vadd.f32 %v3226_v60, %v3137_v11  ;;  %v7446_v63 = vpop.f32.mrf.mxu0  ;;  %3697 = vmatpush.bf16.msra.mxu2 %v5449_v14  ;;  %v5481_v11 = vld [vmem:[%s8296_s2 + $0x190] sm:$0xff]  ;;  %v2428_v14 = vpack.c.b16 %v7011_v17, %v7011_v17  ;;  %v2807_v47 = vshll.u32 %v2748_v16, 16  ;;  %v2715_v27 = vor.u32 %v2714_v24, %v2641_v58 }
 0x43a   : > { %3979 = vmatpush.bf16.msra.mxu3 %v5481_v11  ;;  %v2651_v24 = vshll.u32 %v7141_v32, 16 }
 0x43b   : > { %3176 = vmatmul.bf16.gmra.mxu1 %v7459_v34  ;;  %3354 = vmatmul.bf16.gmra.mxu3 %v7463_v21  ;;  %v2809_v17 = vrot.slane %v2807_v47, 4 }
 0x43c   : > { %3587 = vmatmul.bf16.gmra.mxu0 %v7386_v37 }
 0x43d   : > { %3698 = vmatpush.bf16.msra.mxu2 %v5448_v57  ;;  %v5488_v57 = vld [vmem:[%s8296_s2 + $0x1c8] sm:$0xff]  ;;  %v7523_v59 = vsel %vm6092_vm5, %v2715_v27, %v2809_v17  ;;  %v7541_v27 = vadd.f32 %v7417_v6, %v7444_v23 }
 0x43e   : > { %v3315_v53 = vpop.f32.mrf.mxu3  ;;  %3980 = vmatpush.bf16.msra.mxu3 %v5480_v22  ;;  %8549 = vst [vmem:[#allocation36_spill] sm:$0xff] %v7523_v59 }
 0x43f   : > { %v7483_v8 = vadd.f32 %v3315_v53, %v3227_v41  ;;  %v3228_v31 = vpop.f32.mrf.mxu2  ;;  %v5489_v41 = vld [vmem:[%s8296_s2 + $0x1d0] sm:$0xff] }
 0x440   : > { %v3139_v3 = vpop.f32.mrf.mxu1  ;;  %4068 = vmatpush.bf16.msra.mxu0 %v5489_v41  ;;  %v5479_v41 = vld [vmem:[%s8296_s2 + $0x180] sm:$0xff] }
 0x441   : > { %v3229_v43 = vadd.f32 %v3228_v31, %v3139_v3  ;;  %v7487_v60 = vpop.f32.mrf.mxu0  ;;  %3699 = vmatpush.bf16.msra.mxu2 %v5447_v9  ;;  %v5487_v9 = vld [vmem:[%s8296_s2 + $0x1c0] sm:$0xff] }
 0x442   : > { %3981 = vmatpush.bf16.msra.mxu3 %v5479_v41 }
 0x444   : > { %3270 = vmatmul.bf16.gmra.mxu2 %v7021_v1  ;;  %v2473_v1 = vshrl.u32 %v2428_v14, 16  ;;  %4069 = vmatpush.bf16.msra.mxu0 %v5488_v57 }
 0x446   : > { %v3317_v53 = vpop.f32.mrf.mxu3  ;;  %v7519_v58 = vsel %vm5697_vm2, %v2473_v1, %v2646_v51  ;;  %v5502_v1 = vld [vmem:[%s8296_s2 + $0x238] sm:$0xff]  ;;  %v2716_v51 = vrot.slane %v2651_v24, 1 }
 0x447   : > { %v3318_v31 = vadd.f32 %v3317_v53, %v3229_v43  ;;  %v3231_v3 = vpop.f32.mrf.mxu2  ;;  %4152 = vmatpush.bf16.msra.mxu1 %v5502_v1  ;;  %v2650_v53 = vrot.slane %v2648_v39, 7 }
 0x448   : > { %v3142_v21 = vpop.f32.mrf.mxu1  ;;  %4070 = vmatpush.bf16.msra.mxu0 %v5487_v9  ;;  %v2717_v9 = vor.u32 %v2716_v51, %v2648_v39 }
 0x449   : > { %v3232_v16 = vadd.f32 %v3231_v3, %v3142_v21  ;;  %v3553_v11 = vpop.f32.mrf.mxu0  ;;  %v7529_v21 = vadd.f32 %v7379_v46, %v7413_v45  ;;  %v2749_v46 = vpack.c.b16 %v7134_v5, %v7134_v5  ;;  %v2429_v3 = vpack.c.b16 %v7132_v49, %v7132_v49 }
 0x44a   : > { %v2653_v41 = vor.u32 %v2651_v24, %v2650_v53  ;;  %v7558_v49 = vadd.f32 %v7446_v63, %v7483_v8  ;;  %v7562_v62 = vadd.f32 %v7487_v60, %v3318_v31  ;;  %v5501_v60 = vld [vmem:[%s8296_s2 + $0x230] sm:$0xff] }
 0x44b   : > { %3181 = vmatmul.bf16.gmra.mxu1 %v7519_v58  ;;  %3359 = vmatmul.bf16.gmra.mxu3 %v7523_v59  ;;  %v2811_v17 = vshll.u32 %v2749_v46, 16 }
 0x44c   : > { %3592 = vmatmul.bf16.gmra.mxu0 %v7459_v34  ;;  %4153 = vmatpush.bf16.msra.mxu1 %v5501_v60 }
 0x44e   : > { %v3320_v43 = vpop.f32.mrf.mxu3 }
 0x44f   : > { %v3321_v14 = vadd.f32 %v3320_v43, %v3232_v16  ;;  %v3233_v47 = vpop.f32.mrf.mxu2 }
 0x450   : > { %v3144_v22 = vpop.f32.mrf.mxu1 }
 0x451   : > { %v3234_v45 = vadd.f32 %v3233_v47, %v3144_v22  ;;  %v3555_v57 = vpop.f32.mrf.mxu0  ;;  %v2476_v47 = vshrl.u32 %v2429_v3, 16  ;;  %v2813_v22 = vrot.slane %v2811_v17, 4  ;;  %v7567_v8 = vadd.f32 %v3553_v11, %v3321_v14 }
 0x453   : > { %v7548_v6 = vsel %vm5697_vm2, %v2476_v47, %v2653_v41  ;;  %v7552_v23 = vsel %vm6092_vm5, %v2717_v9, %v2813_v22 }
 0x454   : > { %3275 = vmatmul.bf16.gmra.mxu2 %v7141_v32  ;;  %8550 = vst [vmem:[#allocation14_spill] sm:$0xff] %v7552_v23 }
 0x456   : > { %v3322_v16 = vpop.f32.mrf.mxu3 }
 0x457   : > { %v3323_v1 = vadd.f32 %v3322_v16, %v3234_v45  ;;  %v3236_v43 = vpop.f32.mrf.mxu2 }
 0x458   : > { %v3147_v5 = vpop.f32.mrf.mxu1 }
 0x459   : > { %v3237_v59 = vadd.f32 %v3236_v43, %v3147_v5  ;;  %v3558_v34 = vpop.f32.mrf.mxu0  ;;  %v7573_v22 = vadd.f32 %v3555_v57, %v3323_v1 }
 0x45b   : > { %3186 = vmatmul.bf16.gmra.mxu1 %v7548_v6  ;;  %3364 = vmatmul.bf16.gmra.mxu3 %v7552_v23  ;;  %v8557_v23 = vld [vmem:[#allocation30_spill] sm:$0xff] }
 0x45c   : > { %3597 = vmatmul.bf16.gmra.mxu0 %v7519_v58 }
 0x45e   : > { %v3325_v39 = vpop.f32.mrf.mxu3 }
 0x45f   : > { %v3326_v24 = vadd.f32 %v3325_v39, %v3237_v59  ;;  %v3238_v46 = vpop.f32.mrf.mxu2 }
 0x460   : > { %v3149_v12 = vpop.f32.mrf.mxu1 }
 0x461   : > { %v3239_v45 = vadd.f32 %v3238_v46, %v3149_v12  ;;  %v3560_v53 = vpop.f32.mrf.mxu0 }
 0x464   : > { %3700 = vmatmul.bf16.vlgmr.msra.gmra.mxu2 %v7058_v26 }
 0x466   : > { %v3327_v51 = vpop.f32.mrf.mxu3 }
 0x467   : > { %v3328_v3 = vadd.f32 %v3327_v51, %v3239_v45  ;;  %v3241_v17 = vpop.f32.mrf.mxu2  ;;  %v7578_v45 = vadd.f32 %v3558_v34, %v3326_v24  ;;  %v5500_v24 = vld [vmem:[%s8296_s2 + $0x228] sm:$0xff] }
 0x468   : > { %v3152_v16 = vpop.f32.mrf.mxu1  ;;  %4154 = vmatpush.bf16.msra.mxu1 %v5500_v24 }
 0x469   : > { %v3242_v41 = vadd.f32 %v3241_v17, %v3152_v16  ;;  %v3563_v63 = vpop.f32.mrf.mxu0 }
 0x46b   : > { %3611 = vmatmul.bf16.vlgmr.msrb.gmra.mxu1 %v7015_v2  ;;  %3982 = vmatmul.bf16.vlgmr.msra.gmra.mxu3 %v7043_v15 }
 0x46c   : > { %4071 = vmatmul.bf16.vlgmr.msra.gmra.mxu0 %v7015_v2 }
 0x46e   : > { %v3330_v31 = vpop.f32.mrf.mxu3 }
 0x46f   : > { %v3331_v59 = vadd.f32 %v3330_v31, %v3242_v41  ;;  %v3243_v9 = vpop.f32.mrf.mxu2  ;;  %v7581_v41 = vadd.f32 %v3560_v53, %v3328_v3 }
 0x470   : > { %v3154_v43 = vpop.f32.mrf.mxu1 }
 0x471   : > { %v3244_v5 = vadd.f32 %v3243_v9, %v3154_v43  ;;  %v3565_v47 = vpop.f32.mrf.mxu0  ;;  %v7586_v34 = vadd.f32 %v3563_v63, %v3331_v59 }
 0x474   : > { %3705 = vmatmul.bf16.gmra.mxu2 %v7038_v38 }
 0x476   : > { %v3332_v15 = vpop.f32.mrf.mxu3 }
 0x477   : > { %v3333_v11 = vadd.f32 %v3332_v15, %v3244_v5  ;;  %v3246_v14 = vpop.f32.mrf.mxu2 }
 0x478   : > { %v3157_v39 = vpop.f32.mrf.mxu1 }
 0x479   : > { %v3247_v46 = vadd.f32 %v3246_v14, %v3157_v39  ;;  %v3568_v12 = vpop.f32.mrf.mxu0 }
 0x47b   : > { %3616 = vmatmul.bf16.gmra.mxu1 %v7017_v19  ;;  %3987 = vmatmul.bf16.gmra.mxu3 %v7087_v33 }
 0x47c   : > { %4076 = vmatmul.bf16.gmra.mxu0 %v7060_v36 }
 0x47e   : > { %v3335_v51 = vpop.f32.mrf.mxu3 }
 0x47f   : > { %v3336_v17 = vadd.f32 %v3335_v51, %v3247_v46  ;;  %v3248_v57 = vpop.f32.mrf.mxu2  ;;  %v7592_v46 = vadd.f32 %v3565_v47, %v3333_v11 }
 0x480   : > { %v3159_v1 = vpop.f32.mrf.mxu1 }
 0x481   : > { %v3249_v16 = vadd.f32 %v3248_v57, %v3159_v1  ;;  %v3570_v38 = vpop.f32.mrf.mxu0  ;;  %v7597_v1 = vadd.f32 %v3568_v12, %v3336_v17  ;;  %v5499_v17 = vld [vmem:[%s8296_s2 + $0x220] sm:$0xff] }
 0x482   : > { %4155 = vmatpush.bf16.msra.mxu1 %v5499_v17 }
 0x484   : > { %3710 = vmatmul.bf16.gmra.mxu2 %v7058_v26 }
 0x486   : > { %v3337_v60 = vpop.f32.mrf.mxu3 }
 0x487   : > { %v3338_v31 = vadd.f32 %v3337_v60, %v3249_v16  ;;  %v3251_v9 = vpop.f32.mrf.mxu2 }
 0x488   : > { %v3162_v19 = vpop.f32.mrf.mxu1 }
 0x489   : > { %v3252_v43 = vadd.f32 %v3251_v9, %v3162_v19  ;;  %v3573_v33 = vpop.f32.mrf.mxu0 }
 0x48b   : > { %3621 = vmatmul.bf16.gmra.mxu1 %v7015_v2  ;;  %3992 = vmatmul.bf16.gmra.mxu3 %v7126_v7 }
 0x48c   : > { %4081 = vmatmul.bf16.gmra.mxu0 %v7093_v52 }
 0x48e   : > { %v3340_v53 = vpop.f32.mrf.mxu3 }
 0x48f   : > { %v3341_v3 = vadd.f32 %v3340_v53, %v3252_v43  ;;  %v3253_v5 = vpop.f32.mrf.mxu2  ;;  %v7600_v43 = vadd.f32 %v3570_v38, %v3338_v31 }
 0x490   : > { %v3164_v15 = vpop.f32.mrf.mxu1 }
 0x491   : > { %v3254_v14 = vadd.f32 %v3253_v5, %v3164_v15  ;;  %v3575_v39 = vpop.f32.mrf.mxu0  ;;  %v7605_v12 = vadd.f32 %v3573_v33, %v3341_v3 }
 0x494   : > { %3715 = vmatmul.bf16.gmra.mxu2 %v7091_v20 }
 0x496   : > { %v3342_v2 = vpop.f32.mrf.mxu3 }
 0x497   : > { %v3343_v7 = vadd.f32 %v3342_v2, %v3254_v14  ;;  %v3256_v63 = vpop.f32.mrf.mxu2 }
 0x498   : > { %v3167_v59 = vpop.f32.mrf.mxu1 }
 0x499   : > { %v3257_v51 = vadd.f32 %v3256_v63, %v3167_v59  ;;  %v3578_v57 = vpop.f32.mrf.mxu0 }
 0x49b   : > { %3626 = vmatmul.bf16.gmra.mxu1 %v7060_v36  ;;  %3997 = vmatmul.bf16.gmra.mxu3 %v7154_v40 }
 0x49c   : > { %4086 = vmatmul.bf16.gmra.mxu0 %v7122_v30 }
 0x49e   : > { %v3345_v16 = vpop.f32.mrf.mxu3 }
 0x49f   : > { %v3346_v60 = vadd.f32 %v3345_v16, %v3257_v51  ;;  %v3258_v47 = vpop.f32.mrf.mxu2  ;;  %v7611_v51 = vadd.f32 %v3575_v39, %v3343_v7 }
 0x4a0   : > { %v3169_v11 = vpop.f32.mrf.mxu1 }
 0x4a1   : > { %v3259_v9 = vadd.f32 %v3258_v47, %v3169_v11  ;;  %v3580_v19 = vpop.f32.mrf.mxu0  ;;  %v7616_v11 = vadd.f32 %v3578_v57, %v3346_v60  ;;  %v8553_v57 = vld [vmem:[#allocation26_spill] sm:$0xff] }
 0x4a4   : > { %3720 = vmatmul.bf16.gmra.mxu2 %v7130_v25 }
 0x4a6   : > { %v3347_v24 = vpop.f32.mrf.mxu3 }
 0x4a7   : > { %v3348_v53 = vadd.f32 %v3347_v24, %v3259_v9  ;;  %v3261_v5 = vpop.f32.mrf.mxu2  ;;  %v8551_v9 = vld [vmem:[#allocation23_spill] sm:$0xff] }
 0x4a8   : > { %v3172_v36 = vpop.f32.mrf.mxu1 }
 0x4a9   : > { %v3262_v15 = vadd.f32 %v3261_v5, %v3172_v36  ;;  %v3583_v40 = vpop.f32.mrf.mxu0  ;;  %v7619_v17 = vadd.f32 %v3580_v19, %v3348_v53  ;;  %v5498_v19 = vld [vmem:[%s8296_s2 + $0x218] sm:$0xff] }
 0x4aa   : > { %4156 = vmatpush.bf16.msra.mxu1 %v5498_v19 }
 0x4ab   : > { %3631 = vmatmul.bf16.gmra.mxu1 %v7093_v52  ;;  %4002 = vmatmul.bf16.gmra.mxu3 %v7179_v48 }
 0x4ac   : > { %4091 = vmatmul.bf16.gmra.mxu0 %v7160_v35 }
 0x4ae   : > { %v3350_v38 = vpop.f32.mrf.mxu3 }
 0x4af   : > { %v3351_v31 = vadd.f32 %v3350_v38, %v3262_v15  ;;  %v3263_v14 = vpop.f32.mrf.mxu2  ;;  %v8552_v38 = vld [vmem:[#allocation7_spill] sm:$0xff] }
 0x4b0   : > { %v3174_v2 = vpop.f32.mrf.mxu1 }
 0x4b1   : > { %v3264_v63 = vadd.f32 %v3263_v14, %v3174_v2  ;;  %v3585_v59 = vpop.f32.mrf.mxu0  ;;  %v7624_v60 = vadd.f32 %v3583_v40, %v3351_v31 }
 0x4b4   : > { %3725 = vmatmul.bf16.gmra.mxu2 %v7158_v10 }
 0x4b6   : > { %v3352_v52 = vpop.f32.mrf.mxu3 }
 0x4b7   : > { %v3353_v48 = vadd.f32 %v3352_v52, %v3264_v63  ;;  %v3266_v33 = vpop.f32.mrf.mxu2 }
 0x4b8   : > { %v3177_v3 = vpop.f32.mrf.mxu1 }
 0x4b9   : > { %v3267_v16 = vadd.f32 %v3266_v33, %v3177_v3  ;;  %v3588_v47 = vpop.f32.mrf.mxu0  ;;  %v8554_v33 = vld [vmem:[#allocation9_spill] sm:$0xff] }
 0x4bb   : > { %3636 = vmatmul.bf16.gmra.mxu1 %v7122_v30  ;;  %4007 = vmatmul.bf16.gmra.mxu3 %v7201_v54 }
 0x4bc   : > { %4096 = vmatmul.bf16.gmra.mxu0 %v8551_v9 }
 0x4be   : > { %v3355_v24 = vpop.f32.mrf.mxu3 }
 0x4bf   : > { %v3356_v5 = vadd.f32 %v3355_v24, %v3267_v16  ;;  %v3268_v39 = vpop.f32.mrf.mxu2 }
 0x4c0   : > { %v3179_v7 = vpop.f32.mrf.mxu1 }
 0x4c1   : > { %v3269_v36 = vadd.f32 %v3268_v39, %v3179_v7  ;;  %v3590_v15 = vpop.f32.mrf.mxu0  ;;  %v7635_v19 = vadd.f32 %v3588_v47, %v3356_v5 }
 0x4c4   : > { %3730 = vmatmul.bf16.gmra.mxu2 %v8552_v38 }
 0x4c6   : > { %v3357_v14 = vpop.f32.mrf.mxu3 }
 0x4c7   : > { %v3358_v2 = vadd.f32 %v3357_v14, %v3269_v36  ;;  %v3271_v63 = vpop.f32.mrf.mxu2  ;;  %v7630_v36 = vadd.f32 %v3585_v59, %v3353_v48 }
 0x4c8   : > { %v3182_v30 = vpop.f32.mrf.mxu1 }
 0x4c9   : > { %v3272_v52 = vadd.f32 %v3271_v63, %v3182_v30  ;;  %v3593_v54 = vpop.f32.mrf.mxu0  ;;  %8555 = vst [vmem:[#allocation37_spill] sm:$0xff] %v7630_v36  ;;  %v7638_v36 = vadd.f32 %v3590_v15, %v3358_v2  ;;  %v5497_v15 = vld [vmem:[%s8296_s2 + $0x210] sm:$0xff] }
 0x4ca   : > { %4157 = vmatpush.bf16.msra.mxu1 %v5497_v15 }
 0x4cb   : > { %3641 = vmatmul.bf16.gmra.mxu1 %v7160_v35  ;;  %4012 = vmatmul.bf16.gmra.mxu3 %v8553_v57  ;;  %v8556_v35 = vld [vmem:[#allocation24_spill] sm:$0xff] }
 0x4cc   : > { %4101 = vmatmul.bf16.gmra.mxu0 %v8554_v33 }
 0x4ce   : > { %v3360_v53 = vpop.f32.mrf.mxu3 }
 0x4cf   : > { %v3361_v3 = vadd.f32 %v3360_v53, %v3272_v52  ;;  %v3273_v16 = vpop.f32.mrf.mxu2  ;;  %v8558_v52 = vld [vmem:[#allocation11_spill] sm:$0xff] }
 0x4d0   : > { %v3184_v24 = vpop.f32.mrf.mxu1 }
 0x4d1   : > { %v3274_v39 = vadd.f32 %v3273_v16, %v3184_v24  ;;  %v3595_v7 = vpop.f32.mrf.mxu0 }
 0x4d4   : > { %3735 = vmatmul.bf16.gmra.mxu2 %v8556_v35 }
 0x4d6   : > { %v3362_v14 = vpop.f32.mrf.mxu3 }
 0x4d7   : > { %v3363_v40 = vadd.f32 %v3362_v14, %v3274_v39  ;;  %v3276_v31 = vpop.f32.mrf.mxu2  ;;  %v8559_v39 = vld [vmem:[#allocation27_spill] sm:$0xff] }
 0x4d8   : > { %v3187_v63 = vpop.f32.mrf.mxu1 }
 0x4d9   : > { %v3277_v30 = vadd.f32 %v3276_v31, %v3187_v63  ;;  %v3598_v57 = vpop.f32.mrf.mxu0 }
 0x4db   : > { %3646 = vmatmul.bf16.gmra.mxu1 %v8551_v9  ;;  %4017 = vmatmul.bf16.gmra.mxu3 %v8557_v23 }
 0x4dc   : > { %4106 = vmatmul.bf16.gmra.mxu0 %v8558_v52 }
 0x4de   : > { %v3365_v53 = vpop.f32.mrf.mxu3 }
 0x4df   : > { %v3366_v16 = vadd.f32 %v3365_v53, %v3277_v30  ;;  %v3278_v59 = vpop.f32.mrf.mxu2  ;;  %v8561_v30 = vld [vmem:[#allocation29_spill] sm:$0xff]  ;;  %v7646_v53 = vadd.f32 %v3593_v54, %v3361_v3  ;;  %v8563_v54 = vld [vmem:[#allocation10_spill] sm:$0xff] }
 0x4e0   : > { %v3189_v48 = vpop.f32.mrf.mxu1 }
 0x4e1   : > { %v3279_v24 = vadd.f32 %v3278_v59, %v3189_v48  ;;  %v3600_v35 = vpop.f32.mrf.mxu0  ;;  %v8562_v59 = vld [vmem:[#allocation28_spill] sm:$0xff] }
 0x4e4   : > { %3740 = vmatmul.bf16.gmra.mxu2 %v8559_v39 }
 0x4e6   : > { %v3367_v14 = vpop.f32.mrf.mxu3 }
 0x4e7   : > { %v3368_v31 = vadd.f32 %v3367_v14, %v3279_v24  ;;  %v3701_v63 = vpop.f32.mrf.mxu2 }
 0x4e8   : > { %v3612_v9 = vpop.f32.mrf.mxu1 }
 0x4e9   : > { %v3613_v23 = vadd.f32 %v3612_v9, %v7325_v18  ;;  %v4072_v47 = vpop.f32.mrf.mxu0  ;;  %v7657_v9 = vadd.f32 %v3595_v7, %v3363_v40  ;;  %v8564_v7 = vld [vmem:[#allocation33_spill] sm:$0xff] }
 0x4eb   : > { %v7642_v5 = vadd.f32 %v3701_v63, %v3613_v23  ;;  %3651 = vmatmul.bf16.gmra.mxu1 %v8554_v33  ;;  %4022 = vmatmul.bf16.gmra.mxu3 %v8561_v30 }
 0x4ec   : > { %4111 = vmatmul.bf16.gmra.mxu0 %v8562_v59 }
 0x4ed   : > { %8560 = vst [vmem:[#allocation38_spill] sm:$0xff] %v7642_v5 }
 0x4ee   : > { %v3983_v2 = vpop.f32.mrf.mxu3 }
 0x4ef   : > { %v7652_v48 = vadd.f32 %v4072_v47, %v3983_v2  ;;  %v3703_v18 = vpop.f32.mrf.mxu2 }
 0x4f0   : > { %v3614_v24 = vpop.f32.mrf.mxu1 }
 0x4f1   : > { %v3615_v14 = vadd.f32 %v3614_v24, %v7339_v13  ;;  %v4074_v63 = vpop.f32.mrf.mxu0  ;;  %v7667_v13 = vadd.f32 %v3598_v57, %v3366_v16 }
 0x4f3   : > { %v7655_v33 = vadd.f32 %v3703_v18, %v3615_v14 }
 0x4f4   : > { %3745 = vmatmul.bf16.gmra.mxu2 %v8563_v54 }
 0x4f6   : > { %v3985_v3 = vpop.f32.mrf.mxu3 }
 0x4f7   : > { %v7660_v23 = vadd.f32 %v4074_v63, %v3985_v3  ;;  %v3706_v30 = vpop.f32.mrf.mxu2 }
 0x4f8   : > { %v3617_v5 = vpop.f32.mrf.mxu1 }
 0x4f9   : > { %v3618_v15 = vadd.f32 %v3617_v5, %v7360_v29  ;;  %v4077_v47 = vpop.f32.mrf.mxu0  ;;  %v7675_v5 = vadd.f32 %v3600_v35, %v3368_v31 }
 0x4fb   : > { %v7663_v2 = vadd.f32 %v3706_v30, %v3618_v15  ;;  %3656 = vmatmul.bf16.gmra.mxu1 %v8558_v52  ;;  %4027 = vmatmul.bf16.gmra.mxu3 %v7313_v50  ;;  %v8565_v30 = vld [vmem:[#allocation13_spill] sm:$0xff] }
 0x4fc   : > { %4116 = vmatmul.bf16.gmra.mxu0 %v8564_v7 }
 0x4fe   : > { %v3988_v40 = vpop.f32.mrf.mxu3 }
 0x4ff   : > { %v7670_v18 = vadd.f32 %v4077_v47, %v3988_v40  ;;  %v3708_v24 = vpop.f32.mrf.mxu2 }
 0x500   : > { %v3619_v14 = vpop.f32.mrf.mxu1 }
 0x501   : > { %v3620_v63 = vadd.f32 %v3619_v14, %v7371_v55  ;;  %v4079_v3 = vpop.f32.mrf.mxu0  ;;  %v5496_v55 = vld [vmem:[%s8296_s2 + $0x208] sm:$0xff] }
 0x502   : > { %4158 = vmatpush.bf16.msra.mxu1 %v5496_v55 }
 0x503   : > { %v7673_v29 = vadd.f32 %v3708_v24, %v3620_v63 }
 0x504   : > { %3750 = vmatmul.bf16.gmra.mxu2 %v8565_v30 }
 0x506   : > { %v3990_v52 = vpop.f32.mrf.mxu3 }
 0x507   : > { %v7678_v50 = vadd.f32 %v4079_v3, %v3990_v52  ;;  %v3711_v57 = vpop.f32.mrf.mxu2 }
 0x508   : > { %v3622_v16 = vpop.f32.mrf.mxu1 }
 0x509   : > { %v3623_v15 = vadd.f32 %v3622_v16, %v7396_v61  ;;  %v4082_v47 = vpop.f32.mrf.mxu0 }
 0x50b   : > { %v7681_v40 = vadd.f32 %v3711_v57, %v3623_v15  ;;  %3661 = vmatmul.bf16.gmra.mxu1 %v8562_v59  ;;  %4032 = vmatmul.bf16.gmra.mxu3 %v7348_v28  ;;  %v8567_v59 = vld [vmem:[#allocation12_spill] sm:$0xff] }
 0x50c   : > { %4121 = vmatmul.bf16.gmra.mxu0 %v7319_v4 }
 0x50d   : > { %8566 = vst [vmem:[#allocation39_spill] sm:$0xff] %v7681_v40 }
 0x50e   : > { %v3993_v35 = vpop.f32.mrf.mxu3 }
 0x50f   : > { %v7689_v31 = vadd.f32 %v4082_v47, %v3993_v35  ;;  %v3713_v24 = vpop.f32.mrf.mxu2 }
 0x510   : > { %v3624_v14 = vpop.f32.mrf.mxu1 }
 0x511   : > { %v3625_v61 = vadd.f32 %v3624_v14, %v7430_v44  ;;  %v4084_v63 = vpop.f32.mrf.mxu0 }
 0x513   : > { %v7692_v3 = vadd.f32 %v3713_v24, %v3625_v61 }
 0x514   : > { %3755 = vmatmul.bf16.gmra.mxu2 %v8567_v59 }
 0x516   : > { %v3995_v28 = vpop.f32.mrf.mxu3 }
 0x517   : > { %v7695_v52 = vadd.f32 %v4084_v63, %v3995_v28  ;;  %v3716_v57 = vpop.f32.mrf.mxu2 }
 0x518   : > { %v3627_v16 = vpop.f32.mrf.mxu1 }
 0x519   : > { %v3628_v15 = vadd.f32 %v3627_v16, %v7469_v42  ;;  %v4087_v40 = vpop.f32.mrf.mxu0  ;;  %v8570_v42 = vld [vmem:[#allocation31_spill] sm:$0xff] }
 0x51b   : > { %v7698_v55 = vadd.f32 %v3716_v57, %v3628_v15  ;;  %3666 = vmatmul.bf16.gmra.mxu1 %v8564_v7  ;;  %4037 = vmatmul.bf16.gmra.mxu3 %v7386_v37 }
 0x51c   : > { %4126 = vmatmul.bf16.gmra.mxu0 %v7354_v0 }
 0x51d   : > { %8568 = vst [vmem:[#allocation3_spill] sm:$0xff] %v7698_v55 }
 0x51e   : > { %v3998_v44 = vpop.f32.mrf.mxu3 }
 0x51f   : > { %v7703_v47 = vadd.f32 %v4087_v40, %v3998_v44  ;;  %v3718_v35 = vpop.f32.mrf.mxu2  ;;  %v8573_v40 = vld [vmem:[#allocation34_spill] sm:$0xff] }
 0x520   : > { %v3629_v24 = vpop.f32.mrf.mxu1  ;;  %v5495_v44 = vld [vmem:[%s8296_s2 + $0x200] sm:$0xff] }
 0x521   : > { %v3630_v14 = vadd.f32 %v3629_v24, %v7500_v56  ;;  %v4089_v61 = vpop.f32.mrf.mxu0  ;;  %v8574_v56 = vld [vmem:[#allocation25_spill] sm:$0xff]  ;;  %4159 = vmatpush.bf16.msra.mxu1 %v5495_v44 }
 0x523   : > { %v7706_v63 = vadd.f32 %v3718_v35, %v3630_v14 }
 0x524   : > { %3760 = vmatmul.bf16.gmra.mxu2 %v8570_v42 }
 0x525   : > { %8569 = vst [vmem:[#allocation17_spill] sm:$0xff] %v7706_v63 }
 0x526   : > { %v4000_v28 = vpop.f32.mrf.mxu3 }
 0x527   : > { %v7709_v57 = vadd.f32 %v4089_v61, %v4000_v28  ;;  %v3721_v7 = vpop.f32.mrf.mxu2 }
 0x528   : > { %v3632_v16 = vpop.f32.mrf.mxu1 }
 0x529   : > { %8571 = vst [vmem:[#allocation16_spill] sm:$0xff] %v7709_v57  ;;  %v3633_v37 = vadd.f32 %v3632_v16, %v7529_v21  ;;  %v4092_v15 = vpop.f32.mrf.mxu0 }
 0x52b   : > { %v7712_v55 = vadd.f32 %v3721_v7, %v3633_v37  ;;  %3671 = vmatmul.bf16.gmra.mxu1 %v7319_v4  ;;  %4042 = vmatmul.bf16.gmra.mxu3 %v8573_v40  ;;  %v8576_v4 = vld [vmem:[#allocation32_spill] sm:$0xff] }
 0x52c   : > { %4131 = vmatmul.bf16.gmra.mxu0 %v8574_v56 }
 0x52d   : > { %8572 = vst [vmem:[#allocation5_spill] sm:$0xff] %v7712_v55 }
 0x52e   : > { %v4003_v35 = vpop.f32.mrf.mxu3 }
 0x52f   : > { %v7720_v24 = vadd.f32 %v4092_v15, %v4003_v35  ;;  %v3723_v14 = vpop.f32.mrf.mxu2 }
 0x530   : > { %v3634_v61 = vpop.f32.mrf.mxu1 }
 0x531   : > { %v3635_v21 = vadd.f32 %v3634_v61, %v7541_v27  ;;  %v4094_v28 = vpop.f32.mrf.mxu0  ;;  %v8579_v27 = vld [vmem:[#allocation8_spill] sm:$0xff] }
 0x533   : > { %v7723_v7 = vadd.f32 %v3723_v14, %v3635_v21 }
 0x534   : > { %3765 = vmatmul.bf16.gmra.mxu2 %v8576_v4 }
 0x535   : > { %8575 = vst [vmem:[#allocation20_spill] sm:$0xff] %v7723_v7 }
 0x536   : > { %v4005_v16 = vpop.f32.mrf.mxu3 }
 0x537   : > { %v7726_v37 = vadd.f32 %v4094_v28, %v4005_v16  ;;  %v3726_v40 = vpop.f32.mrf.mxu2 }
 0x538   : > { %v3637_v55 = vpop.f32.mrf.mxu1 }
 0x539   : > { %8577 = vst [vmem:[#allocation4_spill] sm:$0xff] %v7726_v37  ;;  %v3638_v63 = vadd.f32 %v3637_v55, %v7558_v49  ;;  %v4097_v57 = vpop.f32.mrf.mxu0  ;;  %v8580_v49 = vld [vmem:[#allocation35_spill] sm:$0xff] }
 0x53b   : > { %v7729_v44 = vadd.f32 %v3726_v40, %v3638_v63  ;;  %3676 = vmatmul.bf16.gmra.mxu1 %v7354_v0  ;;  %4047 = vmatmul.bf16.gmra.mxu3 %v7519_v58 }
 0x53c   : > { %4136 = vmatmul.bf16.gmra.mxu0 %v8579_v27 }
 0x53d   : > { %8578 = vst [vmem:[#allocation18_spill] sm:$0xff] %v7729_v44 }
 0x53e   : > { %v4008_v15 = vpop.f32.mrf.mxu3 }
 0x53f   : > { %v7734_v35 = vadd.f32 %v4097_v57, %v4008_v15  ;;  %v3728_v14 = vpop.f32.mrf.mxu2 }
 0x540   : > { %v3639_v61 = vpop.f32.mrf.mxu1 }
 0x541   : > { %v3640_v21 = vadd.f32 %v3639_v61, %v7562_v62  ;;  %v4099_v28 = vpop.f32.mrf.mxu0 }
 0x543   : > { %v7737_v16 = vadd.f32 %v3728_v14, %v3640_v21 }
 0x544   : > { %3770 = vmatmul.bf16.gmra.mxu2 %v8580_v49 }
 0x546   : > { %v4010_v55 = vpop.f32.mrf.mxu3 }
 0x547   : > { %v7740_v63 = vadd.f32 %v4099_v28, %v4010_v55  ;;  %v3731_v0 = vpop.f32.mrf.mxu2 }
 0x548   : > { %v3642_v40 = vpop.f32.mrf.mxu1 }
 0x549   : > { %v3643_v44 = vadd.f32 %v3642_v40, %v7567_v8  ;;  %v4102_v7 = vpop.f32.mrf.mxu0  ;;  %v8581_v8 = vld [vmem:[#allocation36_spill] sm:$0xff] }
 0x54b   : > { %v7743_v37 = vadd.f32 %v3731_v0, %v3643_v44  ;;  %3681 = vmatmul.bf16.gmra.mxu1 %v8574_v56  ;;  %4052 = vmatmul.bf16.gmra.mxu3 %v7548_v6 }
 0x54c   : > { %4141 = vmatmul.bf16.gmra.mxu0 %v7141_v32 }
 0x54e   : > { %v4013_v62 = vpop.f32.mrf.mxu3 }
 0x54f   : > { %v7748_v57 = vadd.f32 %v4102_v7, %v4013_v62  ;;  %v3733_v15 = vpop.f32.mrf.mxu2 }
 0x550   : > { %v3644_v14 = vpop.f32.mrf.mxu1 }
 0x551   : > { %v3645_v61 = vadd.f32 %v3644_v14, %v7573_v22  ;;  %v4104_v21 = vpop.f32.mrf.mxu0 }
 0x553   : > { %v7751_v28 = vadd.f32 %v3733_v15, %v3645_v61 }
 0x554   : > { %3775 = vmatmul.bf16.gmra.mxu2 %v8581_v8 }
 0x556   : > { %v4015_v44 = vpop.f32.mrf.mxu3 }
 0x557   : > { %v7754_v55 = vadd.f32 %v4104_v21, %v4015_v44  ;;  %v3736_v56 = vpop.f32.mrf.mxu2 }
 0x558   : > { %v3647_v0 = vpop.f32.mrf.mxu1 }
 0x559   : > { %v3648_v6 = vadd.f32 %v3647_v0, %v7578_v45  ;;  %v4107_v32 = vpop.f32.mrf.mxu0 }
 0x55b   : > { %v7757_v40 = vadd.f32 %v3736_v56, %v3648_v6  ;;  %3686 = vmatmul.bf16.gmra.mxu1 %v8579_v27  ;;  %4057 = vmatmul.bf16.gmra.mxu3 %v7519_v58 }
 0x55c   : > { %4146 = vmatmul.bf16.gmra.mxu0 %v8579_v27 }
 0x55d   : > { %8582 = vst [vmem:[#allocation19_spill] sm:$0xff] %v7757_v40 }
 0x55e   : > { %v4018_v22 = vpop.f32.mrf.mxu3 }
 0x55f   : > { %v7762_v7 = vadd.f32 %v4107_v32, %v4018_v22  ;;  %v3738_v62 = vpop.f32.mrf.mxu2 }
 0x560   : > { %v3649_v15 = vpop.f32.mrf.mxu1 }
 0x561   : > { %v3650_v14 = vadd.f32 %v3649_v15, %v7581_v41  ;;  %v4109_v61 = vpop.f32.mrf.mxu0 }
 0x563   : > { %v7765_v21 = vadd.f32 %v3738_v62, %v3650_v14 }
 0x565   : > { %8583 = vst [vmem:[#allocation6_spill] sm:$0xff] %v7765_v21 }
 0x566   : > { %v4020_v45 = vpop.f32.mrf.mxu3 }
 0x567   : > { %v7767_v44 = vadd.f32 %v4109_v61, %v4020_v45  ;;  %v3741_v56 = vpop.f32.mrf.mxu2 }
 0x568   : > { %v3652_v0 = vpop.f32.mrf.mxu1 }
 0x569   : > { %v3653_v6 = vadd.f32 %v3652_v0, %v7586_v34  ;;  %v4112_v58 = vpop.f32.mrf.mxu0 }
 0x56b   : > { %v7770_v40 = vadd.f32 %v3741_v56, %v3653_v6  ;;  %4160 = vmatmul.bf16.vlgmr.msra.gmra.mxu1 %v7058_v26 }
 0x56e   : > { %v4023_v27 = vpop.f32.mrf.mxu3 }
 0x56f   : > { %v7773_v32 = vadd.f32 %v4112_v58, %v4023_v27  ;;  %v3743_v22 = vpop.f32.mrf.mxu2 }
 0x570   : > { %v3654_v41 = vpop.f32.mrf.mxu1 }
 0x571   : > { %v3655_v62 = vadd.f32 %v3654_v41, %v7592_v46  ;;  %v4114_v15 = vpop.f32.mrf.mxu0 }
 0x573   : > { %v7776_v14 = vadd.f32 %v3743_v22, %v3655_v62 }
 0x575   : > { %8584 = vst [vmem:[#allocation21_spill] sm:$0xff] %v7776_v14 }
 0x576   : > { %v4025_v61 = vpop.f32.mrf.mxu3 }
 0x577   : > { %v7778_v45 = vadd.f32 %v4114_v15, %v4025_v61  ;;  %v3746_v21 = vpop.f32.mrf.mxu2 }
 0x578   : > { %v3657_v34 = vpop.f32.mrf.mxu1 }
 0x579   : > { %v3658_v56 = vadd.f32 %v3657_v34, %v7597_v1  ;;  %v4117_v0 = vpop.f32.mrf.mxu0 }
 0x57b   : > { %v7781_v6 = vadd.f32 %v3746_v21, %v3658_v56  ;;  %4165 = vmatmul.bf16.gmra.mxu1 %v7091_v20 }
 0x57e   : > { %v4028_v26 = vpop.f32.mrf.mxu3 }
 0x57f   : > { %v7784_v58 = vadd.f32 %v4117_v0, %v4028_v26  ;;  %v3748_v27 = vpop.f32.mrf.mxu2 }
 0x580   : > { %v3659_v46 = vpop.f32.mrf.mxu1 }
 0x581   : > { %v3660_v22 = vadd.f32 %v3659_v46, %v7600_v43  ;;  %v4119_v62 = vpop.f32.mrf.mxu0 }
 0x583   : > { %v7787_v41 = vadd.f32 %v3748_v27, %v3660_v22 }
 0x586   : > { %v4030_v15 = vpop.f32.mrf.mxu3 }
 0x587   : > { %v7789_v61 = vadd.f32 %v4119_v62, %v4030_v15  ;;  %v3751_v21 = vpop.f32.mrf.mxu2  ;;  %v8585_v15 = vld [vmem:[#allocation37_spill] sm:$0xff] }
 0x588   : > { %v3662_v14 = vpop.f32.mrf.mxu1 }
 0x589   : > { %v3663_v1 = vadd.f32 %v3662_v14, %v7605_v12  ;;  %v4122_v20 = vpop.f32.mrf.mxu0 }
 0x58b   : > { %v7792_v34 = vadd.f32 %v3751_v21, %v3663_v1  ;;  %4170 = vmatmul.bf16.gmra.mxu1 %v7130_v25  ;;  %v8586_v21 = vld [vmem:[#allocation24_spill] sm:$0xff] }
 0x58e   : > { %v4033_v56 = vpop.f32.mrf.mxu3 }
 0x58f   : > { %v7795_v0 = vadd.f32 %v4122_v20, %v4033_v56 }
 0x590   : > { %v3664_v26 = vpop.f32.mrf.mxu1 }
 0x591   : > { %v7798_v43 = vadd.f32 %v3664_v26, %v7611_v51 }
 0x598   : > { %v3667_v27 = vpop.f32.mrf.mxu1 }
 0x599   : > { %v7801_v46 = vadd.f32 %v3667_v27, %v7616_v11 }
 0x59b   : > { %4175 = vmatmul.bf16.gmra.mxu1 %v7158_v10 }
 0x5a0   : > { %v3669_v12 = vpop.f32.mrf.mxu1 }
 0x5a1   : > { %v7805_v14 = vadd.f32 %v3669_v12, %v7619_v17 }
 0x5a8   : > { %v3672_v22 = vpop.f32.mrf.mxu1 }
 0x5a9   : > { %v7808_v25 = vadd.f32 %v3672_v22, %v7624_v60  ;;  %v8587_v22 = vld [vmem:[#allocation38_spill] sm:$0xff] }
 0x5ab   : > { %4180 = vmatmul.bf16.gmra.mxu1 %v8552_v38 }
 0x5b0   : > { %v3674_v62 = vpop.f32.mrf.mxu1 }
 0x5b1   : > { %v7812_v51 = vadd.f32 %v3674_v62, %v8585_v15 }
 0x5b8   : > { %v3677_v1 = vpop.f32.mrf.mxu1 }
 0x5b9   : > { %v7815_v11 = vadd.f32 %v3677_v1, %v7635_v19 }
 0x5bb   : > { %4185 = vmatmul.bf16.gmra.mxu1 %v8586_v21 }
 0x5c0   : > { %v3679_v10 = vpop.f32.mrf.mxu1 }
 0x5c1   : > { %v7819_v17 = vadd.f32 %v3679_v10, %v7638_v36  ;;  %v8588_v10 = vld [vmem:[#allocation39_spill] sm:$0xff] }
 0x5c8   : > { %v3682_v20 = vpop.f32.mrf.mxu1 }
 0x5c9   : > { %v7822_v60 = vadd.f32 %v3682_v20, %v7646_v53 }
 0x5cb   : > { %4190 = vmatmul.bf16.gmra.mxu1 %v8559_v39 }
 0x5d0   : > { %v3684_v38 = vpop.f32.mrf.mxu1 }
 0x5d1   : > { %v7826_v56 = vadd.f32 %v3684_v38, %v7657_v9  ;;  %v8589_v38 = vld [vmem:[#allocation3_spill] sm:$0xff] }
 0x5d8   : > { %v3687_v26 = vpop.f32.mrf.mxu1 }
 0x5d9   : > { %v7829_v19 = vadd.f32 %v3687_v26, %v7667_v13  ;;  %v8590_v26 = vld [vmem:[#allocation16_spill] sm:$0xff] }
 0x5db   : > { %4195 = vmatmul.bf16.gmra.mxu1 %v8563_v54 }
 0x5e0   : > { %v3689_v27 = vpop.f32.mrf.mxu1 }
 0x5e1   : > { %v7833_v36 = vadd.f32 %v3689_v27, %v7675_v5 }
 0x5e8   : > { %v4161_v12 = vpop.f32.mrf.mxu1 }
 0x5e9   : > { %v4162_v53 = vadd.f32 %v4161_v12, %v7652_v48  ;;  %v8591_v12 = vld [vmem:[#allocation17_spill] sm:$0xff] }
 0x5eb   : > { %v7837_v62 = vadd.f32 %v4162_v53, %v8587_v22  ;;  %4200 = vmatmul.bf16.gmra.mxu1 %v8565_v30  ;;  %v8592_v22 = vld [vmem:[#allocation5_spill] sm:$0xff] }
 0x5f0   : > { %v4163_v39 = vpop.f32.mrf.mxu1 }
 0x5f1   : > { %v4164_v9 = vadd.f32 %v4163_v39, %v7660_v23  ;;  %v8593_v39 = vld [vmem:[#allocation4_spill] sm:$0xff] }
 0x5f3   : > { %v7842_v13 = vadd.f32 %v4164_v9, %v7655_v33 }
 0x5f8   : > { %v4166_v15 = vpop.f32.mrf.mxu1 }
 0x5f9   : > { %v4167_v54 = vadd.f32 %v4166_v15, %v7670_v18  ;;  %v8594_v15 = vld [vmem:[#allocation20_spill] sm:$0xff] }
 0x5fb   : > { %v7846_v5 = vadd.f32 %v4167_v54, %v7663_v2  ;;  %4205 = vmatmul.bf16.gmra.mxu1 %v8567_v59 }
 0x600   : > { %v4168_v48 = vpop.f32.mrf.mxu1 }
 0x601   : > { %v4169_v1 = vadd.f32 %v4168_v48, %v7678_v50 }
 0x603   : > { %v7851_v21 = vadd.f32 %v4169_v1, %v7673_v29  ;;  %v8595_v1 = vld [vmem:[#allocation18_spill] sm:$0xff] }
 0x608   : > { %v4171_v30 = vpop.f32.mrf.mxu1 }
 0x609   : > { %v4172_v23 = vadd.f32 %v4171_v30, %v7689_v31 }
 0x60b   : > { %v7855_v33 = vadd.f32 %v4172_v23, %v8588_v10  ;;  %4210 = vmatmul.bf16.gmra.mxu1 %v8570_v42 }
 0x610   : > { %v4173_v18 = vpop.f32.mrf.mxu1 }
 0x611   : > { %v4174_v2 = vadd.f32 %v4173_v18, %v7695_v52 }
 0x613   : > { %v7860_v20 = vadd.f32 %v4174_v2, %v7692_v3 }
 0x618   : > { %v4176_v59 = vpop.f32.mrf.mxu1 }
 0x619   : > { %v4177_v50 = vadd.f32 %v4176_v59, %v7703_v47  ;;  %v8599_v59 = vld [vmem:[#allocation14_spill] sm:$0xff] }
 0x61b   : > { %v7864_v29 = vadd.f32 %v4177_v50, %v8589_v38  ;;  %4215 = vmatmul.bf16.gmra.mxu1 %v8576_v4 }
 0x620   : > { %v4178_v31 = vpop.f32.mrf.mxu1 }
 0x621   : > { %v4179_v27 = vadd.f32 %v4178_v31, %v8590_v26  ;;  %v8600_v26 = vld [vmem:[#allocation19_spill] sm:$0xff] }
 0x623   : > { %v7869_v53 = vadd.f32 %v4179_v27, %v8591_v12  ;;  %v8602_v27 = vld [vmem:[#allocation6_spill] sm:$0xff] }
 0x628   : > { %v4181_v42 = vpop.f32.mrf.mxu1 }
 0x629   : > { %v4182_v52 = vadd.f32 %v4181_v42, %v7720_v24 }
 0x62b   : > { %v7873_v3 = vadd.f32 %v4182_v52, %v8592_v22  ;;  %4220 = vmatmul.bf16.gmra.mxu1 %v8580_v49  ;;  %v8603_v22 = vld [vmem:[#allocation21_spill] sm:$0xff] }
 0x630   : > { %v4183_v47 = vpop.f32.mrf.mxu1 }
 0x631   : > { %v4184_v9 = vadd.f32 %v4183_v47, %v8593_v39  ;;  %v7915_v39 = vpop.f32.mrf.mxu3 }
 0x633   : > { %v7878_v54 = vadd.f32 %v4184_v9, %v8594_v15  ;;  %v7918_v9 = vpop.f32.mrf.mxu0 }
 0x638   : > { %v4186_v4 = vpop.f32.mrf.mxu1 }
 0x639   : > { %v4187_v48 = vadd.f32 %v4186_v4, %v7734_v35 }
 0x63b   : > { %v7882_v30 = vadd.f32 %v4187_v48, %v8595_v1  ;;  %4225 = vmatmul.bf16.gmra.mxu1 %v8581_v8  ;;  %v7926_v48 = vpop.f32.mrf.mxu3  ;;  %v7931_v1 = vpop.f32.mrf.mxu0 }
 0x63d   : > { %8596 = vst [vmem:[#allocation22_spill] sm:$0xff] %v7882_v30 }
 0x640   : > { %v4188_v24 = vpop.f32.mrf.mxu1 }
 0x641   : > { %v4189_v23 = vadd.f32 %v4188_v24, %v7740_v63 }
 0x643   : > { %v7887_v10 = vadd.f32 %v4189_v23, %v7737_v16 }
 0x645   : > { %8597 = vst [vmem:[#allocation2_spill] sm:$0xff] %v7887_v10 }
 0x648   : > { %v4191_v49 = vpop.f32.mrf.mxu1 }
 0x649   : > { %v4192_v18 = vadd.f32 %v4191_v49, %v7748_v57  ;;  %v7939_v49 = vpop.f32.mrf.mxu3 }
 0x64b   : > { %v7891_v2 = vadd.f32 %v4192_v18, %v7743_v37  ;;  %4230 = vmatmul.bf16.gmra.mxu1 %v8599_v59  ;;  %v7941_v18 = vpop.f32.mrf.mxu0 }
 0x64d   : > { %8598 = vst [vmem:[#allocation15_spill] sm:$0xff] %v7891_v2 }
 0x650   : > { %v4193_v35 = vpop.f32.mrf.mxu1 }
 0x651   : > { %v4194_v50 = vadd.f32 %v4193_v35, %v7754_v55  ;;  %v4313_v35 = vmul.f32 %v7846_v5, %v7846_v5 }
 0x653   : > { %v7896_v38 = vadd.f32 %v4194_v50, %v7751_v28 }
 0x658   : > { %v4196_v31 = vpop.f32.mrf.mxu1 }
 0x659   : > { %v4197_v63 = vadd.f32 %v4196_v31, %v7762_v7  ;;  %v4314_v31 = vmul.f32 %v7851_v21, %v7851_v21 }
 0x65b   : > { %v7900_v16 = vadd.f32 %v4197_v63, %v8600_v26  ;;  %4235 = vmatmul.bf16.gmra.mxu1 %v8581_v8 }
 0x65d   : > { %8601 = vst [vmem:[#allocation23_spill] sm:$0xff] %v7900_v16 }
 0x660   : > { %v4198_v57 = vpop.f32.mrf.mxu1 }
 0x661   : > { %v4199_v37 = vadd.f32 %v4198_v57, %v7767_v44  ;;  %v4315_v57 = vmul.f32 %v7855_v33, %v7855_v33 }
 0x663   : > { %v7905_v12 = vadd.f32 %v4199_v37, %v8602_v27  ;;  %v7959_v27 = vpop.f32.mrf.mxu3 }
 0x668   : > { %v4201_v42 = vpop.f32.mrf.mxu1 }
 0x669   : > { %v4202_v55 = vadd.f32 %v4201_v42, %v7773_v32  ;;  %v7923_v32 = vpop.f32.mrf.mxu2 }
 0x66b   : > { %v7909_v28 = vadd.f32 %v4202_v55, %v7770_v40  ;;  %v4316_v55 = vmul.f32 %v7860_v20, %v7860_v20 }
 0x670   : > { %v4203_v52 = vpop.f32.mrf.mxu1 }
 0x671   : > { %v4204_v7 = vadd.f32 %v4203_v52, %v7778_v45  ;;  %v7933_v24 = vpop.f32.mrf.mxu2 }
 0x673   : > { %v7913_v47 = vadd.f32 %v4204_v7, %v8603_v22  ;;  %v4132_v7 = vpop.f32.mrf.mxu0 }
 0x678   : > { %v4206_v8 = vpop.f32.mrf.mxu1 }
 0x679   : > { %v4207_v44 = vadd.f32 %v4206_v8, %v7784_v58  ;;  %v7945_v59 = vpop.f32.mrf.mxu2  ;;  %v4317_v8 = vmul.f32 %v7864_v29, %v7864_v29 }
 0x67b   : > { %v7921_v15 = vadd.f32 %v4207_v44, %v7781_v6 }
 0x680   : > { %v4208_v40 = vpop.f32.mrf.mxu1 }
 0x681   : > { %v4209_v4 = vadd.f32 %v4208_v40, %v7789_v61  ;;  %v4312_v61 = vmul.f32 %v7842_v13, %v7842_v13 }
 0x683   : > { %v7929_v45 = vadd.f32 %v4209_v4, %v7787_v41  ;;  %v4311_v41 = vmul.f32 %v7837_v62, %v7837_v62  ;;  %v7967_v4 = vpop.f32.mrf.mxu2 }
 0x688   : > { %v4211_v58 = vpop.f32.mrf.mxu1 }
 0x689   : > { %v4212_v23 = vadd.f32 %v4211_v58, %v7795_v0  ;;  %v4343_v0 = vadd.f32 %v4312_v61, %v4311_v41 }
 0x68b   : > { %v7937_v6 = vadd.f32 %v4212_v23, %v7792_v34  ;;  %v4273_v34 = vadd.f32 %v7842_v13, %v7837_v62  ;;  %v4344_v26 = vadd.f32 %v4343_v0, %v4313_v35  ;;  %v4318_v23 = vmul.f32 %v7869_v53, %v7869_v53 }
 0x68c   : > { %v4319_v35 = vmul.f32 %v7873_v3, %v7873_v3 }
 0x68d   : > { %v4274_v63 = vadd.f32 %v4273_v34, %v7846_v5  ;;  %v4345_v42 = vadd.f32 %v4344_v26, %v4314_v31  ;;  %v4320_v31 = vmul.f32 %v7878_v54, %v7878_v54  ;;  %v4045_v26 = vpop.f32.mrf.mxu3 }
 0x68f   : > { %v4275_v37 = vadd.f32 %v4274_v63, %v7851_v21  ;;  %v4346_v22 = vadd.f32 %v4345_v42, %v4315_v57 }
 0x690   : > { %v4213_v50 = vpop.f32.mrf.mxu1 }
 0x691   : > { %v4276_v52 = vadd.f32 %v4275_v37, %v7855_v33  ;;  %v4347_v58 = vadd.f32 %v4346_v22, %v4316_v55  ;;  %v4321_v37 = vmul.f32 %v7882_v30, %v7882_v30 }
 0x693   : > { %v4277_v40 = vadd.f32 %v4276_v52, %v7860_v20  ;;  %v4348_v41 = vadd.f32 %v4347_v58, %v4317_v8  ;;  %v4134_v52 = vpop.f32.mrf.mxu0  ;;  %v4322_v8 = vmul.f32 %v7887_v10, %v7887_v10  ;;  %v3763_v58 = vpop.f32.mrf.mxu2 }
 0x695   : > { %v4278_v61 = vadd.f32 %v4277_v40, %v7864_v29  ;;  %v4349_v0 = vadd.f32 %v4348_v41, %v4318_v23 }
 0x697   : > { %v4279_v34 = vadd.f32 %v4278_v61, %v7869_v53  ;;  %v4350_v57 = vadd.f32 %v4349_v0, %v4319_v35  ;;  %v4323_v61 = vmul.f32 %v7891_v2, %v7891_v2 }
 0x698   : > { %v4216_v44 = vpop.f32.mrf.mxu1 }
 0x699   : > { %v4280_v63 = vadd.f32 %v4279_v34, %v7873_v3  ;;  %v4351_v22 = vadd.f32 %v4350_v57, %v4320_v31  ;;  %v4324_v34 = vmul.f32 %v7896_v38, %v7896_v38  ;;  %v4325_v31 = vmul.f32 %v7900_v16, %v7900_v16 }
 0x69b   : > { %v4281_v55 = vadd.f32 %v4280_v63, %v7878_v54  ;;  %v4352_v23 = vadd.f32 %v4351_v22, %v4321_v37  ;;  %v4326_v22 = vmul.f32 %v7905_v12, %v7905_v12 }
 0x69d   : > { %v4282_v40 = vadd.f32 %v4281_v55, %v7882_v30  ;;  %v4353_v35 = vadd.f32 %v4352_v23, %v4322_v8  ;;  %v4048_v30 = vpop.f32.mrf.mxu3  ;;  %v4137_v8 = vpop.f32.mrf.mxu0 }
 0x69f   : > { %v4283_v41 = vadd.f32 %v4282_v40, %v7887_v10  ;;  %v4354_v63 = vadd.f32 %v4353_v35, %v4323_v61  ;;  %v4327_v10 = vmul.f32 %v7909_v28, %v7909_v28  ;;  %v4125_v61 = vadd.f32 %v7918_v9, %v7915_v39  ;;  %v3766_v35 = vpop.f32.mrf.mxu2 }
 0x6a0   : > { %v4218_v42 = vpop.f32.mrf.mxu1  ;;  %v3754_v39 = vadd.f32 %v7923_v32, %v7798_v43  ;;  %v4130_v9 = vadd.f32 %v7941_v18, %v7939_v49  ;;  %v3759_v32 = vadd.f32 %v7945_v59, %v7805_v14 }
 0x6a1   : > { %v4284_v0 = vadd.f32 %v4283_v41, %v7891_v2  ;;  %v4355_v37 = vadd.f32 %v4354_v63, %v4324_v34  ;;  %v4328_v34 = vmul.f32 %v7913_v47, %v7913_v47 }
 0x6a2   : > { %v4219_v43 = vadd.f32 %v4218_v42, %v4130_v9 }
 0x6a3   : > { %v4285_v55 = vadd.f32 %v4284_v0, %v7896_v38  ;;  %v4356_v23 = vadd.f32 %v4355_v37, %v4325_v31  ;;  %v4128_v0 = vadd.f32 %v7931_v1, %v7926_v48  ;;  %v4329_v37 = vmul.f32 %v7921_v15, %v7921_v15 }
 0x6a4   : > { %v3757_v48 = vadd.f32 %v7933_v24, %v7801_v46  ;;  %v4135_v46 = vadd.f32 %v4134_v52, %v4045_v26  ;;  %v8033_v59 = vadd.f32 %v4219_v43, %v3759_v32  ;;  %v3764_v26 = vadd.f32 %v3763_v58, %v7812_v51 }
 0x6a5   : > { %v4286_v40 = vadd.f32 %v4285_v55, %v7900_v16  ;;  %v4357_v2 = vadd.f32 %v4356_v23, %v4326_v22  ;;  %v4214_v55 = vadd.f32 %v4213_v50, %v4125_v61  ;;  %v4050_v49 = vpop.f32.mrf.mxu3 }
 0x6a7   : > { %v4287_v41 = vadd.f32 %v4286_v40, %v7905_v12  ;;  %v4358_v31 = vadd.f32 %v4357_v2, %v4327_v10  ;;  %v4217_v40 = vadd.f32 %v4216_v44, %v4128_v0  ;;  %v4330_v10 = vmul.f32 %v7929_v45, %v7929_v45  ;;  %v3768_v52 = vpop.f32.mrf.mxu2 }
 0x6a8   : > { %v4221_v57 = vpop.f32.mrf.mxu1  ;;  %v4133_v2 = vadd.f32 %v4132_v7, %v7959_v27  ;;  %v8019_v23 = vadd.f32 %v4214_v55, %v3754_v39  ;;  %v4331_v44 = vmul.f32 %v7937_v6, %v7937_v6  ;;  %v3762_v27 = vadd.f32 %v7967_v4, %v7808_v25 }
 0x6a9   : > { %v4288_v63 = vadd.f32 %v4287_v41, %v7909_v28  ;;  %v4359_v1 = vadd.f32 %v4358_v31, %v4328_v34  ;;  %v8026_v61 = vadd.f32 %v4217_v40, %v3757_v48  ;;  %v4138_v7 = vadd.f32 %v4137_v8, %v4048_v30  ;;  %v4139_v34 = vpop.f32.mrf.mxu0 }
 0x6aa   : > { %v4222_v41 = vadd.f32 %v4221_v57, %v4133_v2  ;;  %v4332_v14 = vmul.f32 %v8019_v23, %v8019_v23  ;;  %v3767_v8 = vadd.f32 %v3766_v35, %v7815_v11  ;;  %v3769_v2 = vadd.f32 %v3768_v52, %v7819_v17 }
 0x6ab   : > { %v4289_v22 = vadd.f32 %v4288_v63, %v7913_v47  ;;  %v4360_v18 = vadd.f32 %v4359_v1, %v4329_v37  ;;  %v4333_v25 = vmul.f32 %v8026_v61, %v8026_v61  ;;  %v4140_v1 = vadd.f32 %v4139_v34, %v4050_v49 }
 0x6ac   : > { %v8039_v30 = vadd.f32 %v4222_v41, %v3762_v27 }
 0x6ad   : > { %v4290_v50 = vadd.f32 %v4289_v22, %v7921_v15  ;;  %v4361_v42 = vadd.f32 %v4360_v18, %v4330_v10  ;;  %v4053_v48 = vpop.f32.mrf.mxu3 }
 0x6ae   : > { %v4335_v22 = vmul.f32 %v8039_v30, %v8039_v30 }
 0x6af   : > { %v4291_v24 = vadd.f32 %v4290_v50, %v7929_v45  ;;  %v4362_v55 = vadd.f32 %v4361_v42, %v4331_v44 }
 0x6b0   : > { %v4223_v16 = vpop.f32.mrf.mxu1 }
 0x6b1   : > { %v4292_v0 = vadd.f32 %v4291_v24, %v7937_v6  ;;  %v4224_v63 = vadd.f32 %v4223_v16, %v4135_v46  ;;  %v4363_v37 = vadd.f32 %v4362_v55, %v4332_v14  ;;  %v4334_v16 = vmul.f32 %v8033_v59, %v8033_v59  ;;  %v4142_v50 = vpop.f32.mrf.mxu0  ;;  %v3771_v24 = vpop.f32.mrf.mxu2 }
 0x6b2   : > { %v4143_v42 = vadd.f32 %v4142_v50, %v4053_v48 }
 0x6b3   : > { %v4293_v57 = vadd.f32 %v4292_v0, %v8019_v23  ;;  %v8045_v51 = vadd.f32 %v4224_v63, %v3764_v26  ;;  %v4364_v58 = vadd.f32 %v4363_v37, %v4333_v25  ;;  %v3772_v26 = vadd.f32 %v3771_v24, %v7822_v60 }
 0x6b5   : > { %v4294_v39 = vadd.f32 %v4293_v57, %v8026_v61  ;;  %v4365_v10 = vadd.f32 %v4364_v58, %v4334_v16  ;;  %v4336_v35 = vmul.f32 %v8045_v51, %v8045_v51  ;;  %v4055_v14 = vpop.f32.mrf.mxu3 }
 0x6b7   : > { %v4295_v9 = vadd.f32 %v4294_v39, %v8033_v59  ;;  %v4366_v32 = vadd.f32 %v4365_v10, %v4335_v22 }
 0x6b8   : > { %v4226_v31 = vpop.f32.mrf.mxu1 }
 0x6b9   : > { %v4227_v4 = vadd.f32 %v4226_v31, %v4138_v7  ;;  %v4296_v11 = vadd.f32 %v4295_v9, %v8039_v30  ;;  %v4367_v41 = vadd.f32 %v4366_v32, %v4336_v35  ;;  %v4144_v55 = vpop.f32.mrf.mxu0  ;;  %v3773_v57 = vpop.f32.mrf.mxu2 }
 0x6ba   : > { %v3774_v16 = vadd.f32 %v3773_v57, %v7826_v56 }
 0x6bb   : > { %v8050_v40 = vadd.f32 %v4227_v4, %v3767_v8  ;;  %v4297_v18 = vadd.f32 %v4296_v11, %v8045_v51  ;;  %v4145_v8 = vadd.f32 %v4144_v55, %v4055_v14 }
 0x6bd   : > { %v4337_v44 = vmul.f32 %v8050_v40, %v8050_v40  ;;  %v4298_v49 = vadd.f32 %v4297_v18, %v8050_v40  ;;  %v4058_v9 = vpop.f32.mrf.mxu3 }
 0x6bf   : > { %v4368_v7 = vadd.f32 %v4367_v41, %v4337_v44 }
 0x6c0   : > { %v4228_v43 = vpop.f32.mrf.mxu1 }
 0x6c1   : > { %v4229_v46 = vadd.f32 %v4228_v43, %v4140_v1  ;;  %v4147_v60 = vpop.f32.mrf.mxu0  ;;  %v3776_v10 = vpop.f32.mrf.mxu2 }
 0x6c2   : > { %v4148_v11 = vadd.f32 %v4147_v60, %v4058_v9  ;;  %v3777_v50 = vadd.f32 %v3776_v10, %v7829_v19 }
 0x6c3   : > { %v8060_v27 = vadd.f32 %v4229_v46, %v3769_v2 }
 0x6c5   : > { %v4299_v34 = vadd.f32 %v4298_v49, %v8060_v27  ;;  %v4338_v17 = vmul.f32 %v8060_v27, %v8060_v27  ;;  %v4060_v56 = vpop.f32.mrf.mxu3 }
 0x6c7   : > { %v4369_v0 = vadd.f32 %v4368_v7, %v4338_v17 }
 0x6c8   : > { %v4231_v63 = vpop.f32.mrf.mxu1 }
 0x6c9   : > { %v4232_v52 = vadd.f32 %v4231_v63, %v4143_v42  ;;  %v4149_v46 = vpop.f32.mrf.mxu0  ;;  %v3778_v49 = vpop.f32.mrf.mxu2 }
 0x6ca   : > { %v4150_v24 = vadd.f32 %v4149_v46, %v4060_v56 }
 0x6cb   : > { %v8066_v31 = vadd.f32 %v4232_v52, %v3772_v26 }
 0x6cd   : > { %v4300_v25 = vadd.f32 %v4299_v34, %v8066_v31  ;;  %v4339_v4 = vmul.f32 %v8066_v31, %v8066_v31  ;;  %v3779_v34 = vadd.f32 %v3778_v49, %v7833_v36 }
 0x6cf   : > { %v4370_v37 = vadd.f32 %v4369_v0, %v4339_v4 }
 0x6d0   : > { %v4233_v39 = vpop.f32.mrf.mxu1 }
 0x6d1   : > { %v4234_v58 = vadd.f32 %v4233_v39, %v4145_v8 }
 0x6d3   : > { %v8072_v22 = vadd.f32 %v4234_v58, %v3774_v16 }
 0x6d5   : > { %v4301_v48 = vadd.f32 %v4300_v25, %v8072_v22  ;;  %v4340_v1 = vmul.f32 %v8072_v22, %v8072_v22 }
 0x6d7   : > { %v4371_v35 = vadd.f32 %v4370_v37, %v4340_v1 }
 0x6d8   : > { %v4236_v2 = vpop.f32.mrf.mxu1 }
 0x6d9   : > { %v4237_v43 = vadd.f32 %v4236_v2, %v4148_v11 }
 0x6db   : > { %v8078_v32 = vadd.f32 %v4237_v43, %v3777_v50 }
 0x6dd   : > { %v4302_v18 = vadd.f32 %v4301_v48, %v8078_v32  ;;  %v4341_v44 = vmul.f32 %v8078_v32, %v8078_v32 }
 0x6df   : > { %v4372_v41 = vadd.f32 %v4371_v35, %v4341_v44 }
 0x6e0   : > { %v4238_v7 = vpop.f32.mrf.mxu1 }
 0x6e1   : > { %v4239_v17 = vadd.f32 %v4238_v7, %v4150_v24 }
 0x6e3   : > { %v8084_v42 = vadd.f32 %v4239_v17, %v3779_v34 }
 0x6e5   : > { %v4303_v19 = vadd.f32 %v4302_v18, %v8084_v42  ;;  %v4342_v0 = vmul.f32 %v8084_v42, %v8084_v42 }
 0x6e7   : > { %v4304_v14 = vrot.slane %v4303_v19, 4  ;;  %v4373_v63 = vadd.f32 %v4372_v41, %v4342_v0 }
 0x6e9   : > { %v4305_v26 = vadd.f32 %v4304_v14, %v4303_v19  ;;  %v4374_v52 = vrot.slane %v4373_v63, 4 }
 0x6eb   : > { %v4306_v55 = vrot.slane %v4305_v26, 2  ;;  %v4375_v57 = vadd.f32 %v4374_v52, %v4373_v63  ;;  %v8607_v52 = vld [vmem:[#allocation23_spill] sm:$0xff] }
 0x6ed   : > { %v4307_v25 = vadd.f32 %v4306_v55, %v4305_v26  ;;  %v4376_v4 = vrot.slane %v4375_v57, 2 }
 0x6ef   : > { %v4308_v8 = vrot.slane %v4307_v25, 1  ;;  %v4377_v37 = vadd.f32 %v4376_v4, %v4375_v57 }
 0x6f1   : > { %v4309_v39 = vadd.f32 %v4308_v8, %v4307_v25  ;;  %v4378_v36 = vrot.slane %v4377_v37, 1 }
 0x6f3   : > { %v8089_v16 = vmul.f32 0.00390625, %v4309_v39  ;;  %v4379_v58 = vadd.f32 %v4378_v36, %v4377_v37 }
 0x6f5   : > { %v4380_v9 = vmul.f32 0.00390625, %v4379_v58  ;;  %v4381_v60 = vmul.f32 %v8089_v16, %v8089_v16  ;;  %v4410_v10 = vsub.f32 %v8050_v40, %v8089_v16  ;;  %v4411_v11 = vsub.f32 %v8060_v27, %v8089_v16 }
 0x6f6   : > { %v4412_v35 = vsub.f32 %v8066_v31, %v8089_v16  ;;  %v4413_v2 = vsub.f32 %v8072_v22, %v8089_v16  ;;  %v4414_v50 = vsub.f32 %v8078_v32, %v8089_v16  ;;  %v4415_v43 = vsub.f32 %v8084_v42, %v8089_v16  ;;  %v5534_v32 = vld [vmem:[%s5622_s27 + $0x18] sm:$0xff]  ;;  %v5536_v42 = vld [vmem:[%s5622_s27 + $0x28] sm:$0xff] }
 0x6f7   : > { %v4382_v48 = vsub.f32 %v4380_v9, %v4381_v60  ;;  %v4384_v24 = vsub.f32 %v7837_v62, %v8089_v16  ;;  %v4385_v41 = vsub.f32 %v7842_v13, %v8089_v16  ;;  %v4386_v49 = vsub.f32 %v7846_v5, %v8089_v16 }
 0x6f8   : > { %v4387_v7 = vsub.f32 %v7851_v21, %v8089_v16  ;;  %v4388_v34 = vsub.f32 %v7855_v33, %v8089_v16  ;;  %v4389_v17 = vsub.f32 %v7860_v20, %v8089_v16  ;;  %v4390_v19 = vsub.f32 %v7864_v29, %v8089_v16  ;;  %v8604_v21 = vld [vmem:[#allocation22_spill] sm:$0xff]  ;;  %v8606_v20 = vld [vmem:[#allocation15_spill] sm:$0xff] }
 0x6f9   : > { %v4383_v1 = vmax.f32 %v4382_v48, 0.0  ;;  %v4391_v62 = vsub.f32 %v7869_v53, %v8089_v16  ;;  %v4392_v13 = vsub.f32 %v7873_v3, %v8089_v16  ;;  %v4393_v5 = vsub.f32 %v7878_v54, %v8089_v16  ;;  %v8605_v33 = vld [vmem:[#allocation2_spill] sm:$0xff] }
 0x6fa   : > { %v4394_v14 = vsub.f32 %v8604_v21, %v8089_v16  ;;  %v4395_v63 = vsub.f32 %v8605_v33, %v8089_v16  ;;  %v4396_v26 = vsub.f32 %v8606_v20, %v8089_v16  ;;  %v4397_v53 = vsub.f32 %v7896_v38, %v8089_v16  ;;  %v5535_v33 = vld [vmem:[%s5622_s27 + $0x20] sm:$0xff] }
 0x6fb   : > { %v4416_v56 = vadd.f32 1e-05, %v4383_v1  ;;  %v4398_v3 = vsub.f32 %v8607_v52, %v8089_v16  ;;  %v4399_v54 = vsub.f32 %v7905_v12, %v8089_v16  ;;  %v4400_v55 = vsub.f32 %v7909_v28, %v8089_v16 }
 0x6fc   : > { %v4401_v57 = vsub.f32 %v7913_v47, %v8089_v16  ;;  %v4402_v25 = vsub.f32 %v7921_v15, %v8089_v16  ;;  %v4403_v38 = vsub.f32 %v7929_v45, %v8089_v16  ;;  %v4404_v8 = vsub.f32 %v7937_v6, %v8089_v16 }
 0x6fd   : > { %5529 = vrsqrt.f32 %v4416_v56  ;;  %vm4423_vm10 = vweird.f32 %v4416_v56  ;;  %v4405_v12 = vsub.f32 %v8019_v23, %v8089_v16  ;;  %v4406_v28 = vsub.f32 %v8026_v61, %v8089_v16 }
 0x6fe   : > { %v4407_v47 = vsub.f32 %v8033_v59, %v8089_v16  ;;  %v4408_v15 = vsub.f32 %v8039_v30, %v8089_v16  ;;  %v4409_v37 = vsub.f32 %v8045_v51, %v8089_v16 }
 0x703   : > { %v5530_v18 = vpop.eup %5529 }
 0x704   : > { %v4418_v44 = vmul.f32 %v5530_v18, %v4416_v56  ;;  %vm4424_vm9 = vweird.f32 %v5530_v18 }
 0x705   : > { %vm4425_vm11 = vmor %vm4423_vm10, %vm4424_vm9 }
 0x706   : > { %v4419_v46 = vmul.f32 %v5530_v18, %v4418_v44 }
 0x708   : > { %v4420_v0 = vmul.f32 0.5, %v4419_v46 }
 0x70a   : > { %v4421_v29 = vsub.f32 1.5, %v4420_v0 }
 0x70c   : > { %v4422_v4 = vmul.f32 %v5530_v18, %v4421_v29 }
 0x70e   : > { %v4426_v45 = vsel %vm4425_vm11, %v5530_v18, %v4422_v4 }
 0x70f   : > { %v4427_v39 = vmul.f32 %v4426_v45, %v4384_v24  ;;  %v4428_v36 = vmul.f32 %v4426_v45, %v4385_v41  ;;  %v4429_v6 = vmul.f32 %v4426_v45, %v4386_v49  ;;  %v4430_v58 = vmul.f32 %v4426_v45, %v4387_v7 }
 0x710   : > { %v4431_v9 = vmul.f32 %v4426_v45, %v4388_v34  ;;  %v4432_v23 = vmul.f32 %v4426_v45, %v4389_v17  ;;  %v4433_v60 = vmul.f32 %v4426_v45, %v4390_v19  ;;  %v4434_v48 = vmul.f32 %v4426_v45, %v4391_v62 }
 0x711   : > { %v4435_v61 = vmul.f32 %v4426_v45, %v4392_v13  ;;  %v4436_v1 = vmul.f32 %v4426_v45, %v4393_v5  ;;  %v4437_v56 = vmul.f32 %v4426_v45, %v4394_v14  ;;  %v4438_v44 = vmul.f32 %v4426_v45, %v4395_v63  ;;  %v5532_v5 = vld [vmem:[%s5622_s27 + $0x8] sm:$0xff] }
 0x712   : > { %v4439_v59 = vmul.f32 %v4426_v45, %v4396_v26  ;;  %v4440_v46 = vmul.f32 %v4426_v45, %v4397_v53  ;;  %v4441_v30 = vmul.f32 %v4426_v45, %v4398_v3  ;;  %v4442_v0 = vmul.f32 %v4426_v45, %v4399_v54  ;;  %v5538_v26 = vld [vmem:[%s5622_s27 + $0x38] sm:$0xff]  ;;  %v5539_v53 = vld [vmem:[%s5622_s27 + $0x40] sm:$0xff]  ;;  %v5540_v3 = vld [vmem:[%s5622_s27 + $0x48] sm:$0xff] }
 0x713   : > { %v4443_v21 = vmul.f32 %v4426_v45, %v4400_v55  ;;  %v8157_v51 = vmul.f32 %v4426_v45, %v4401_v57  ;;  %v8159_v18 = vmul.f32 %v4426_v45, %v4402_v25  ;;  %v8161_v24 = vmul.f32 %v4426_v45, %v4403_v38  ;;  %v5541_v55 = vld [vmem:[%s5622_s27 + $0x50] sm:$0xff]  ;;  %v5542_v25 = vld [vmem:[%s5622_s27 + $0x58] sm:$0xff]  ;;  %v5543_v38 = vld [vmem:[%s5622_s27 + $0x60] sm:$0xff] }
 0x714   : > { %v8163_v41 = vmul.f32 %v4426_v45, %v4404_v8  ;;  %v8165_v49 = vmul.f32 %v4426_v45, %v4405_v12  ;;  %v8167_v7 = vmul.f32 %v4426_v45, %v4406_v28  ;;  %v8169_v34 = vmul.f32 %v4426_v45, %v4407_v47  ;;  %v5544_v12 = vld [vmem:[%s5622_s27 + $0x68] sm:$0xff]  ;;  %v5545_v47 = vld [vmem:[%s5622_s27 + $0x70] sm:$0xff] }
 0x715   : > { %v8171_v17 = vmul.f32 %v4426_v45, %v4408_v15  ;;  %v8173_v19 = vmul.f32 %v4426_v45, %v4409_v37  ;;  %v8178_v62 = vmul.f32 %v4426_v45, %v4410_v10  ;;  %v8183_v13 = vmul.f32 %v4426_v45, %v4411_v11  ;;  %v5531_v11 = vld [vmem:[%s5622_s27] sm:$0xff]  ;;  %v5546_v37 = vld [vmem:[%s5622_s27 + $0x78] sm:$0xff] }
 0x716   : > { %v8195_v40 = vmul.f32 %v4426_v45, %v4412_v35  ;;  %v8200_v10 = vmul.f32 %v4426_v45, %v4413_v2  ;;  %v8205_v27 = vmul.f32 %v4426_v45, %v4414_v50  ;;  %v8210_v31 = vmul.f32 %v4426_v45, %v4415_v43  ;;  %v5533_v2 = vld [vmem:[%s5622_s27 + $0x10] sm:$0xff] }
 0x717   : > { %v4459_v35 = vadd.f32 %v5531_v11, %v4427_v39  ;;  %v4460_v22 = vadd.f32 %v5532_v5, %v4428_v36  ;;  %v4461_v14 = vadd.f32 %v5533_v2, %v4429_v6  ;;  %v4462_v50 = vadd.f32 %v5534_v32, %v4430_v58  ;;  %v5537_v43 = vld [vmem:[%s5622_s27 + $0x30] sm:$0xff]  ;;  %v5547_v39 = vld [vmem:[%s5622_s27 + $0x80] sm:$0xff]  ;;  %v5548_v6 = vld [vmem:[%s5622_s27 + $0x88] sm:$0xff] }
 0x718   : > { %v4463_v63 = vadd.f32 %v5535_v33, %v4431_v9  ;;  %v4464_v16 = vadd.f32 %v5536_v42, %v4432_v23  ;;  %v4465_v20 = vadd.f32 %v5537_v43, %v4433_v60  ;;  %v4466_v29 = vadd.f32 %v5538_v26, %v4434_v48  ;;  %v5549_v9 = vld [vmem:[%s5622_s27 + $0x90] sm:$0xff]  ;;  %v5550_v60 = vld [vmem:[%s5622_s27 + $0x98] sm:$0xff] }
 0x719   : > { %4491 = vst [vmem:[%s8190_s5] sm:$0xff] %v4459_v35  ;;  %v4467_v52 = vadd.f32 %v5539_v53, %v4435_v61  ;;  %v4468_v54 = vadd.f32 %v5540_v3, %v4436_v1  ;;  %v4469_v57 = vadd.f32 %v5541_v55, %v4437_v56  ;;  %v4470_v4 = vadd.f32 %v5542_v25, %v4438_v44  ;;  %v5551_v61 = vld [vmem:[%s5622_s27 + $0xa0] sm:$0xff]  ;;  %v5552_v56 = vld [vmem:[%s5622_s27 + $0xa8] sm:$0xff]  ;;  %v5561_v5 = vld [vmem:[%s5622_s27 + $0xf0] sm:$0xff] }
 0x71a   : > { %4492 = vst [vmem:[%s8190_s5 + $0x8] sm:$0xff] %v4460_v22  ;;  %v4471_v8 = vadd.f32 %v5543_v38, %v4439_v59  ;;  %v4472_v28 = vadd.f32 %v5544_v12, %v4440_v46  ;;  %v4473_v15 = vadd.f32 %v5545_v47, %v4441_v30  ;;  %v4474_v45 = vadd.f32 %v5546_v37, %v4442_v0  ;;  %v5553_v59 = vld [vmem:[%s5622_s27 + $0xb0] sm:$0xff]  ;;  %v5554_v30 = vld [vmem:[%s5622_s27 + $0xb8] sm:$0xff] }
 0x71b   : > { %4493 = vst [vmem:[%s8190_s5 + $0x10] sm:$0xff] %v4461_v14  ;;  %v4475_v36 = vadd.f32 %v5547_v39, %v4443_v21  ;;  %v4476_v58 = vadd.f32 %v5548_v6, %v8157_v51  ;;  %v4477_v23 = vadd.f32 %v5549_v9, %v8159_v18  ;;  %v4478_v48 = vadd.f32 %v5550_v60, %v8161_v24  ;;  %v5555_v21 = vld [vmem:[%s5622_s27 + $0xc0] sm:$0xff]  ;;  %v5556_v18 = vld [vmem:[%s5622_s27 + $0xc8] sm:$0xff]  ;;  %v5562_v22 = vld [vmem:[%s5622_s27 + $0xf8] sm:$0xff] }
 0x71c   : > { %4494 = vst [vmem:[%s8190_s5 + $0x18] sm:$0xff] %v4462_v50  ;;  %v4479_v1 = vadd.f32 %v5551_v61, %v8163_v41  ;;  %v4480_v44 = vadd.f32 %v5552_v56, %v8165_v49  ;;  %v4481_v46 = vadd.f32 %v5553_v59, %v8167_v7  ;;  %v4482_v0 = vadd.f32 %v5554_v30, %v8169_v34  ;;  %v5557_v41 = vld [vmem:[%s5622_s27 + $0xd0] sm:$0xff]  ;;  %v5558_v7 = vld [vmem:[%s5622_s27 + $0xd8] sm:$0xff] }
 0x71d   : > { %4495 = vst [vmem:[%s8190_s5 + $0x20] sm:$0xff] %v4463_v63  ;;  %v4483_v51 = vadd.f32 %v5555_v21, %v8171_v17  ;;  %v4484_v24 = vadd.f32 %v5556_v18, %v8173_v19  ;;  %v4485_v49 = vadd.f32 %v5557_v41, %v8178_v62  ;;  %v4486_v34 = vadd.f32 %v5558_v7, %v8183_v13  ;;  %v5559_v17 = vld [vmem:[%s5622_s27 + $0xe0] sm:$0xff]  ;;  %v5560_v19 = vld [vmem:[%s5622_s27 + $0xe8] sm:$0xff] }
 0x71e   : > { %4496 = vst [vmem:[%s8190_s5 + $0x28] sm:$0xff] %v4464_v16  ;;  %v4487_v11 = vadd.f32 %v5559_v17, %v8195_v40  ;;  %v4488_v35 = vadd.f32 %v5560_v19, %v8200_v10  ;;  %v4489_v62 = vadd.f32 %v5561_v5, %v8205_v27  ;;  %v4490_v2 = vadd.f32 %v5562_v22, %v8210_v31 }
 0x71f   : > { %4497 = vst [vmem:[%s8190_s5 + $0x30] sm:$0xff] %v4465_v20 }
 0x720   : > { %4498 = vst [vmem:[%s8190_s5 + $0x38] sm:$0xff] %v4466_v29 }
 0x721   : > { %4499 = vst [vmem:[%s8190_s5 + $0x40] sm:$0xff] %v4467_v52 }
 0x722   : > { %4500 = vst [vmem:[%s8190_s5 + $0x48] sm:$0xff] %v4468_v54 }
 0x723   : > { %4501 = vst [vmem:[%s8190_s5 + $0x50] sm:$0xff] %v4469_v57 }
 0x724   : > { %4502 = vst [vmem:[%s8190_s5 + $0x58] sm:$0xff] %v4470_v4 }
 0x725   : > { %4503 = vst [vmem:[%s8190_s5 + $0x60] sm:$0xff] %v4471_v8 }
 0x726   : > { %4504 = vst [vmem:[%s8190_s5 + $0x68] sm:$0xff] %v4472_v28 }
 0x727   : > { %4505 = vst [vmem:[%s8190_s5 + $0x70] sm:$0xff] %v4473_v15 }
 0x728   : > { %4506 = vst [vmem:[%s8190_s5 + $0x78] sm:$0xff] %v4474_v45 }
 0x729   : > { %4507 = vst [vmem:[%s8190_s5 + $0x80] sm:$0xff] %v4475_v36 }
 0x72a   : > { %4508 = vst [vmem:[%s8190_s5 + $0x88] sm:$0xff] %v4476_v58 }
 0x72b   : > { %4509 = vst [vmem:[%s8190_s5 + $0x90] sm:$0xff] %v4477_v23 }
 0x72c   : > { %4510 = vst [vmem:[%s8190_s5 + $0x98] sm:$0xff] %v4478_v48 }
 0x72d   : > { %4511 = vst [vmem:[%s8190_s5 + $0xa0] sm:$0xff] %v4479_v1 }
 0x72e   : > { %4512 = vst [vmem:[%s8190_s5 + $0xa8] sm:$0xff] %v4480_v44 }
 0x72f   : > { %4513 = vst [vmem:[%s8190_s5 + $0xb0] sm:$0xff] %v4481_v46 }
 0x730   : > { %4514 = vst [vmem:[%s8190_s5 + $0xb8] sm:$0xff] %v4482_v0 }
 0x731   : > { %4515 = vst [vmem:[%s8190_s5 + $0xc0] sm:$0xff] %v4483_v51 }
 0x732   : > { %4516 = vst [vmem:[%s8190_s5 + $0xc8] sm:$0xff] %v4484_v24 }
 0x733   : > { %4517 = vst [vmem:[%s8190_s5 + $0xd0] sm:$0xff] %v4485_v49 }
 0x734   : > { %4518 = vst [vmem:[%s8190_s5 + $0xd8] sm:$0xff] %v4486_v34 }
 0x735   : > { %4519 = vst [vmem:[%s8190_s5 + $0xe0] sm:$0xff] %v4487_v11 }
 0x736   : > { %4520 = vst [vmem:[%s8190_s5 + $0xe8] sm:$0xff] %v4488_v35 }
 0x737   : > { %4521 = vst [vmem:[%s8190_s5 + $0xf0] sm:$0xff] %v4489_v62 }
 0x738   : > { %4522 = vst [vmem:[%s8190_s5 + $0xf8] sm:$0xff] %v4490_v2 }
 0x739 PF: > { %s13_s12 = sadd.s32 1, %s5569_s12  }
 0x73a   : > { %p10_p4 = scmp.ge.s32.totalorder %s13_s12, 4  }
 0x73c   :  { %12 = sbr.rel (!%p10_p4) target bundleno = 1 (0x1), region = 66 }

</bundles_post_ra>
